<compile_context>
chip_gen: v5e
topology: v5e:2x2
jax: 0.10.0
libtpu: 0.0.40
codegen_flags: <defaults>
</compile_context>

<pallas_src>
import jax
import jax.numpy as jnp
from jax.experimental import pallas as pl
from jax.experimental.pallas import tpu as pltpu


def _round_up(n, k):
    return ((n + k - 1) // k) * k


def _num_tensorcore_tiles():
    """Grid tiles = number of TensorCores the Pallas device exposes (megacore)."""
    try:
        kind = jax.devices()[0].device_kind.lower()
    except Exception:
        return 1
    if any(tag in kind for tag in ("v7", "v4", "v5p")):
        return 2
    return 1


def _rnn_kernel(x_ref, wih_ref, whh_ref, bias_ref, wlin_ref, blin_ref, o_ref):
    """One batch tile: input projection + tanh recurrence + final linear + sigmoid."""
    TB = o_ref.shape[0]                      # batch-tile rows
    m = x_ref.shape[1]
    P = x_ref.shape[0] // TB                 # sequence length (x rows are time-major)
    hid = whh_ref.shape[0]                   # padded hidden width (multiple of 128)

    wih = wih_ref[...]                       # (m, hid)      bf16, resident across grid steps
    whh = whh_ref[...]                       # (hid, hid)    bf16
    bias = bias_ref[...]                     # (1, hid)      f32, = bih + bhh (zero in pads)

    # Prologue: the x @ Wih projection for all P steps has no serial dependence ->
    # a single MXU matmul with the fused bias added once, off the recurrence chain.
    xproj = jnp.dot(x_ref[...], wih, preferred_element_type=jnp.float32) + bias  # (P*TB, hid)

    # Two independent hidden-state carries (batch-tile halves) so their per-step
    # matmul / tanh interleave on MXU vs EUP.  TB is always a multiple of 16 here.
    if TB % 16 == 0:
        tbh = TB // 2
        offs = (0, tbh)
    else:
        tbh = TB
        offs = (0,)
    carries = [jnp.zeros((tbh, hid), jnp.float32) for _ in offs]

    # P is small and static -> fully unrolled recurrence; only h @ Whh + tanh on the
    # critical path.  Static, sublane-aligned slices of xproj per step.
    for t in range(P):
        pres = []
        for c, off in zip(carries, offs):
            row = t * TB + off
            pres.append(xproj[row:row + tbh, :]
                        + jnp.dot(c.astype(jnp.bfloat16), whh,
                                  preferred_element_type=jnp.float32))
        carries = [jnp.tanh(p) for p in pres]

    # TODO(synk): training-mode dropout (p=args.dropout) omitted — eval-mode identity.

    # Final linear projection (zero-padded to a lane-dense 128-wide output) + sigmoid.
    wlin = wlin_ref[...]                     # (hid, n_out_pad) bf16
    blin = blin_ref[...]                     # (1, n_out_pad)   f32
    for c, off in zip(carries, offs):
        o = jnp.dot(c.astype(jnp.bfloat16), wlin,
                    preferred_element_type=jnp.float32) + blin
        o_ref[off:off + tbh, :] = jax.nn.sigmoid(o).astype(o_ref.dtype)


def rnn_forward(x, params, *, max_tile=1024, num_tiles=None):
    """x: (B, P, m) float32.  params: padded bf16 weights, f32 fused bias / blin."""
    B, P, m = x.shape
    hid_pad = params["whh"].shape[0]
    n_out_pad = params["wlin"].shape[1]

    # One tile per TensorCore (grid=1 on v5e/v6e, 2 on v4/v5p/v7x); cap tile size.
    nb_target = _num_tensorcore_tiles() if num_tiles is None else num_tiles
    tb = min(_round_up(pl.cdiv(B, nb_target), 16), _round_up(max_tile, 16))
    b_pad = _round_up(B, tb)
    nb = b_pad // tb

    xb = x.astype(jnp.bfloat16)
    if b_pad != B:
        xb = jnp.pad(xb, ((0, b_pad - B), (0, 0), (0, 0)))      # zero rows are harmless
    # Tile-major / time-major / batch-minor 2D layout: each grid tile's rows are
    # contiguous, so the kernel's input projection is one big matmul and per-step
    # slices are static & sublane-aligned.
    x2d = xb.reshape(nb, tb, P, m).transpose(0, 2, 1, 3).reshape(nb * P * tb, m)

    cost = pl.CostEstimate(
        flops=2 * b_pad * (P * (m + hid_pad) * hid_pad + hid_pad * n_out_pad),
        transcendentals=b_pad * (P * hid_pad + n_out_pad),
        bytes_accessed=(x2d.size * 2
                        + (params["wih"].size + params["whh"].size + params["wlin"].size) * 2
                        + (params["bias"].size + params["blin"].size) * 4
                        + b_pad * n_out_pad * 4),
    )

    out_pad = pl.pallas_call(
        _rnn_kernel,
        out_shape=jax.ShapeDtypeStruct((b_pad, n_out_pad), jnp.float32),
        grid=(nb,),
        in_specs=[
            pl.BlockSpec((P * tb, m), lambda i: (i, 0)),          # x tile (double-buffered)
            pl.BlockSpec((m, hid_pad), lambda i: (0, 0)),         # weights: VMEM-resident
            pl.BlockSpec((hid_pad, hid_pad), lambda i: (0, 0)),
            pl.BlockSpec((1, hid_pad), lambda i: (0, 0)),
            pl.BlockSpec((hid_pad, n_out_pad), lambda i: (0, 0)),
            pl.BlockSpec((1, n_out_pad), lambda i: (0, 0)),
        ],
        out_specs=pl.BlockSpec((tb, n_out_pad), lambda i: (i, 0)),
        compiler_params=pltpu.CompilerParams(
            dimension_semantics=("parallel",),                    # megacore on dual-TC chips
        ),
        cost_estimate=cost,
    )(x2d, params["wih"], params["whh"], params["bias"], params["wlin"], params["blin"])

    return out_pad[:B, :m]                                        # drop batch + lane padding


def init_params(key, m, hidR):
    """Deterministic init matching nn.RNN / nn.Linear shapes (weights stored transposed,
    hidden width and output width zero-padded to lane-dense multiples of 128)."""
    ks = jax.random.split(key, 6)
    bound = 1.0 / jnp.sqrt(hidR)            # PyTorch init for nn.RNN and nn.Linear(hidR, m)
    hid_pad = _round_up(hidR, 128)
    n_out_pad = _round_up(m, 128)

    wih = jax.random.uniform(ks[0], (m, hidR), jnp.float32, -bound, bound)
    whh = jax.random.uniform(ks[1], (hidR, hidR), jnp.float32, -bound, bound)
    bih = jax.random.uniform(ks[2], (1, hidR), jnp.float32, -bound, bound)
    bhh = jax.random.uniform(ks[3], (1, hidR), jnp.float32, -bound, bound)
    wlin = jax.random.uniform(ks[4], (hidR, m), jnp.float32, -bound, bound)
    blin = jax.random.uniform(ks[5], (1, m), jnp.float32, -bound, bound)

    # Zero padding keeps padded hidden lanes exactly 0 through the recurrence and
    # padded output lanes inert (sliced off in the wrapper).
    wih_p = jnp.zeros((m, hid_pad), jnp.float32).at[:, :hidR].set(wih)
    whh_p = jnp.zeros((hid_pad, hid_pad), jnp.float32).at[:hidR, :hidR].set(whh)
    bias_p = jnp.zeros((1, hid_pad), jnp.float32).at[:, :hidR].set(bih + bhh)  # fused bias
    wlin_p = jnp.zeros((hid_pad, n_out_pad), jnp.float32).at[:hidR, :m].set(wlin)
    blin_p = jnp.zeros((1, n_out_pad), jnp.float32).at[:, :m].set(blin)

    return {
        "wih": wih_p.astype(jnp.bfloat16),
        "whh": whh_p.astype(jnp.bfloat16),
        "bias": bias_p,
        "wlin": wlin_p.astype(jnp.bfloat16),
        "blin": blin_p,
    }


if __name__ == "__main__":
    # Shapes implied by the module: window P=8, data.m=4, hidRNN=32; batch 256.
    B, P, m, hidR = 256, 8, 4, 32
    key = jax.random.PRNGKey(0)
    k_x, k_p = jax.random.split(key)

    x = jax.random.normal(k_x, (B, P, m), dtype=jnp.float32)
    params = init_params(k_p, m, hidR)

    out = jax.block_until_ready(rnn_forward(x, params))
    assert out.shape == (B, m)

    # Pure-JAX reference with the same bf16 weights / f32 accumulation.
    hid_pad = params["whh"].shape[0]
    xb = x.astype(jnp.bfloat16)
    xproj = (jnp.einsum("bpm,mh->bph", xb, params["wih"],
                        preferred_element_type=jnp.float32) + params["bias"])
    h = jnp.zeros((B, hid_pad), jnp.float32)
    for t in range(P):
        h = jnp.tanh(xproj[:, t, :]
                     + jnp.dot(h.astype(jnp.bfloat16), params["whh"],
                               preferred_element_type=jnp.float32))
    ref = jax.nn.sigmoid(
        jnp.dot(h.astype(jnp.bfloat16), params["wlin"],
                preferred_element_type=jnp.float32) + params["blin"])[:, :m]

    err = float(jnp.max(jnp.abs(out - ref)))
    assert jnp.allclose(out, ref, atol=2e-3, rtol=2e-3), err
    print("KERNEL_OK")
</pallas_src>

<mosaic_0001>
module attributes {stable_mosaic.version = 11 : i64} {
  func.func @_rnn_kernel(%arg0: i32, %arg1: memref<2048x4xbf16, #tpu.memory_space<vmem>>, %arg2: memref<4x128xbf16, #tpu.memory_space<vmem>>, %arg3: memref<128x128xbf16, #tpu.memory_space<vmem>>, %arg4: memref<1x128xf32, #tpu.memory_space<vmem>>, %arg5: memref<128x128xbf16, #tpu.memory_space<vmem>>, %arg6: memref<1x128xf32, #tpu.memory_space<vmem>>, %arg7: memref<256x128xf32, #tpu.memory_space<vmem>>) attributes {dimension_semantics = [#tpu.dimension_semantics<parallel>], iteration_bounds = array<i64: 1>, scalar_prefetch = 0 : i64, scratch_operands = 0 : i64, tpu.core_type = #tpu.core_type<tc>, window_params = [{transform_indices = @transform_0, window_bounds = array<i64: 2048, 4>}, {pipeline_mode = #tpu.pipeline_mode<synchronous>, transform_indices = @transform_1, window_bounds = array<i64: 4, 128>}, {pipeline_mode = #tpu.pipeline_mode<synchronous>, transform_indices = @transform_2, window_bounds = array<i64: 128, 128>}, {pipeline_mode = #tpu.pipeline_mode<synchronous>, transform_indices = @transform_3, window_bounds = array<i64: 1, 128>}, {pipeline_mode = #tpu.pipeline_mode<synchronous>, transform_indices = @transform_4, window_bounds = array<i64: 128, 128>}, {pipeline_mode = #tpu.pipeline_mode<synchronous>, transform_indices = @transform_5, window_bounds = array<i64: 1, 128>}, {transform_indices = @transform_6, window_bounds = array<i64: 256, 128>}]} {
    %c0 = arith.constant 0 : index
    %c0_0 = arith.constant 0 : index
    %0 = vector.load %arg2[%c0, %c0_0] : memref<4x128xbf16, #tpu.memory_space<vmem>>, vector<4x128xbf16>
    %c0_1 = arith.constant 0 : index
    %c0_2 = arith.constant 0 : index
    %1 = vector.load %arg3[%c0_1, %c0_2] : memref<128x128xbf16, #tpu.memory_space<vmem>>, vector<128x128xbf16>
    %c0_3 = arith.constant 0 : index
    %c0_4 = arith.constant 0 : index
    %2 = vector.load %arg4[%c0_3, %c0_4] : memref<1x128xf32, #tpu.memory_space<vmem>>, vector<1x128xf32>
    %c0_5 = arith.constant 0 : index
    %c0_6 = arith.constant 0 : index
    %3 = vector.load %arg1[%c0_5, %c0_6] : memref<2048x4xbf16, #tpu.memory_space<vmem>>, vector<2048x4xbf16>
    %cst = arith.constant dense<0.000000e+00> : vector<2048x128xf32>
    %4 = tpu.matmul %3, %0, %cst {dimension_numbers = #tpu.dot_dimension_numbers<[1], [0], [0], [1], [0, 0, 1, 1], [], []>} : vector<2048x4xbf16>, vector<4x128xbf16>, vector<2048x128xf32> -> vector<2048x128xf32>
    %5 = vector.broadcast %2 : vector<1x128xf32> to vector<2048x128xf32>
    %6 = arith.addf %4, %5 : vector<2048x128xf32>
    %cst_7 = arith.constant 0.000000e+00 : f32
    %7 = vector.broadcast %cst_7 : f32 to vector<128x128xf32>
    %cst_8 = arith.constant 0.000000e+00 : f32
    %8 = vector.broadcast %cst_8 : f32 to vector<128x128xf32>
    %9 = vector.extract_strided_slice %6 {offsets = [0, 0], sizes = [128, 128], strides = [1, 1]} : vector<2048x128xf32> to vector<128x128xf32>
    %10 = arith.truncf %7 : vector<128x128xf32> to vector<128x128xbf16>
    %cst_9 = arith.constant dense<0.000000e+00> : vector<128x128xf32>
    %11 = tpu.matmul %10, %1, %cst_9 {dimension_numbers = #tpu.dot_dimension_numbers<[1], [0], [0], [1], [0, 0, 1, 1], [], []>} : vector<128x128xbf16>, vector<128x128xbf16>, vector<128x128xf32> -> vector<128x128xf32>
    %12 = arith.addf %9, %11 : vector<128x128xf32>
    %13 = vector.extract_strided_slice %6 {offsets = [128, 0], sizes = [128, 128], strides = [1, 1]} : vector<2048x128xf32> to vector<128x128xf32>
    %14 = arith.truncf %8 : vector<128x128xf32> to vector<128x128xbf16>
    %cst_10 = arith.constant dense<0.000000e+00> : vector<128x128xf32>
    %15 = tpu.matmul %14, %1, %cst_10 {dimension_numbers = #tpu.dot_dimension_numbers<[1], [0], [0], [1], [0, 0, 1, 1], [], []>} : vector<128x128xbf16>, vector<128x128xbf16>, vector<128x128xf32> -> vector<128x128xf32>
    %16 = arith.addf %13, %15 : vector<128x128xf32>
    %17 = math.tanh %12 : vector<128x128xf32>
    %18 = math.tanh %16 : vector<128x128xf32>
    %19 = vector.extract_strided_slice %6 {offsets = [256, 0], sizes = [128, 128], strides = [1, 1]} : vector<2048x128xf32> to vector<128x128xf32>
    %20 = arith.truncf %17 : vector<128x128xf32> to vector<128x128xbf16>
    %cst_11 = arith.constant dense<0.000000e+00> : vector<128x128xf32>
    %21 = tpu.matmul %20, %1, %cst_11 {dimension_numbers = #tpu.dot_dimension_numbers<[1], [0], [0], [1], [0, 0, 1, 1], [], []>} : vector<128x128xbf16>, vector<128x128xbf16>, vector<128x128xf32> -> vector<128x128xf32>
    %22 = arith.addf %19, %21 : vector<128x128xf32>
    %23 = vector.extract_strided_slice %6 {offsets = [384, 0], sizes = [128, 128], strides = [1, 1]} : vector<2048x128xf32> to vector<128x128xf32>
    %24 = arith.truncf %18 : vector<128x128xf32> to vector<128x128xbf16>
    %cst_12 = arith.constant dense<0.000000e+00> : vector<128x128xf32>
    %25 = tpu.matmul %24, %1, %cst_12 {dimension_numbers = #tpu.dot_dimension_numbers<[1], [0], [0], [1], [0, 0, 1, 1], [], []>} : vector<128x128xbf16>, vector<128x128xbf16>, vector<128x128xf32> -> vector<128x128xf32>
    %26 = arith.addf %23, %25 : vector<128x128xf32>
    %27 = math.tanh %22 : vector<128x128xf32>
    %28 = math.tanh %26 : vector<128x128xf32>
    %29 = vector.extract_strided_slice %6 {offsets = [512, 0], sizes = [128, 128], strides = [1, 1]} : vector<2048x128xf32> to vector<128x128xf32>
    %30 = arith.truncf %27 : vector<128x128xf32> to vector<128x128xbf16>
    %cst_13 = arith.constant dense<0.000000e+00> : vector<128x128xf32>
    %31 = tpu.matmul %30, %1, %cst_13 {dimension_numbers = #tpu.dot_dimension_numbers<[1], [0], [0], [1], [0, 0, 1, 1], [], []>} : vector<128x128xbf16>, vector<128x128xbf16>, vector<128x128xf32> -> vector<128x128xf32>
    %32 = arith.addf %29, %31 : vector<128x128xf32>
    %33 = vector.extract_strided_slice %6 {offsets = [640, 0], sizes = [128, 128], strides = [1, 1]} : vector<2048x128xf32> to vector<128x128xf32>
    %34 = arith.truncf %28 : vector<128x128xf32> to vector<128x128xbf16>
    %cst_14 = arith.constant dense<0.000000e+00> : vector<128x128xf32>
    %35 = tpu.matmul %34, %1, %cst_14 {dimension_numbers = #tpu.dot_dimension_numbers<[1], [0], [0], [1], [0, 0, 1, 1], [], []>} : vector<128x128xbf16>, vector<128x128xbf16>, vector<128x128xf32> -> vector<128x128xf32>
    %36 = arith.addf %33, %35 : vector<128x128xf32>
    %37 = math.tanh %32 : vector<128x128xf32>
    %38 = math.tanh %36 : vector<128x128xf32>
    %39 = vector.extract_strided_slice %6 {offsets = [768, 0], sizes = [128, 128], strides = [1, 1]} : vector<2048x128xf32> to vector<128x128xf32>
    %40 = arith.truncf %37 : vector<128x128xf32> to vector<128x128xbf16>
    %cst_15 = arith.constant dense<0.000000e+00> : vector<128x128xf32>
    %41 = tpu.matmul %40, %1, %cst_15 {dimension_numbers = #tpu.dot_dimension_numbers<[1], [0], [0], [1], [0, 0, 1, 1], [], []>} : vector<128x128xbf16>, vector<128x128xbf16>, vector<128x128xf32> -> vector<128x128xf32>
    %42 = arith.addf %39, %41 : vector<128x128xf32>
    %43 = vector.extract_strided_slice %6 {offsets = [896, 0], sizes = [128, 128], strides = [1, 1]} : vector<2048x128xf32> to vector<128x128xf32>
    %44 = arith.truncf %38 : vector<128x128xf32> to vector<128x128xbf16>
    %cst_16 = arith.constant dense<0.000000e+00> : vector<128x128xf32>
    %45 = tpu.matmul %44, %1, %cst_16 {dimension_numbers = #tpu.dot_dimension_numbers<[1], [0], [0], [1], [0, 0, 1, 1], [], []>} : vector<128x128xbf16>, vector<128x128xbf16>, vector<128x128xf32> -> vector<128x128xf32>
    %46 = arith.addf %43, %45 : vector<128x128xf32>
    %47 = math.tanh %42 : vector<128x128xf32>
    %48 = math.tanh %46 : vector<128x128xf32>
    %49 = vector.extract_strided_slice %6 {offsets = [1024, 0], sizes = [128, 128], strides = [1, 1]} : vector<2048x128xf32> to vector<128x128xf32>
    %50 = arith.truncf %47 : vector<128x128xf32> to vector<128x128xbf16>
    %cst_17 = arith.constant dense<0.000000e+00> : vector<128x128xf32>
    %51 = tpu.matmul %50, %1, %cst_17 {dimension_numbers = #tpu.dot_dimension_numbers<[1], [0], [0], [1], [0, 0, 1, 1], [], []>} : vector<128x128xbf16>, vector<128x128xbf16>, vector<128x128xf32> -> vector<128x128xf32>
    %52 = arith.addf %49, %51 : vector<128x128xf32>
    %53 = vector.extract_strided_slice %6 {offsets = [1152, 0], sizes = [128, 128], strides = [1, 1]} : vector<2048x128xf32> to vector<128x128xf32>
    %54 = arith.truncf %48 : vector<128x128xf32> to vector<128x128xbf16>
    %cst_18 = arith.constant dense<0.000000e+00> : vector<128x128xf32>
    %55 = tpu.matmul %54, %1, %cst_18 {dimension_numbers = #tpu.dot_dimension_numbers<[1], [0], [0], [1], [0, 0, 1, 1], [], []>} : vector<128x128xbf16>, vector<128x128xbf16>, vector<128x128xf32> -> vector<128x128xf32>
    %56 = arith.addf %53, %55 : vector<128x128xf32>
    %57 = math.tanh %52 : vector<128x128xf32>
    %58 = math.tanh %56 : vector<128x128xf32>
    %59 = vector.extract_strided_slice %6 {offsets = [1280, 0], sizes = [128, 128], strides = [1, 1]} : vector<2048x128xf32> to vector<128x128xf32>
    %60 = arith.truncf %57 : vector<128x128xf32> to vector<128x128xbf16>
    %cst_19 = arith.constant dense<0.000000e+00> : vector<128x128xf32>
    %61 = tpu.matmul %60, %1, %cst_19 {dimension_numbers = #tpu.dot_dimension_numbers<[1], [0], [0], [1], [0, 0, 1, 1], [], []>} : vector<128x128xbf16>, vector<128x128xbf16>, vector<128x128xf32> -> vector<128x128xf32>
    %62 = arith.addf %59, %61 : vector<128x128xf32>
    %63 = vector.extract_strided_slice %6 {offsets = [1408, 0], sizes = [128, 128], strides = [1, 1]} : vector<2048x128xf32> to vector<128x128xf32>
    %64 = arith.truncf %58 : vector<128x128xf32> to vector<128x128xbf16>
    %cst_20 = arith.constant dense<0.000000e+00> : vector<128x128xf32>
    %65 = tpu.matmul %64, %1, %cst_20 {dimension_numbers = #tpu.dot_dimension_numbers<[1], [0], [0], [1], [0, 0, 1, 1], [], []>} : vector<128x128xbf16>, vector<128x128xbf16>, vector<128x128xf32> -> vector<128x128xf32>
    %66 = arith.addf %63, %65 : vector<128x128xf32>
    %67 = math.tanh %62 : vector<128x128xf32>
    %68 = math.tanh %66 : vector<128x128xf32>
    %69 = vector.extract_strided_slice %6 {offsets = [1536, 0], sizes = [128, 128], strides = [1, 1]} : vector<2048x128xf32> to vector<128x128xf32>
    %70 = arith.truncf %67 : vector<128x128xf32> to vector<128x128xbf16>
    %cst_21 = arith.constant dense<0.000000e+00> : vector<128x128xf32>
    %71 = tpu.matmul %70, %1, %cst_21 {dimension_numbers = #tpu.dot_dimension_numbers<[1], [0], [0], [1], [0, 0, 1, 1], [], []>} : vector<128x128xbf16>, vector<128x128xbf16>, vector<128x128xf32> -> vector<128x128xf32>
    %72 = arith.addf %69, %71 : vector<128x128xf32>
    %73 = vector.extract_strided_slice %6 {offsets = [1664, 0], sizes = [128, 128], strides = [1, 1]} : vector<2048x128xf32> to vector<128x128xf32>
    %74 = arith.truncf %68 : vector<128x128xf32> to vector<128x128xbf16>
    %cst_22 = arith.constant dense<0.000000e+00> : vector<128x128xf32>
    %75 = tpu.matmul %74, %1, %cst_22 {dimension_numbers = #tpu.dot_dimension_numbers<[1], [0], [0], [1], [0, 0, 1, 1], [], []>} : vector<128x128xbf16>, vector<128x128xbf16>, vector<128x128xf32> -> vector<128x128xf32>
    %76 = arith.addf %73, %75 : vector<128x128xf32>
    %77 = math.tanh %72 : vector<128x128xf32>
    %78 = math.tanh %76 : vector<128x128xf32>
    %79 = vector.extract_strided_slice %6 {offsets = [1792, 0], sizes = [128, 128], strides = [1, 1]} : vector<2048x128xf32> to vector<128x128xf32>
    %80 = arith.truncf %77 : vector<128x128xf32> to vector<128x128xbf16>
    %cst_23 = arith.constant dense<0.000000e+00> : vector<128x128xf32>
    %81 = tpu.matmul %80, %1, %cst_23 {dimension_numbers = #tpu.dot_dimension_numbers<[1], [0], [0], [1], [0, 0, 1, 1], [], []>} : vector<128x128xbf16>, vector<128x128xbf16>, vector<128x128xf32> -> vector<128x128xf32>
    %82 = arith.addf %79, %81 : vector<128x128xf32>
    %83 = vector.extract_strided_slice %6 {offsets = [1920, 0], sizes = [128, 128], strides = [1, 1]} : vector<2048x128xf32> to vector<128x128xf32>
    %84 = arith.truncf %78 : vector<128x128xf32> to vector<128x128xbf16>
    %cst_24 = arith.constant dense<0.000000e+00> : vector<128x128xf32>
    %85 = tpu.matmul %84, %1, %cst_24 {dimension_numbers = #tpu.dot_dimension_numbers<[1], [0], [0], [1], [0, 0, 1, 1], [], []>} : vector<128x128xbf16>, vector<128x128xbf16>, vector<128x128xf32> -> vector<128x128xf32>
    %86 = arith.addf %83, %85 : vector<128x128xf32>
    %87 = math.tanh %82 : vector<128x128xf32>
    %88 = math.tanh %86 : vector<128x128xf32>
    %c0_25 = arith.constant 0 : index
    %c0_26 = arith.constant 0 : index
    %89 = vector.load %arg5[%c0_25, %c0_26] : memref<128x128xbf16, #tpu.memory_space<vmem>>, vector<128x128xbf16>
    %c0_27 = arith.constant 0 : index
    %c0_28 = arith.constant 0 : index
    %90 = vector.load %arg6[%c0_27, %c0_28] : memref<1x128xf32, #tpu.memory_space<vmem>>, vector<1x128xf32>
    %91 = arith.truncf %87 : vector<128x128xf32> to vector<128x128xbf16>
    %cst_29 = arith.constant dense<0.000000e+00> : vector<128x128xf32>
    %92 = tpu.matmul %91, %89, %cst_29 {dimension_numbers = #tpu.dot_dimension_numbers<[1], [0], [0], [1], [0, 0, 1, 1], [], []>} : vector<128x128xbf16>, vector<128x128xbf16>, vector<128x128xf32> -> vector<128x128xf32>
    %93 = vector.broadcast %90 : vector<1x128xf32> to vector<128x128xf32>
    %94 = arith.addf %92, %93 : vector<128x128xf32>
    %95 = arith.negf %94 : vector<128x128xf32>
    %96 = math.exp %95 : vector<128x128xf32>
    %cst_30 = arith.constant 1.000000e+00 : f32
    %97 = vector.broadcast %cst_30 : f32 to vector<128x128xf32>
    %98 = arith.addf %97, %96 : vector<128x128xf32>
    %99 = arith.divf %97, %98 : vector<128x128xf32>
    %c0_31 = arith.constant 0 : index
    %c0_32 = arith.constant 0 : index
    %100 = vector.load %arg7[%c0_31, %c0_32] : memref<256x128xf32, #tpu.memory_space<vmem>>, vector<128x128xf32>
    tpu.vector_store %arg7[%c0_31, %c0_32], %99 {strides = array<i32>} : memref<256x128xf32, #tpu.memory_space<vmem>>, vector<128x128xf32>,
    %101 = arith.truncf %88 : vector<128x128xf32> to vector<128x128xbf16>
    %cst_33 = arith.constant dense<0.000000e+00> : vector<128x128xf32>
    %102 = tpu.matmul %101, %89, %cst_33 {dimension_numbers = #tpu.dot_dimension_numbers<[1], [0], [0], [1], [0, 0, 1, 1], [], []>} : vector<128x128xbf16>, vector<128x128xbf16>, vector<128x128xf32> -> vector<128x128xf32>
    %103 = vector.broadcast %90 : vector<1x128xf32> to vector<128x128xf32>
    %104 = arith.addf %102, %103 : vector<128x128xf32>
    %105 = arith.negf %104 : vector<128x128xf32>
    %106 = math.exp %105 : vector<128x128xf32>
    %cst_34 = arith.constant 1.000000e+00 : f32
    %107 = vector.broadcast %cst_34 : f32 to vector<128x128xf32>
    %108 = arith.addf %107, %106 : vector<128x128xf32>
    %109 = arith.divf %107, %108 : vector<128x128xf32>
    %c128 = arith.constant 128 : index
    %c0_35 = arith.constant 0 : index
    %110 = vector.load %arg7[%c128, %c0_35] : memref<256x128xf32, #tpu.memory_space<vmem>>, vector<128x128xf32>
    tpu.vector_store %arg7[%c128, %c0_35], %109 {strides = array<i32>} : memref<256x128xf32, #tpu.memory_space<vmem>>, vector<128x128xf32>,
    return
  }
  func.func @transform_0(%arg0: i32) -> (i32, i32) {
    %c0_i32 = arith.constant 0 : i32
    %c0_i32_0 = arith.constant 0 : i32
    return %arg0, %c0_i32 : i32, i32
  }
  func.func @transform_1(%arg0: i32) -> (i32, i32) {
    %c0_i32 = arith.constant 0 : i32
    %c0_i32_0 = arith.constant 0 : i32
    %c0_i32_1 = arith.constant 0 : i32
    return %c0_i32, %c0_i32_0 : i32, i32
  }
  func.func @transform_2(%arg0: i32) -> (i32, i32) {
    %c0_i32 = arith.constant 0 : i32
    %c0_i32_0 = arith.constant 0 : i32
    %c0_i32_1 = arith.constant 0 : i32
    return %c0_i32, %c0_i32_0 : i32, i32
  }
  func.func @transform_3(%arg0: i32) -> (i32, i32) {
    %c0_i32 = arith.constant 0 : i32
    %c0_i32_0 = arith.constant 0 : i32
    %c0_i32_1 = arith.constant 0 : i32
    return %c0_i32, %c0_i32_0 : i32, i32
  }
  func.func @transform_4(%arg0: i32) -> (i32, i32) {
    %c0_i32 = arith.constant 0 : i32
    %c0_i32_0 = arith.constant 0 : i32
    %c0_i32_1 = arith.constant 0 : i32
    return %c0_i32, %c0_i32_0 : i32, i32
  }
  func.func @transform_5(%arg0: i32) -> (i32, i32) {
    %c0_i32 = arith.constant 0 : i32
    %c0_i32_0 = arith.constant 0 : i32
    %c0_i32_1 = arith.constant 0 : i32
    return %c0_i32, %c0_i32_0 : i32, i32
  }
  func.func @transform_6(%arg0: i32) -> (i32, i32) {
    %c0_i32 = arith.constant 0 : i32
    %c0_i32_0 = arith.constant 0 : i32
    return %arg0, %c0_i32 : i32, i32
  }
}

</mosaic_0001>

<bundles_post_ra>
// kernel: tpu_custom_call.1
= control target key start
LH: loop header
LB: loop body
LE: loop exit
PB: predicated region body
PF: predicated region fallthrough
CT: control target
= control target key end

     0   :  { %vm1327_vm0 = vcmask 1041408   ;;  %vm942_vm1 = vcmask 31744   ;;  %s7858_s0 = inlined_call_operand.vmem [shape: bf16[2048,4], index: 0, kind: input, shape index: {}]   ;;  %s7859_s1 = inlined_call_operand.vmem [shape: bf16[4,128], index: 1, kind: input, shape index: {}]   ;;  %s7860_s2 = inlined_call_operand.vmem [shape: bf16[128,128], index: 2, kind: input, shape index: {}]   ;;  %s7861_s3 = inlined_call_operand.vmem [shape: f32[1,128], index: 3, kind: input, shape index: {}]   ;;  %s7862_s4 = inlined_call_operand.vmem [shape: bf16[128,128], index: 4, kind: input, shape index: {}]   ;;  %s7863_s5 = inlined_call_operand.vmem [shape: f32[1,128], index: 5, kind: input, shape index: {}]   ;;  %s7864_s6 = inlined_call_operand.hbm [shape: f32[256,128], index: 6, kind: output, shape index: {}]  }
   0x1   :  { %v25_v0 = vld [vmem:[%s7859_s1] sm:$0x3]  ;;  %v5038_v3 = vld [vmem:[%s7858_s0 + $0x218] sm:$0xff]  ;;  %v5072_v4 = vld [vmem:[%s7858_s0 + $0x328] sm:$0xff] }
   0x2   :  { %v1329_v1 = vsel %vm1327_vm0, %v25_v0, 0  ;;  %v4971_v2 = vld [vmem:[%s7858_s0] sm:$0xff] }
   0x3   :  { %1338 = vmatpush.bf16.msra.mxu0 %v1329_v1  ;;  %5107 = vmatpush.bf16.msra.mxu1 %v1329_v1 }
   0x4   :  { %5109 = vmatpush.bf16.msra.mxu3 %v1329_v1  ;;  %5108 = vmatpush.bf16.msra.mxu2 %v1329_v1 }
   0x5   :  { %11 = vsyncpa [#allocation3], 0  ;;  %v4972_v5 = vld [vmem:[%s7858_s0 + $0x8] sm:$0xff]  ;;  %v5039_v6 = vld [vmem:[%s7858_s0 + $0x220] sm:$0xff]  ;;  %s4215_s28 = sshll.u32 %s7864_s6, 4  ;;  %s5804_s1 = smov 128   ;;  %s4216_s28 = int_to_ptr.hbm [resolvable:$true] %s4215_s28 }
   0x6   :  { %4739 = vmatmul.msk.bf16.vlgmr.msra.gmra.mxu0 %vm942_vm1, %v4971_v2  ;;  %4806 = vmatmul.msk.bf16.vlgmr.msra.gmra.mxu1 %vm942_vm1, %v5038_v3  ;;  %v5073_v7 = vld [vmem:[%s7858_s0 + $0x330] sm:$0xff]  ;;  %v5040_v9 = vld [vmem:[%s7858_s0 + $0x228] sm:$0xff]  ;;  %v5074_v10 = vld [vmem:[%s7858_s0 + $0x338] sm:$0xff] }
   0x7   :  { %4840 = vmatmul.msk.bf16.vlgmr.msra.gmra.mxu3 %vm942_vm1, %v5072_v4  ;;  %v4973_v8 = vld [vmem:[%s7858_s0 + $0x10] sm:$0xff]  ;;  %v4974_v11 = vld [vmem:[%s7858_s0 + $0x18] sm:$0xff]  ;;  %v5075_v13 = vld [vmem:[%s7858_s0 + $0x340] sm:$0xff] }
   0x8   :  { %v5041_v12 = vld [vmem:[%s7858_s0 + $0x230] sm:$0xff]  ;;  %v4975_v14 = vld [vmem:[%s7858_s0 + $0x20] sm:$0xff]  ;;  %v5042_v15 = vld [vmem:[%s7858_s0 + $0x238] sm:$0xff] }
   0x9   :  { %v5076_v16 = vld [vmem:[%s7858_s0 + $0x348] sm:$0xff]  ;;  %v5043_v18 = vld [vmem:[%s7858_s0 + $0x240] sm:$0xff]  ;;  %v5077_v19 = vld [vmem:[%s7858_s0 + $0x350] sm:$0xff] }
   0xa   :  { %v4976_v17 = vld [vmem:[%s7858_s0 + $0x28] sm:$0xff]  ;;  %v4977_v20 = vld [vmem:[%s7858_s0 + $0x30] sm:$0xff]  ;;  %v5078_v22 = vld [vmem:[%s7858_s0 + $0x358] sm:$0xff] }
   0xb   :  { %v5044_v21 = vld [vmem:[%s7858_s0 + $0x248] sm:$0xff]  ;;  %v4978_v23 = vld [vmem:[%s7858_s0 + $0x38] sm:$0xff]  ;;  %v5045_v24 = vld [vmem:[%s7858_s0 + $0x250] sm:$0xff] }
   0xc   :  { %v5079_v25 = vld [vmem:[%s7858_s0 + $0x360] sm:$0xff]  ;;  %v5046_v27 = vld [vmem:[%s7858_s0 + $0x258] sm:$0xff]  ;;  %v5080_v30 = vld [vmem:[%s7858_s0 + $0x368] sm:$0xff] }
   0xd   :  { %v4979_v26 = vld [vmem:[%s7858_s0 + $0x40] sm:$0xff]  ;;  %v5959_v31 = vld [vmem:[%s7860_s2 + $0x38] sm:$0xff]  ;;  %v4980_v36 = vld [vmem:[%s7858_s0 + $0x48] sm:$0xff] }
   0xe   :  { %2028 = vmatpush.bf16.msrb.mxu1 %v5959_v31  ;;  %2222 = vmatpush.bf16.msrb.mxu3 %v5959_v31  ;;  %v5047_v37 = vld [vmem:[%s7858_s0 + $0x260] sm:$0xff]  ;;  %v5081_v40 = vld [vmem:[%s7858_s0 + $0x370] sm:$0xff]  ;;  %v5056_v41 = vld [vmem:[%s7858_s0 + $0x2a8] sm:$0xff] }
   0xf   :  { %2149 = vmatpush.bf16.msrb.mxu2 %v5959_v31  ;;  %v4981_v46 = vld [vmem:[%s7858_s0 + $0x50] sm:$0xff]  ;;  %v5048_v47 = vld [vmem:[%s7858_s0 + $0x268] sm:$0xff]  ;;  %v5082_v50 = vld [vmem:[%s7858_s0 + $0x378] sm:$0xff] }
  0x10   :  { %4824 = vmatmul.msk.bf16.vlgmr.msra.gmra.mxu2 %vm942_vm1, %v5056_v41  ;;  %v5057_v51 = vld [vmem:[%s7858_s0 + $0x2b0] sm:$0xff]  ;;  %v4982_v57 = vld [vmem:[%s7858_s0 + $0x58] sm:$0xff]  ;;  %v5083_v61 = vld [vmem:[%s7858_s0 + $0x380] sm:$0xff] }
  0x11   :  { %v6029_v55 = vld [vmem:[%s7860_s2 + $0x30] sm:$0xff]  ;;  %v5058_v62 = vld [vmem:[%s7858_s0 + $0x2b8] sm:$0xff]  ;;  %v4983_v3 = vld [vmem:[%s7858_s0 + $0x60] sm:$0xff] }
  0x12   :  { %2029 = vmatpush.bf16.msrb.mxu1 %v6029_v55  ;;  %2223 = vmatpush.bf16.msrb.mxu3 %v6029_v55  ;;  %v5049_v58 = vld [vmem:[%s7858_s0 + $0x270] sm:$0xff]  ;;  %v5050_v4 = vld [vmem:[%s7858_s0 + $0x278] sm:$0xff] }
  0x13   :  { %2150 = vmatpush.bf16.msrb.mxu2 %v6029_v55 }
  0x16   :  { %4740 = vmatmul.msk.bf16.gmra.mxu0 %vm942_vm1, %v4972_v5  ;;  %4807 = vmatmul.msk.bf16.gmra.mxu1 %vm942_vm1, %v5039_v6 }
  0x17   :  { %4841 = vmatmul.msk.bf16.gmra.mxu3 %vm942_vm1, %v5073_v7  ;;  %v5084_v7 = vld [vmem:[%s7858_s0 + $0x388] sm:$0xff] }
  0x20   :  { %4825 = vmatmul.msk.bf16.gmra.mxu2 %vm942_vm1, %v5057_v51  ;;  %v5053_v51 = vld [vmem:[%s7858_s0 + $0x290] sm:$0xff] }
  0x26   :  { %4741 = vmatmul.msk.bf16.gmra.mxu0 %vm942_vm1, %v4973_v8  ;;  %4808 = vmatmul.msk.bf16.gmra.mxu1 %vm942_vm1, %v5040_v9  ;;  %v5059_v8 = vld [vmem:[%s7858_s0 + $0x2c0] sm:$0xff] }
  0x27   :  { %4842 = vmatmul.msk.bf16.gmra.mxu3 %vm942_vm1, %v5074_v10 }
  0x30   :  { %4826 = vmatmul.msk.bf16.gmra.mxu2 %vm942_vm1, %v5058_v62  ;;  %v5062_v62 = vld [vmem:[%s7858_s0 + $0x2d8] sm:$0xff] }
  0x36   :  { %4742 = vmatmul.msk.bf16.gmra.mxu0 %vm942_vm1, %v4974_v11  ;;  %4809 = vmatmul.msk.bf16.gmra.mxu1 %vm942_vm1, %v5041_v12  ;;  %v6093_v12 = vld [vmem:[%s7860_s2 + $0x28] sm:$0xff] }
  0x37   :  { %4843 = vmatmul.msk.bf16.gmra.mxu3 %vm942_vm1, %v5075_v13  ;;  %2030 = vmatpush.bf16.msrb.mxu1 %v6093_v12 }
  0x38   :  { %2224 = vmatpush.bf16.msrb.mxu3 %v6093_v12  ;;  %2151 = vmatpush.bf16.msrb.mxu2 %v6093_v12 }
  0x40   :  { %4827 = vmatmul.msk.bf16.gmra.mxu2 %vm942_vm1, %v5059_v8 }
  0x46   :  { %4743 = vmatmul.msk.bf16.gmra.mxu0 %vm942_vm1, %v4975_v14  ;;  %4810 = vmatmul.msk.bf16.gmra.mxu1 %vm942_vm1, %v5042_v15  ;;  %v4984_v14 = vld [vmem:[%s7858_s0 + $0x68] sm:$0xff]  ;;  %v5051_v15 = vld [vmem:[%s7858_s0 + $0x280] sm:$0xff] }
  0x47   :  { %4844 = vmatmul.msk.bf16.gmra.mxu3 %vm942_vm1, %v5076_v16 }
  0x56   :  { %4744 = vmatmul.msk.bf16.gmra.mxu0 %vm942_vm1, %v4976_v17  ;;  %4811 = vmatmul.msk.bf16.gmra.mxu1 %vm942_vm1, %v5043_v18  ;;  %v5085_v18 = vld [vmem:[%s7858_s0 + $0x390] sm:$0xff] }
  0x57   :  { %4845 = vmatmul.msk.bf16.gmra.mxu3 %vm942_vm1, %v5077_v19  ;;  %v5060_v19 = vld [vmem:[%s7858_s0 + $0x2c8] sm:$0xff] }
  0x58   :  { %4828 = vmatmul.msk.bf16.gmra.mxu2 %vm942_vm1, %v5060_v19 }
  0x66   :  { %4745 = vmatmul.msk.bf16.gmra.mxu0 %vm942_vm1, %v4977_v20  ;;  %4812 = vmatmul.msk.bf16.gmra.mxu1 %vm942_vm1, %v5044_v21 }
  0x67   :  { %4846 = vmatmul.msk.bf16.gmra.mxu3 %vm942_vm1, %v5078_v22 }
  0x76   :  { %4746 = vmatmul.msk.bf16.gmra.mxu0 %vm942_vm1, %v4978_v23  ;;  %4813 = vmatmul.msk.bf16.gmra.mxu1 %vm942_vm1, %v5045_v24  ;;  %v4985_v24 = vld [vmem:[%s7858_s0 + $0x70] sm:$0xff] }
  0x77   :  { %4847 = vmatmul.msk.bf16.gmra.mxu3 %vm942_vm1, %v5079_v25  ;;  %v5052_v25 = vld [vmem:[%s7858_s0 + $0x288] sm:$0xff] }
  0x83   :  { %v5946_v28 = vpop.f32.mrf.mxu0  ;;  %v5948_v29 = vpop.f32.mrf.mxu1 }
  0x86   :  { %4747 = vmatmul.msk.bf16.gmra.mxu0 %vm942_vm1, %v4979_v26  ;;  %4814 = vmatmul.msk.bf16.gmra.mxu1 %vm942_vm1, %v5046_v27 }
  0x87   :  { %4848 = vmatmul.msk.bf16.gmra.mxu3 %vm942_vm1, %v5080_v30  ;;  %v5086_v30 = vld [vmem:[%s7858_s0 + $0x398] sm:$0xff] }
  0x8a   :  { %v5963_v32 = vpop.f32.mrf.mxu3 }
  0x8b   :  { %7867 = vst [vmem:[#allocation5_spill] sm:$0xff] %v5963_v32  ;;  %v5966_v33 = vpop.f32.mrf.mxu0  ;;  %v5968_v34 = vpop.f32.mrf.mxu1  ;;  %v7865_v32 = vmov 0  }
  0x92   :  { %v5970_v35 = vpop.f32.mrf.mxu3 }
  0x93   :  { %7868 = vst [vmem:[#allocation6_spill] sm:$0xff] %v5970_v35  ;;  %v5978_v38 = vpop.f32.mrf.mxu0  ;;  %v5980_v39 = vpop.f32.mrf.mxu1  ;;  %v5090_v35 = vld [vmem:[%s7858_s0 + $0x3b8] sm:$0xff] }
  0x96   :  { %4748 = vmatmul.msk.bf16.gmra.mxu0 %vm942_vm1, %v4980_v36  ;;  %4815 = vmatmul.msk.bf16.gmra.mxu1 %vm942_vm1, %v5047_v37  ;;  %v5061_v36 = vld [vmem:[%s7858_s0 + $0x2d0] sm:$0xff] }
  0x97   :  { %4849 = vmatmul.msk.bf16.gmra.mxu3 %vm942_vm1, %v5081_v40  ;;  %4829 = vmatmul.msk.bf16.gmra.mxu2 %vm942_vm1, %v5061_v36 }
  0x9a   :  { %v5992_v42 = vpop.f32.mrf.mxu3 }
  0x9b   :  { %7869 = vst [vmem:[#allocation7_spill] sm:$0xff] %v5992_v42  ;;  %v5994_v43 = vpop.f32.mrf.mxu0  ;;  %v5996_v44 = vpop.f32.mrf.mxu1 }
  0x9c   :  { %v6290_v42 = vpop.f32.mrf.mxu2 }
  0x9d   :  { %7899 = vst [vmem:[#allocation37_spill] sm:$0xff] %v6290_v42 }
  0xa2   :  { %v5998_v45 = vpop.f32.mrf.mxu3 }
  0xa3   :  { %7870 = vst [vmem:[#allocation8_spill] sm:$0xff] %v5998_v45  ;;  %v6006_v48 = vpop.f32.mrf.mxu0  ;;  %v6008_v49 = vpop.f32.mrf.mxu1 }
  0xa6   :  { %4749 = vmatmul.msk.bf16.gmra.mxu0 %vm942_vm1, %v4981_v46  ;;  %4816 = vmatmul.msk.bf16.gmra.mxu1 %vm942_vm1, %v5048_v47  ;;  %v6157_v46 = vld [vmem:[%s7860_s2 + $0x20] sm:$0xff] }
  0xa7   :  { %4850 = vmatmul.msk.bf16.gmra.mxu3 %vm942_vm1, %v5082_v50  ;;  %v4986_v50 = vld [vmem:[%s7858_s0 + $0x78] sm:$0xff]  ;;  %2031 = vmatpush.bf16.msrb.mxu1 %v6157_v46 }
  0xa8   :  { %2225 = vmatpush.bf16.msrb.mxu3 %v6157_v46  ;;  %2152 = vmatpush.bf16.msrb.mxu2 %v6157_v46 }
  0xa9   :  { %4830 = vmatmul.msk.bf16.gmra.mxu2 %vm942_vm1, %v5062_v62 }
  0xaa   :  { %v6020_v52 = vpop.f32.mrf.mxu3 }
  0xab   :  { %7871 = vst [vmem:[#allocation9_spill] sm:$0xff] %v6020_v52  ;;  %v6022_v53 = vpop.f32.mrf.mxu0  ;;  %v6024_v54 = vpop.f32.mrf.mxu1 }
  0xb2   :  { %v6034_v56 = vpop.f32.mrf.mxu3 }
  0xb3   :  { %7872 = vst [vmem:[#allocation10_spill] sm:$0xff] %v6034_v56  ;;  %v6042_v59 = vpop.f32.mrf.mxu0  ;;  %v6044_v60 = vpop.f32.mrf.mxu1 }
  0xb4   :  { %7873 = vst [vmem:[#allocation11_spill] sm:$0xff] %v6044_v60 }
  0xb6   :  { %4750 = vmatmul.msk.bf16.gmra.mxu0 %vm942_vm1, %v4982_v57  ;;  %4817 = vmatmul.msk.bf16.gmra.mxu1 %vm942_vm1, %v5049_v58 }
  0xb7   :  { %4851 = vmatmul.msk.bf16.gmra.mxu3 %vm942_vm1, %v5083_v61  ;;  %v5087_v61 = vld [vmem:[%s7858_s0 + $0x3a0] sm:$0xff] }
  0xba   :  { %v6056_v63 = vpop.f32.mrf.mxu3 }
  0xbb   :  { %7874 = vst [vmem:[#allocation12_spill] sm:$0xff] %v6056_v63  ;;  %v6058_v0 = vpop.f32.mrf.mxu0  ;;  %v6060_v1 = vpop.f32.mrf.mxu1 }
  0xbc   :  { %7875 = vst [vmem:[#allocation13_spill] sm:$0xff] %v6060_v1 }
  0xc2   :  { %v6062_v2 = vpop.f32.mrf.mxu3 }
  0xc3   :  { %7876 = vst [vmem:[#allocation14_spill] sm:$0xff] %v6062_v2  ;;  %v6070_v5 = vpop.f32.mrf.mxu0  ;;  %v6072_v6 = vpop.f32.mrf.mxu1 }
  0xc4   :  { %7877 = vst [vmem:[#allocation15_spill] sm:$0xff] %v6072_v6 }
  0xc6   :  { %4751 = vmatmul.msk.bf16.gmra.mxu0 %vm942_vm1, %v4983_v3  ;;  %4818 = vmatmul.msk.bf16.gmra.mxu1 %vm942_vm1, %v5050_v4  ;;  %v6183_v3 = vld [vmem:[%s7860_s2 + $0x18] sm:$0xff]  ;;  %v6194_v4 = vld [vmem:[%s7860_s2 + $0x10] sm:$0xff] }
  0xc7   :  { %4852 = vmatmul.msk.bf16.gmra.mxu3 %vm942_vm1, %v5084_v7  ;;  %2032 = vmatpush.bf16.msrb.mxu1 %v6183_v3 }
  0xc8   :  { %2226 = vmatpush.bf16.msrb.mxu3 %v6183_v3  ;;  %2153 = vmatpush.bf16.msrb.mxu2 %v6183_v3 }
  0xca   :  { %v6084_v9 = vpop.f32.mrf.mxu3 }
  0xcb   :  { %7878 = vst [vmem:[#allocation16_spill] sm:$0xff] %v6084_v9  ;;  %v6086_v10 = vpop.f32.mrf.mxu0  ;;  %v6088_v11 = vpop.f32.mrf.mxu1  ;;  %2033 = vmatpush.bf16.msrb.mxu1 %v6194_v4  ;;  %v7910_v9 = vmov 0  }
  0xcc   :  { %7879 = vst [vmem:[#allocation17_spill] sm:$0xff] %v6088_v11  ;;  %2227 = vmatpush.bf16.msrb.mxu3 %v6194_v4  ;;  %2154 = vmatpush.bf16.msrb.mxu2 %v6194_v4 }
  0xd2   :  { %v6098_v13 = vpop.f32.mrf.mxu3 }
  0xd3   :  { %7880 = vst [vmem:[#allocation18_spill] sm:$0xff] %v6098_v13  ;;  %v6106_v16 = vpop.f32.mrf.mxu0  ;;  %v6108_v17 = vpop.f32.mrf.mxu1  ;;  %v5091_v13 = vld [vmem:[%s7858_s0 + $0x3c0] sm:$0xff] }
  0xd4   :  { %7881 = vst [vmem:[#allocation19_spill] sm:$0xff] %v6108_v17 }
  0xd6   :  { %4752 = vmatmul.msk.bf16.gmra.mxu0 %vm942_vm1, %v4984_v14  ;;  %4819 = vmatmul.msk.bf16.gmra.mxu1 %vm942_vm1, %v5051_v15  ;;  %v6207_v15 = vld [vmem:[%s7860_s2 + $0x8] sm:$0xff] }
  0xd7   :  { %4853 = vmatmul.msk.bf16.gmra.mxu3 %vm942_vm1, %v5085_v18  ;;  %2034 = vmatpush.bf16.msrb.mxu1 %v6207_v15  ;;  %v6216_v18 = vld [vmem:[%s7860_s2] sm:$0xff] }
  0xd8   :  { %2228 = vmatpush.bf16.msrb.mxu3 %v6207_v15  ;;  %2155 = vmatpush.bf16.msrb.mxu2 %v6207_v15 }
  0xda   :  { %v6120_v20 = vpop.f32.mrf.mxu3 }
  0xdb   :  { %7882 = vst [vmem:[#allocation20_spill] sm:$0xff] %v6120_v20  ;;  %v6122_v21 = vpop.f32.mrf.mxu0  ;;  %v6124_v22 = vpop.f32.mrf.mxu1  ;;  %2035 = vmatpush.bf16.msrb.mxu1 %v6216_v18 }
  0xdc   :  { %7883 = vst [vmem:[#allocation21_spill] sm:$0xff] %v6124_v22  ;;  %2229 = vmatpush.bf16.msrb.mxu3 %v6216_v18  ;;  %2156 = vmatpush.bf16.msrb.mxu2 %v6216_v18 }
  0xdf   :  { %2327 = vmatpush.bf16.msra.mxu1 %v5959_v31 }
  0xe0   :  { %2400 = vmatpush.bf16.msra.mxu2 %v5959_v31  ;;  %2505 = vmatpush.bf16.msra.mxu3 %v5959_v31 }
  0xe2   :  { %v6126_v23 = vpop.f32.mrf.mxu3 }
  0xe3   :  { %7884 = vst [vmem:[#allocation22_spill] sm:$0xff] %v6126_v23  ;;  %v6134_v26 = vpop.f32.mrf.mxu0  ;;  %v6136_v27 = vpop.f32.mrf.mxu1  ;;  %2328 = vmatpush.bf16.msra.mxu1 %v6029_v55 }
  0xe4   :  { %7885 = vst [vmem:[#allocation23_spill] sm:$0xff] %v6136_v27  ;;  %2401 = vmatpush.bf16.msra.mxu2 %v6029_v55  ;;  %2506 = vmatpush.bf16.msra.mxu3 %v6029_v55 }
  0xe6   :  { %4753 = vmatmul.msk.bf16.gmra.mxu0 %vm942_vm1, %v4985_v24  ;;  %4820 = vmatmul.msk.bf16.gmra.mxu1 %vm942_vm1, %v5052_v25  ;;  %v4987_v24 = vld [vmem:[%s7858_s0 + $0x80] sm:$0xff]  ;;  %v5054_v25 = vld [vmem:[%s7858_s0 + $0x298] sm:$0xff] }
  0xe7   :  { %4854 = vmatmul.msk.bf16.gmra.mxu3 %vm942_vm1, %v5086_v30  ;;  %2329 = vmatpush.bf16.msra.mxu1 %v6093_v12 }
  0xe8   :  { %2402 = vmatpush.bf16.msra.mxu2 %v6093_v12  ;;  %2507 = vmatpush.bf16.msra.mxu3 %v6093_v12 }
  0xea   :  { %v6148_v37 = vpop.f32.mrf.mxu3 }
  0xeb   :  { %7886 = vst [vmem:[#allocation24_spill] sm:$0xff] %v6148_v37  ;;  %v6150_v40 = vpop.f32.mrf.mxu0  ;;  %v6152_v41 = vpop.f32.mrf.mxu1  ;;  %2330 = vmatpush.bf16.msra.mxu1 %v6157_v46 }
  0xec   :  { %7887 = vst [vmem:[#allocation25_spill] sm:$0xff] %v6152_v41  ;;  %2403 = vmatpush.bf16.msra.mxu2 %v6157_v46  ;;  %2508 = vmatpush.bf16.msra.mxu3 %v6157_v46 }
  0xef   :  { %2331 = vmatpush.bf16.msra.mxu1 %v6183_v3 }
  0xf0   :  { %2404 = vmatpush.bf16.msra.mxu2 %v6183_v3  ;;  %2509 = vmatpush.bf16.msra.mxu3 %v6183_v3 }
  0xf2   :  { %v6159_v47 = vpop.f32.mrf.mxu3 }
  0xf3   :  { %7888 = vst [vmem:[#allocation26_spill] sm:$0xff] %v6159_v47  ;;  %v6167_v57 = vpop.f32.mrf.mxu0  ;;  %v6169_v58 = vpop.f32.mrf.mxu1  ;;  %2332 = vmatpush.bf16.msra.mxu1 %v6194_v4 }
  0xf4   :  { %7889 = vst [vmem:[#allocation27_spill] sm:$0xff] %v6169_v58  ;;  %2405 = vmatpush.bf16.msra.mxu2 %v6194_v4  ;;  %2510 = vmatpush.bf16.msra.mxu3 %v6194_v4 }
  0xf6   :  { %4754 = vmatmul.msk.bf16.gmra.mxu0 %vm942_vm1, %v4986_v50  ;;  %4821 = vmatmul.msk.bf16.gmra.mxu1 %vm942_vm1, %v5053_v51  ;;  %v5088_v50 = vld [vmem:[%s7858_s0 + $0x3a8] sm:$0xff]  ;;  %v5063_v51 = vld [vmem:[%s7858_s0 + $0x2e0] sm:$0xff] }
  0xf7   :  { %4855 = vmatmul.msk.bf16.gmra.mxu3 %vm942_vm1, %v5087_v61  ;;  %4831 = vmatmul.msk.bf16.gmra.mxu2 %vm942_vm1, %v5063_v51 }
  0xf8   :  { %2333 = vmatpush.bf16.msra.mxu1 %v6207_v15  ;;  %2406 = vmatpush.bf16.msra.mxu2 %v6207_v15 }
  0xf9   :  { %2511 = vmatpush.bf16.msra.mxu3 %v6207_v15 }
  0xfa   :  { %v6197_v7 = vpop.f32.mrf.mxu3 }
  0xfb   :  { %7890 = vst [vmem:[#allocation28_spill] sm:$0xff] %v6197_v7  ;;  %v6199_v8 = vpop.f32.mrf.mxu0  ;;  %v6201_v14 = vpop.f32.mrf.mxu1 }
  0xfc   :  { %7891 = vst [vmem:[#allocation29_spill] sm:$0xff] %v6201_v14  ;;  %2334 = vmatpush.bf16.msra.mxu1 %v6216_v18  ;;  %2407 = vmatpush.bf16.msra.mxu2 %v6216_v18 }
  0xfd   :  { %2512 = vmatpush.bf16.msra.mxu3 %v6216_v18 }
 0x102   :  { %v6219_v19 = vpop.f32.mrf.mxu3 }
 0x103   :  { %7892 = vst [vmem:[#allocation30_spill] sm:$0xff] %v6219_v19  ;;  %v6227_v30 = vpop.f32.mrf.mxu0  ;;  %v6229_v36 = vpop.f32.mrf.mxu1 }
 0x104   :  { %7893 = vst [vmem:[#allocation31_spill] sm:$0xff] %v6229_v36 }
 0x106   :  { %4755 = vmatmul.msk.bf16.gmra.mxu0 %vm942_vm1, %v4987_v24  ;;  %4822 = vmatmul.msk.bf16.gmra.mxu1 %vm942_vm1, %v5054_v25  ;;  %v4988_v25 = vld [vmem:[%s7858_s0 + $0x88] sm:$0xff] }
 0x107   :  { %4856 = vmatmul.msk.bf16.gmra.mxu3 %vm942_vm1, %v5088_v50  ;;  %v5055_v50 = vld [vmem:[%s7858_s0 + $0x2a0] sm:$0xff] }
 0x10a   :  { %v6248_v61 = vpop.f32.mrf.mxu3 }
 0x10b   :  { %7894 = vst [vmem:[#allocation32_spill] sm:$0xff] %v6248_v61  ;;  %v6250_v62 = vpop.f32.mrf.mxu0  ;;  %v6252_v56 = vpop.f32.mrf.mxu1  ;;  %v5089_v61 = vld [vmem:[%s7858_s0 + $0x3b0] sm:$0xff] }
 0x10c   :  { %7895 = vst [vmem:[#allocation33_spill] sm:$0xff] %v6252_v56 }
 0x112   :  { %v6260_v24 = vpop.f32.mrf.mxu3 }
 0x113   :  { %7896 = vst [vmem:[#allocation34_spill] sm:$0xff] %v6260_v24  ;;  %v6268_v51 = vpop.f32.mrf.mxu0  ;;  %v6270_v52 = vpop.f32.mrf.mxu1  ;;  %v5064_v24 = vld [vmem:[%s7858_s0 + $0x2e8] sm:$0xff] }
 0x114   :  { %7897 = vst [vmem:[#allocation35_spill] sm:$0xff] %v6270_v52  ;;  %4832 = vmatmul.msk.bf16.gmra.mxu2 %vm942_vm1, %v5064_v24  ;;  %v4989_v24 = vld [vmem:[%s7858_s0 + $0x90] sm:$0xff] }
 0x116   :  { %4756 = vmatmul.msk.bf16.gmra.mxu0 %vm942_vm1, %v4988_v25  ;;  %4823 = vmatmul.msk.bf16.gmra.mxu1 %vm942_vm1, %v5055_v50  ;;  %v6307_v25 = vpop.f32.mrf.mxu2 }
 0x117   :  { %4857 = vmatmul.msk.bf16.gmra.mxu3 %vm942_vm1, %v5089_v61  ;;  %7902 = vst [vmem:[#allocation40_spill] sm:$0xff] %v6307_v25 }
 0x11a   :  { %v6288_v45 = vpop.f32.mrf.mxu3 }
 0x11b   :  { %7898 = vst [vmem:[#allocation36_spill] sm:$0xff] %v6288_v45  ;;  %v6292_v19 = vpop.f32.mrf.mxu0  ;;  %v6294_v7 = vpop.f32.mrf.mxu1 }
 0x11c   :  { %7900 = vst [vmem:[#allocation38_spill] sm:$0xff] %v6294_v7 }
 0x11e   :  { %v6328_v37 = vpop.f32.mrf.mxu2 }
 0x11f   :  { %7905 = vst [vmem:[#allocation43_spill] sm:$0xff] %v6328_v37 }
 0x122   :  { %v6302_v61 = vpop.f32.mrf.mxu3 }
 0x123   :  { %7901 = vst [vmem:[#allocation39_spill] sm:$0xff] %v6302_v61  ;;  %v6309_v50 = vpop.f32.mrf.mxu0  ;;  %v6311_v45 = vpop.f32.mrf.mxu1  ;;  %v5065_v61 = vld [vmem:[%s7858_s0 + $0x2f0] sm:$0xff] }
 0x124   :  { %7903 = vst [vmem:[#allocation41_spill] sm:$0xff] %v6311_v45  ;;  %4833 = vmatmul.msk.bf16.gmra.mxu2 %vm942_vm1, %v5065_v61 }
 0x126   :  { %4757 = vmatmul.msk.bf16.gmra.mxu0 %vm942_vm1, %v4989_v24  ;;  %2036 = vmatmul.bf16.vlgmr.msrb.gmra.mxu1 %v7865_v32  ;;  %v6341_v61 = vpop.f32.mrf.mxu2 }
 0x127   :  { %4858 = vmatmul.msk.bf16.gmra.mxu3 %vm942_vm1, %v5090_v35  ;;  %2578 = vmatpush.bf16.msrb.mxu1 %v5959_v31  ;;  %v4990_v35 = vld [vmem:[%s7858_s0 + $0x98] sm:$0xff]  ;;  %7908 = vst [vmem:[#allocation46_spill] sm:$0xff] %v6341_v61 }
 0x12a   :  { %v6326_v47 = vpop.f32.mrf.mxu3 }
 0x12b   :  { %7904 = vst [vmem:[#allocation42_spill] sm:$0xff] %v6326_v47  ;;  %v6330_v23 = vpop.f32.mrf.mxu0  ;;  %v6332_v20 = vpop.f32.mrf.mxu1  ;;  %2579 = vmatpush.bf16.msrb.mxu1 %v6029_v55 }
 0x12c   :  { %7906 = vst [vmem:[#allocation44_spill] sm:$0xff] %v6332_v20 }
 0x12e   :  { %v6361_v63 = vpop.f32.mrf.mxu2 }
 0x12f   :  { %2580 = vmatpush.bf16.msrb.mxu1 %v6093_v12  ;;  %7912 = vst [vmem:[#allocation49_spill] sm:$0xff] %v6361_v63  ;;  %v5092_v63 = vld [vmem:[%s7858_s0 + $0x3c8] sm:$0xff] }
 0x132   :  { %v6336_v24 = vpop.f32.mrf.mxu3 }
 0x133   :  { %7907 = vst [vmem:[#allocation45_spill] sm:$0xff] %v6336_v24  ;;  %v6343_v32 = vpop.f32.mrf.mxu0  ;;  %v6345_v47 = vpop.f32.mrf.mxu1  ;;  %2581 = vmatpush.bf16.msrb.mxu1 %v6157_v46  ;;  %v5066_v24 = vld [vmem:[%s7858_s0 + $0x2f8] sm:$0xff] }
 0x134   :  { %7909 = vst [vmem:[#allocation47_spill] sm:$0xff] %v6345_v47  ;;  %4834 = vmatmul.msk.bf16.gmra.mxu2 %vm942_vm1, %v5066_v24 }
 0x136   :  { %4758 = vmatmul.msk.bf16.gmra.mxu0 %vm942_vm1, %v4990_v35  ;;  %2041 = vmatmul.bf16.gmra.mxu1 %v7910_v9  ;;  %v6374_v24 = vpop.f32.mrf.mxu2 }
 0x137   :  { %4859 = vmatmul.msk.bf16.gmra.mxu3 %vm942_vm1, %v5091_v13  ;;  %2582 = vmatpush.bf16.msrb.mxu1 %v6183_v3  ;;  %v4991_v13 = vld [vmem:[%s7858_s0 + $0xa0] sm:$0xff]  ;;  %7915 = vst [vmem:[#allocation52_spill] sm:$0xff] %v6374_v24 }
 0x13a   :  { %v6359_v2 = vpop.f32.mrf.mxu3 }
 0x13b   :  { %7911 = vst [vmem:[#allocation48_spill] sm:$0xff] %v6359_v2  ;;  %v6363_v61 = vpop.f32.mrf.mxu0  ;;  %v6365_v37 = vpop.f32.mrf.mxu1  ;;  %2583 = vmatpush.bf16.msrb.mxu1 %v6194_v4 }
 0x13c   :  { %7913 = vst [vmem:[#allocation50_spill] sm:$0xff] %v6365_v37 }
 0x13e   :  { %v6393_v42 = vpop.f32.mrf.mxu2 }
 0x13f   :  { %2584 = vmatpush.bf16.msrb.mxu1 %v6207_v15  ;;  %7918 = vst [vmem:[#allocation55_spill] sm:$0xff] %v6393_v42 }
 0x142   :  { %v6369_v35 = vpop.f32.mrf.mxu3 }
 0x143   :  { %7914 = vst [vmem:[#allocation51_spill] sm:$0xff] %v6369_v35  ;;  %v6376_v25 = vpop.f32.mrf.mxu0  ;;  %v6378_v2 = vpop.f32.mrf.mxu1  ;;  %2585 = vmatpush.bf16.msrb.mxu1 %v6216_v18  ;;  %v5067_v35 = vld [vmem:[%s7858_s0 + $0x300] sm:$0xff] }
 0x144   :  { %7916 = vst [vmem:[#allocation53_spill] sm:$0xff] %v6378_v2  ;;  %4835 = vmatmul.msk.bf16.gmra.mxu2 %vm942_vm1, %v5067_v35  ;;  %v5093_v35 = vld [vmem:[%s7858_s0 + $0x3d0] sm:$0xff] }
 0x146   :  { %4759 = vmatmul.msk.bf16.gmra.mxu0 %vm942_vm1, %v4991_v13  ;;  %2046 = vmatmul.bf16.gmra.mxu1 %v7910_v9  ;;  %v4992_v13 = vld [vmem:[%s7858_s0 + $0xa8] sm:$0xff]  ;;  %v6404_v20 = vpop.f32.mrf.mxu2 }
 0x147   :  { %4860 = vmatmul.msk.bf16.gmra.mxu3 %vm942_vm1, %v5092_v63  ;;  %7921 = vst [vmem:[#allocation58_spill] sm:$0xff] %v6404_v20 }
 0x14a   :  { %v6391_v24 = vpop.f32.mrf.mxu3 }
 0x14b   :  { %7917 = vst [vmem:[#allocation54_spill] sm:$0xff] %v6391_v24  ;;  %v6395_v2 = vpop.f32.mrf.mxu0  ;;  %v6397_v37 = vpop.f32.mrf.mxu1  ;;  %v5068_v24 = vld [vmem:[%s7858_s0 + $0x308] sm:$0xff] }
 0x14c   :  { %7919 = vst [vmem:[#allocation56_spill] sm:$0xff] %v6397_v37 }
 0x14e   :  { %v6422_v20 = vpop.f32.mrf.mxu2 }
 0x14f   :  { %7924 = vst [vmem:[#allocation61_spill] sm:$0xff] %v6422_v20 }
 0x152   :  { %v6399_v47 = vpop.f32.mrf.mxu3 }
 0x153   :  { %7920 = vst [vmem:[#allocation57_spill] sm:$0xff] %v6399_v47  ;;  %v6406_v45 = vpop.f32.mrf.mxu0  ;;  %v6408_v63 = vpop.f32.mrf.mxu1 }
 0x154   :  { %7922 = vst [vmem:[#allocation59_spill] sm:$0xff] %v6408_v63  ;;  %4836 = vmatmul.msk.bf16.gmra.mxu2 %vm942_vm1, %v5068_v24  ;;  %v5094_v24 = vld [vmem:[%s7858_s0 + $0x3d8] sm:$0xff] }
 0x156   :  { %4760 = vmatmul.msk.bf16.gmra.mxu0 %vm942_vm1, %v4992_v13  ;;  %2051 = vmatmul.bf16.gmra.mxu1 %v7910_v9  ;;  %v4993_v13 = vld [vmem:[%s7858_s0 + $0xb0] sm:$0xff]  ;;  %v6433_v7 = vpop.f32.mrf.mxu2 }
 0x157   :  { %4861 = vmatmul.msk.bf16.gmra.mxu3 %vm942_vm1, %v5093_v35  ;;  %7927 = vst [vmem:[#allocation64_spill] sm:$0xff] %v6433_v7 }
 0x15a   :  { %v6420_v47 = vpop.f32.mrf.mxu3 }
 0x15b   :  { %7923 = vst [vmem:[#allocation60_spill] sm:$0xff] %v6420_v47  ;;  %v6424_v42 = vpop.f32.mrf.mxu0  ;;  %v6426_v63 = vpop.f32.mrf.mxu1  ;;  %v5069_v47 = vld [vmem:[%s7858_s0 + $0x310] sm:$0xff] }
 0x15c   :  { %7925 = vst [vmem:[#allocation62_spill] sm:$0xff] %v6426_v63 }
 0x15e   :  { %v6451_v7 = vpop.f32.mrf.mxu2 }
 0x15f   :  { %7930 = vst [vmem:[#allocation67_spill] sm:$0xff] %v6451_v7 }
 0x162   :  { %v6428_v37 = vpop.f32.mrf.mxu3 }
 0x163   :  { %7926 = vst [vmem:[#allocation63_spill] sm:$0xff] %v6428_v37  ;;  %v6435_v52 = vpop.f32.mrf.mxu0  ;;  %v6437_v35 = vpop.f32.mrf.mxu1 }
 0x164   :  { %7928 = vst [vmem:[#allocation65_spill] sm:$0xff] %v6437_v35  ;;  %4837 = vmatmul.msk.bf16.gmra.mxu2 %vm942_vm1, %v5069_v47  ;;  %v5095_v47 = vld [vmem:[%s7858_s0 + $0x3e0] sm:$0xff] }
 0x166   :  { %4761 = vmatmul.msk.bf16.gmra.mxu0 %vm942_vm1, %v4993_v13  ;;  %2056 = vmatmul.bf16.gmra.mxu1 %v7910_v9  ;;  %v4994_v13 = vld [vmem:[%s7858_s0 + $0xb8] sm:$0xff]  ;;  %v6462_v56 = vpop.f32.mrf.mxu2 }
 0x167   :  { %4862 = vmatmul.msk.bf16.gmra.mxu3 %vm942_vm1, %v5094_v24  ;;  %7933 = vst [vmem:[#allocation70_spill] sm:$0xff] %v6462_v56 }
 0x16a   :  { %v6449_v37 = vpop.f32.mrf.mxu3 }
 0x16b   :  { %7929 = vst [vmem:[#allocation66_spill] sm:$0xff] %v6449_v37  ;;  %v6453_v20 = vpop.f32.mrf.mxu0  ;;  %v6455_v35 = vpop.f32.mrf.mxu1  ;;  %v5070_v37 = vld [vmem:[%s7858_s0 + $0x318] sm:$0xff] }
 0x16c   :  { %7931 = vst [vmem:[#allocation68_spill] sm:$0xff] %v6455_v35 }
 0x16e   :  { %v6480_v56 = vpop.f32.mrf.mxu2 }
 0x16f   :  { %7936 = vst [vmem:[#allocation73_spill] sm:$0xff] %v6480_v56 }
 0x172   :  { %v6457_v63 = vpop.f32.mrf.mxu3 }
 0x173   :  { %7932 = vst [vmem:[#allocation69_spill] sm:$0xff] %v6457_v63  ;;  %v6464_v36 = vpop.f32.mrf.mxu0  ;;  %v6466_v24 = vpop.f32.mrf.mxu1 }
 0x174   :  { %7934 = vst [vmem:[#allocation71_spill] sm:$0xff] %v6466_v24  ;;  %4838 = vmatmul.msk.bf16.gmra.mxu2 %vm942_vm1, %v5070_v37  ;;  %v5096_v37 = vld [vmem:[%s7858_s0 + $0x3e8] sm:$0xff] }
 0x176   :  { %4762 = vmatmul.msk.bf16.gmra.mxu0 %vm942_vm1, %v4994_v13  ;;  %2061 = vmatmul.bf16.gmra.mxu1 %v7910_v9  ;;  %v4995_v13 = vld [vmem:[%s7858_s0 + $0xc0] sm:$0xff]  ;;  %v6491_v14 = vpop.f32.mrf.mxu2 }
 0x177   :  { %4863 = vmatmul.msk.bf16.gmra.mxu3 %vm942_vm1, %v5095_v47  ;;  %7939 = vst [vmem:[#allocation76_spill] sm:$0xff] %v6491_v14 }
 0x17a   :  { %v6478_v63 = vpop.f32.mrf.mxu3 }
 0x17b   :  { %7935 = vst [vmem:[#allocation72_spill] sm:$0xff] %v6478_v63  ;;  %v6482_v7 = vpop.f32.mrf.mxu0  ;;  %v6484_v24 = vpop.f32.mrf.mxu1 }
 0x17c   :  { %7937 = vst [vmem:[#allocation74_spill] sm:$0xff] %v6484_v24 }
 0x17e   :  { %v6509_v14 = vpop.f32.mrf.mxu2 }
 0x17f   :  { %7942 = vst [vmem:[#allocation79_spill] sm:$0xff] %v6509_v14 }
 0x182   :  { %v6486_v35 = vpop.f32.mrf.mxu3 }
 0x183   :  { %7938 = vst [vmem:[#allocation75_spill] sm:$0xff] %v6486_v35  ;;  %v6493_v58 = vpop.f32.mrf.mxu0  ;;  %v6495_v47 = vpop.f32.mrf.mxu1  ;;  %v5071_v35 = vld [vmem:[%s7858_s0 + $0x320] sm:$0xff] }
 0x184   :  { %7940 = vst [vmem:[#allocation77_spill] sm:$0xff] %v6495_v47  ;;  %4839 = vmatmul.msk.bf16.gmra.mxu2 %vm942_vm1, %v5071_v35  ;;  %v5097_v35 = vld [vmem:[%s7858_s0 + $0x3f0] sm:$0xff] }
 0x186   :  { %4763 = vmatmul.msk.bf16.gmra.mxu0 %vm942_vm1, %v4995_v13  ;;  %2066 = vmatmul.bf16.gmra.mxu1 %v7910_v9  ;;  %v4996_v13 = vld [vmem:[%s7858_s0 + $0xc8] sm:$0xff]  ;;  %v6520_v41 = vpop.f32.mrf.mxu2 }
 0x187   :  { %4864 = vmatmul.msk.bf16.gmra.mxu3 %vm942_vm1, %v5096_v37  ;;  %7945 = vst [vmem:[#allocation82_spill] sm:$0xff] %v6520_v41 }
 0x18a   :  { %v6507_v63 = vpop.f32.mrf.mxu3 }
 0x18b   :  { %7941 = vst [vmem:[#allocation78_spill] sm:$0xff] %v6507_v63  ;;  %v6511_v56 = vpop.f32.mrf.mxu0  ;;  %v6513_v47 = vpop.f32.mrf.mxu1 }
 0x18c   :  { %7943 = vst [vmem:[#allocation80_spill] sm:$0xff] %v6513_v47 }
 0x192   :  { %v6515_v24 = vpop.f32.mrf.mxu3 }
 0x193   :  { %7944 = vst [vmem:[#allocation81_spill] sm:$0xff] %v6515_v24  ;;  %v6522_v27 = vpop.f32.mrf.mxu0  ;;  %v6524_v37 = vpop.f32.mrf.mxu1 }
 0x194   :  { %7946 = vst [vmem:[#allocation83_spill] sm:$0xff] %v6524_v37  ;;  %v6543_v37 = vld [vmem:[%s7861_s3] ss:$0 sm:$0xff] }
 0x195   :  { %v1343_v11 = vadd.f32 %v6543_v37, %v5966_v33  ;;  %v1383_v6 = vadd.f32 %v6543_v37, %v6250_v62  ;;  %v4998_v33 = vld [vmem:[%s7858_s0 + $0xd8] sm:$0xff] }
 0x196   :  { %4764 = vmatmul.msk.bf16.gmra.mxu0 %vm942_vm1, %v4996_v13  ;;  %2071 = vmatmul.bf16.gmra.mxu1 %v7910_v9  ;;  %v4997_v9 = vld [vmem:[%s7858_s0 + $0xd0] sm:$0xff] }
 0x197   :  { %4865 = vmatmul.msk.bf16.gmra.mxu3 %vm942_vm1, %v5097_v35  ;;  %v6534_v63 = vpop.f32.mrf.mxu2 }
 0x198   :  { %7948 = vst [vmem:[#allocation85_spill] sm:$0xff] %v6534_v63 }
 0x19a   :  { %v6532_v24 = vpop.f32.mrf.mxu3 }
 0x19b   :  { %7947 = vst [vmem:[#allocation84_spill] sm:$0xff] %v6532_v24  ;;  %v6536_v14 = vpop.f32.mrf.mxu0  ;;  %v6538_v41 = vpop.f32.mrf.mxu1  ;;  %v5098_v24 = vld [vmem:[%s7858_s0 + $0x3f8] sm:$0xff] }
 0x19c   :  { %7949 = vst [vmem:[#allocation86_spill] sm:$0xff] %v6538_v41  ;;  %v1341_v41 = vadd.f32 %v6543_v37, %v5946_v28 }
 0x19f   :  { %v6555_v63 = vpop.f32.mrf.mxu2 }
 0x1a0   :  { %7951 = vst [vmem:[#allocation88_spill] sm:$0xff] %v6555_v63 }
 0x1a2   :  { %v6545_v47 = vpop.f32.mrf.mxu3 }
 0x1a3   :  { %7950 = vst [vmem:[#allocation87_spill] sm:$0xff] %v6545_v47  ;;  %v6550_v13 = vpop.f32.mrf.mxu0  ;;  %v2037_v35 = vpop.f32.mrf.mxu1  ;;  %v1381_v47 = vadd.f32 %v6543_v37, %v6227_v30 }
 0x1a4   :  { %v2077_v22 = vadd.f32 %v2037_v35, %v1341_v41 }
 0x1a5   :  { %v2093_v17 = vadd.f32 %v2037_v35, %v1381_v47 }
 0x1a6   :  { %4765 = vmatmul.msk.bf16.gmra.mxu0 %vm942_vm1, %v4997_v9  ;;  %5116 = vtanh.f32 %v2077_v22 }
 0x1a7   :  { %4866 = vmatmul.msk.bf16.gmra.mxu3 %vm942_vm1, %v5098_v24  ;;  %5118 = vtanh.f32 %v2093_v17  ;;  %v6571_v30 = vpop.f32.mrf.mxu2  ;;  %v1386_v17 = vadd.f32 %v6543_v37, %v6268_v51 }
 0x1aa   :  { %v6567_v1 = vpop.f32.mrf.mxu3 }
 0x1ab   :  { %7952 = vst [vmem:[#allocation89_spill] sm:$0xff] %v6567_v1  ;;  %v6569_v63 = vpop.f32.mrf.mxu0  ;;  %v2039_v28 = vpop.f32.mrf.mxu1 }
 0x1ac   :  { %v2078_v9 = vadd.f32 %v2039_v28, %v1343_v11  ;;  %v2094_v60 = vadd.f32 %v2039_v28, %v1383_v6  ;;  %v5117_v41 = vpop.eup %5116  ;;  %v1346_v6 = vadd.f32 %v6543_v37, %v5978_v38  ;;  %v1388_v38 = vadd.f32 %v6543_v37, %v6292_v19  ;;  %v4999_v19 = vld [vmem:[%s7858_s0 + $0xe0] sm:$0xff] }
 0x1ad   :  { %v5119_v62 = vpop.eup %5118 }
 0x1ae   :  { %5120 = vtanh.f32 %v2078_v9 }
 0x1af   :  { %5122 = vtanh.f32 %v2094_v60  ;;  %v6585_v9 = vpop.f32.mrf.mxu2 }
 0x1b2   :  { %v6573_v24 = vpop.f32.mrf.mxu3 }
 0x1b3   :  { %7953 = vst [vmem:[#allocation90_spill] sm:$0xff] %v6573_v24  ;;  %v6578_v47 = vpop.f32.mrf.mxu0  ;;  %v2042_v35 = vpop.f32.mrf.mxu1 }
 0x1b4   :  { %v5121_v1 = vpop.eup %5120  ;;  %v2079_v28 = vadd.f32 %v2042_v35, %v1346_v6  ;;  %v2095_v24 = vadd.f32 %v2042_v35, %v1386_v17 }
 0x1b5   :  { %v5123_v22 = vpop.eup %5122  ;;  %v2141_v11 = vpack.c.bf16 %v5121_v1, %v5117_v41  ;;  %v1348_v1 = vadd.f32 %v6543_v37, %v5994_v43 }
 0x1b6   :  { %4766 = vmatmul.msk.bf16.gmra.mxu0 %vm942_vm1, %v4998_v33  ;;  %v2214_v60 = vpack.c.bf16 %v5123_v22, %v5119_v62  ;;  %5124 = vtanh.f32 %v2079_v28 }
 0x1b7   :  { %2157 = vmatmul.bf16.vlgmr.msrb.gmra.mxu2 %v2141_v11  ;;  %5126 = vtanh.f32 %v2095_v24  ;;  %v6606_v35 = vpop.f32.mrf.mxu2 }
 0x1b8   :  { %2230 = vmatmul.bf16.vlgmr.msrb.gmra.mxu3 %v2214_v60  ;;  %2683 = vmatpush.bf16.msrb.mxu2 %v5959_v31 }
 0x1b9   :  { %2756 = vmatpush.bf16.msrb.mxu3 %v5959_v31 }
 0x1ba   :  { %v6593_v41 = vpop.f32.mrf.mxu3 }
 0x1bb   :  { %v6595_v33 = vpop.f32.mrf.mxu0  ;;  %v2044_v51 = vpop.f32.mrf.mxu1 }
 0x1bc   :  { %v2080_v62 = vadd.f32 %v2044_v51, %v1348_v1  ;;  %v2096_v22 = vadd.f32 %v2044_v51, %v1388_v38  ;;  %2684 = vmatpush.bf16.msrb.mxu2 %v6029_v55  ;;  %v5125_v31 = vpop.eup %5124  ;;  %v1391_v1 = vadd.f32 %v6543_v37, %v6309_v50 }
 0x1bd   :  { %2757 = vmatpush.bf16.msrb.mxu3 %v6029_v55  ;;  %v5127_v11 = vpop.eup %5126 }
 0x1be   :  { %5128 = vtanh.f32 %v2080_v62 }
 0x1bf   :  { %5130 = vtanh.f32 %v2096_v22 }
 0x1c0   :  { %2685 = vmatpush.bf16.msrb.mxu2 %v6093_v12 }
 0x1c1   :  { %2758 = vmatpush.bf16.msrb.mxu3 %v6093_v12  ;;  %v1351_v12 = vadd.f32 %v6543_v37, %v6006_v48  ;;  %v1393_v48 = vadd.f32 %v6543_v37, %v6330_v23 }
 0x1c2   :  { %v6601_v43 = vpop.f32.mrf.mxu3 }
 0x1c3   :  { %v6608_v6 = vpop.f32.mrf.mxu0  ;;  %v2047_v24 = vpop.f32.mrf.mxu1 }
 0x1c4   :  { %v5129_v55 = vpop.eup %5128  ;;  %2686 = vmatpush.bf16.msrb.mxu2 %v6157_v46  ;;  %v2081_v38 = vadd.f32 %v2047_v24, %v1351_v12  ;;  %v2097_v51 = vadd.f32 %v2047_v24, %v1391_v1 }
 0x1c5   :  { %v5131_v60 = vpop.eup %5130  ;;  %v2142_v17 = vpack.c.bf16 %v5129_v55, %v5125_v31  ;;  %2759 = vmatpush.bf16.msrb.mxu3 %v6157_v46  ;;  %v1353_v46 = vadd.f32 %v6543_v37, %v6022_v53 }
 0x1c6   :  { %4767 = vmatmul.msk.bf16.gmra.mxu0 %vm942_vm1, %v4999_v19  ;;  %v2215_v28 = vpack.c.bf16 %v5131_v60, %v5127_v11  ;;  %5132 = vtanh.f32 %v2081_v38  ;;  %v6627_v11 = vpop.f32.mrf.mxu2  ;;  %v1396_v38 = vadd.f32 %v6543_v37, %v6343_v32 }
 0x1c7   :  { %2162 = vmatmul.bf16.gmra.mxu2 %v2142_v17  ;;  %5134 = vtanh.f32 %v2097_v51 }
 0x1c8   :  { %2235 = vmatmul.bf16.gmra.mxu3 %v2215_v28  ;;  %2687 = vmatpush.bf16.msrb.mxu2 %v6183_v3 }
 0x1c9   :  { %2760 = vmatpush.bf16.msrb.mxu3 %v6183_v3  ;;  %v5000_v3 = vld [vmem:[%s7858_s0 + $0xe8] sm:$0xff] }
 0x1ca   :  { %v6623_v62 = vpop.f32.mrf.mxu3 }
 0x1cb   :  { %v6625_v22 = vpop.f32.mrf.mxu0  ;;  %v2049_v31 = vpop.f32.mrf.mxu1 }
 0x1cc   :  { %v2082_v50 = vadd.f32 %v2049_v31, %v1353_v46  ;;  %v2098_v19 = vadd.f32 %v2049_v31, %v1393_v48  ;;  %2688 = vmatpush.bf16.msrb.mxu2 %v6194_v4  ;;  %v5133_v53 = vpop.eup %5132  ;;  %v1358_v48 = vadd.f32 %v6543_v37, %v6058_v0  ;;  %v5001_v0 = vld [vmem:[%s7858_s0 + $0xf0] sm:$0xff] }
 0x1cd   :  { %2761 = vmatpush.bf16.msrb.mxu3 %v6194_v4  ;;  %v5135_v24 = vpop.eup %5134 }
 0x1ce   :  { %5136 = vtanh.f32 %v2082_v50  ;;  %v6645_v1 = vpop.f32.mrf.mxu2 }
 0x1cf   :  { %5138 = vtanh.f32 %v2098_v19 }
 0x1d0   :  { %2689 = vmatpush.bf16.msrb.mxu2 %v6207_v15 }
 0x1d1   :  { %2762 = vmatpush.bf16.msrb.mxu3 %v6207_v15  ;;  %v1356_v15 = vadd.f32 %v6543_v37, %v6042_v59 }
 0x1d2   :  { %v6633_v23 = vpop.f32.mrf.mxu3 }
 0x1d3   :  { %7954 = vst [vmem:[#allocation91_spill] sm:$0xff] %v6633_v23  ;;  %v6638_v55 = vpop.f32.mrf.mxu0  ;;  %v2052_v60 = vpop.f32.mrf.mxu1 }
 0x1d4   :  { %v5137_v17 = vpop.eup %5136  ;;  %2690 = vmatpush.bf16.msrb.mxu2 %v6216_v18  ;;  %v2083_v51 = vadd.f32 %v2052_v60, %v1356_v15  ;;  %v2099_v46 = vadd.f32 %v2052_v60, %v1396_v38 }
 0x1d5   :  { %v5139_v4 = vpop.eup %5138  ;;  %v2143_v12 = vpack.c.bf16 %v5137_v17, %v5133_v53  ;;  %2763 = vmatpush.bf16.msrb.mxu3 %v6216_v18  ;;  %v1398_v18 = vadd.f32 %v6543_v37, %v6363_v61 }
 0x1d6   :  { %4768 = vmatmul.msk.bf16.gmra.mxu0 %vm942_vm1, %v5000_v3  ;;  %v2216_v28 = vpack.c.bf16 %v5139_v4, %v5135_v24  ;;  %5140 = vtanh.f32 %v2083_v51  ;;  %v6657_v32 = vpop.f32.mrf.mxu2  ;;  %v1401_v51 = vadd.f32 %v6543_v37, %v6376_v25 }
 0x1d7   :  { %2167 = vmatmul.bf16.gmra.mxu2 %v2143_v12  ;;  %5142 = vtanh.f32 %v2099_v46 }
 0x1d8   :  { %2240 = vmatmul.bf16.gmra.mxu3 %v2216_v28  ;;  %v1361_v28 = vadd.f32 %v6543_v37, %v6070_v5 }
 0x1da   :  { %v6653_v31 = vpop.f32.mrf.mxu3 }
 0x1db   :  { %7955 = vst [vmem:[#allocation92_spill] sm:$0xff] %v6653_v31  ;;  %v6655_v59 = vpop.f32.mrf.mxu0  ;;  %v2054_v50 = vpop.f32.mrf.mxu1  ;;  %v1438_v31 = vadd.f32 %v6543_v37, %v6595_v33 }
 0x1dc   :  { %v2084_v19 = vadd.f32 %v2054_v50, %v1358_v48  ;;  %v2100_v53 = vadd.f32 %v2054_v50, %v1398_v18  ;;  %v5141_v3 = vpop.eup %5140  ;;  %v1363_v18 = vadd.f32 %v6543_v37, %v6086_v10  ;;  %v1403_v50 = vadd.f32 %v6543_v37, %v6395_v2  ;;  %v5002_v2 = vld [vmem:[%s7858_s0 + $0xf8] sm:$0xff] }
 0x1dd   :  { %v5143_v61 = vpop.eup %5142 }
 0x1de   :  { %5144 = vtanh.f32 %v2084_v19 }
 0x1df   :  { %5146 = vtanh.f32 %v2100_v53  ;;  %v6677_v53 = vpop.f32.mrf.mxu2 }
 0x1e2   :  { %v6659_v24 = vpop.f32.mrf.mxu3 }
 0x1e3   :  { %7956 = vst [vmem:[#allocation93_spill] sm:$0xff] %v6659_v24  ;;  %v6664_v60 = vpop.f32.mrf.mxu0  ;;  %v2057_v17 = vpop.f32.mrf.mxu1 }
 0x1e4   :  { %v5145_v4 = vpop.eup %5144  ;;  %v2085_v46 = vadd.f32 %v2057_v17, %v1361_v28  ;;  %v2101_v48 = vadd.f32 %v2057_v17, %v1401_v51 }
 0x1e5   :  { %v5147_v12 = vpop.eup %5146  ;;  %v2144_v15 = vpack.c.bf16 %v5145_v4, %v5141_v3 }
 0x1e6   :  { %4769 = vmatmul.msk.bf16.gmra.mxu0 %vm942_vm1, %v5001_v0  ;;  %v2217_v38 = vpack.c.bf16 %v5147_v12, %v5143_v61  ;;  %5148 = vtanh.f32 %v2085_v46  ;;  %v1366_v46 = vadd.f32 %v6543_v37, %v6106_v16 }
 0x1e7   :  { %2172 = vmatmul.bf16.gmra.mxu2 %v2144_v15  ;;  %5150 = vtanh.f32 %v2101_v48  ;;  %v6688_v28 = vpop.f32.mrf.mxu2 }
 0x1e8   :  { %2245 = vmatmul.bf16.gmra.mxu3 %v2217_v38 }
 0x1ea   :  { %v6675_v19 = vpop.f32.mrf.mxu3 }
 0x1eb   :  { %7957 = vst [vmem:[#allocation94_spill] sm:$0xff] %v6675_v19  ;;  %v6679_v5 = vpop.f32.mrf.mxu0  ;;  %v2059_v3 = vpop.f32.mrf.mxu1 }
 0x1ec   :  { %v2086_v0 = vadd.f32 %v2059_v3, %v1363_v18  ;;  %v2102_v25 = vadd.f32 %v2059_v3, %v1403_v50  ;;  %v5149_v61 = vpop.eup %5148  ;;  %v1406_v18 = vadd.f32 %v6543_v37, %v6406_v45 }
 0x1ed   :  { %v5151_v10 = vpop.eup %5150 }
 0x1ee   :  { %5152 = vtanh.f32 %v2086_v0  ;;  %v1368_v0 = vadd.f32 %v6543_v37, %v6122_v21 }
 0x1ef   :  { %5154 = vtanh.f32 %v2102_v25  ;;  %v1408_v25 = vadd.f32 %v6543_v37, %v6424_v42  ;;  %v6703_v45 = vpop.f32.mrf.mxu2  ;;  %v5003_v42 = vld [vmem:[%s7858_s0 + $0x100] sm:$0xff] }
 0x1f2   :  { %v6681_v17 = vpop.f32.mrf.mxu3 }
 0x1f3   :  { %7958 = vst [vmem:[#allocation95_spill] sm:$0xff] %v6681_v17  ;;  %v6686_v4 = vpop.f32.mrf.mxu0  ;;  %v2062_v12 = vpop.f32.mrf.mxu1 }
 0x1f4   :  { %v5153_v15 = vpop.eup %5152  ;;  %v2087_v50 = vadd.f32 %v2062_v12, %v1366_v46  ;;  %v2103_v3 = vadd.f32 %v2062_v12, %v1406_v18 }
 0x1f5   :  { %v5155_v38 = vpop.eup %5154  ;;  %v2145_v51 = vpack.c.bf16 %v5153_v15, %v5149_v61 }
 0x1f6   :  { %4770 = vmatmul.msk.bf16.gmra.mxu0 %vm942_vm1, %v5002_v2  ;;  %v2218_v48 = vpack.c.bf16 %v5155_v38, %v5151_v10  ;;  %5156 = vtanh.f32 %v2087_v50 }
 0x1f7   :  { %2177 = vmatmul.bf16.gmra.mxu2 %v2145_v51  ;;  %5158 = vtanh.f32 %v2103_v3  ;;  %v1371_v3 = vadd.f32 %v6543_v37, %v6134_v26 }
 0x1f8   :  { %2250 = vmatmul.bf16.gmra.mxu3 %v2218_v48 }
 0x1fa   :  { %v6699_v61 = vpop.f32.mrf.mxu3 }
 0x1fb   :  { %7959 = vst [vmem:[#allocation96_spill] sm:$0xff] %v6699_v61  ;;  %v6701_v15 = vpop.f32.mrf.mxu0  ;;  %v2064_v16 = vpop.f32.mrf.mxu1 }
 0x1fc   :  { %v2088_v2 = vadd.f32 %v2064_v16, %v1368_v0  ;;  %v2104_v10 = vadd.f32 %v2064_v16, %v1408_v25  ;;  %v5157_v12 = vpop.eup %5156  ;;  %v1411_v25 = vadd.f32 %v6543_v37, %v6435_v52 }
 0x1fd   :  { %v5159_v21 = vpop.eup %5158 }
 0x1fe   :  { %5160 = vtanh.f32 %v2088_v2  ;;  %v6717_v2 = vpop.f32.mrf.mxu2 }
 0x1ff   :  { %5162 = vtanh.f32 %v2104_v10 }
 0x202   :  { %v6705_v38 = vpop.f32.mrf.mxu3 }
 0x203   :  { %7960 = vst [vmem:[#allocation97_spill] sm:$0xff] %v6705_v38  ;;  %v6710_v51 = vpop.f32.mrf.mxu0  ;;  %v2067_v46 = vpop.f32.mrf.mxu1  ;;  %v1373_v38 = vadd.f32 %v6543_v37, %v6150_v40  ;;  %v5004_v40 = vld [vmem:[%s7858_s0 + $0x108] sm:$0xff] }
 0x204   :  { %v5161_v48 = vpop.eup %5160  ;;  %v2089_v16 = vadd.f32 %v2067_v46, %v1371_v3  ;;  %v2105_v10 = vadd.f32 %v2067_v46, %v1411_v25 }
 0x205   :  { %v5163_v18 = vpop.eup %5162  ;;  %v2146_v50 = vpack.c.bf16 %v5161_v48, %v5157_v12  ;;  %v1413_v12 = vadd.f32 %v6543_v37, %v6453_v20 }
 0x206   :  { %4771 = vmatmul.msk.bf16.gmra.mxu0 %vm942_vm1, %v5003_v42  ;;  %v2219_v0 = vpack.c.bf16 %v5163_v18, %v5159_v21  ;;  %5164 = vtanh.f32 %v2089_v16  ;;  %v6732_v46 = vpop.f32.mrf.mxu2 }
 0x207   :  { %2182 = vmatmul.bf16.gmra.mxu2 %v2146_v50  ;;  %5166 = vtanh.f32 %v2105_v10  ;;  %v1376_v10 = vadd.f32 %v6543_v37, %v6167_v57 }
 0x208   :  { %2255 = vmatmul.bf16.gmra.mxu3 %v2219_v0 }
 0x20a   :  { %v6723_v48 = vpop.f32.mrf.mxu3 }
 0x20b   :  { %7961 = vst [vmem:[#allocation98_spill] sm:$0xff] %v6723_v48  ;;  %v6725_v26 = vpop.f32.mrf.mxu0  ;;  %v2069_v42 = vpop.f32.mrf.mxu1  ;;  %v1418_v48 = vadd.f32 %v6543_v37, %v6482_v7  ;;  %v5005_v7 = vld [vmem:[%s7858_s0 + $0x110] sm:$0xff] }
 0x20c   :  { %v2090_v21 = vadd.f32 %v2069_v42, %v1373_v38  ;;  %v2106_v52 = vadd.f32 %v2069_v42, %v1413_v12  ;;  %v5165_v18 = vpop.eup %5164  ;;  %v1416_v42 = vadd.f32 %v6543_v37, %v6464_v36 }
 0x20d   :  { %v5167_v20 = vpop.eup %5166 }
 0x20e   :  { %5168 = vtanh.f32 %v2090_v21 }
 0x20f   :  { %5170 = vtanh.f32 %v2106_v52 }
 0x212   :  { %v6727_v50 = vpop.f32.mrf.mxu3 }
 0x213   :  { %7962 = vst [vmem:[#allocation99_spill] sm:$0xff] %v6727_v50  ;;  %v6734_v3 = vpop.f32.mrf.mxu0  ;;  %v2072_v0 = vpop.f32.mrf.mxu1  ;;  %v1378_v50 = vadd.f32 %v6543_v37, %v6199_v8 }
 0x214   :  { %v5169_v25 = vpop.eup %5168  ;;  %v2091_v21 = vadd.f32 %v2072_v0, %v1376_v10  ;;  %v2107_v52 = vadd.f32 %v2072_v0, %v1416_v42 }
 0x215   :  { %v5171_v16 = vpop.eup %5170  ;;  %v2147_v38 = vpack.c.bf16 %v5169_v25, %v5165_v18 }
 0x216   :  { %4772 = vmatmul.msk.bf16.gmra.mxu0 %vm942_vm1, %v5004_v40  ;;  %v2220_v12 = vpack.c.bf16 %v5171_v16, %v5167_v20  ;;  %5172 = vtanh.f32 %v2091_v21  ;;  %v6749_v16 = vpop.f32.mrf.mxu2 }
 0x217   :  { %2187 = vmatmul.bf16.gmra.mxu2 %v2147_v38  ;;  %5174 = vtanh.f32 %v2107_v52 }
 0x218   :  { %2260 = vmatmul.bf16.gmra.mxu3 %v2220_v12 }
 0x21a   :  { %v6745_v18 = vpop.f32.mrf.mxu3 }
 0x21b   :  { %7963 = vst [vmem:[#allocation100_spill] sm:$0xff] %v6745_v18  ;;  %v6747_v25 = vpop.f32.mrf.mxu0  ;;  %v2074_v57 = vpop.f32.mrf.mxu1 }
 0x21c   :  { %v2092_v40 = vadd.f32 %v2074_v57, %v1378_v50  ;;  %v2108_v20 = vadd.f32 %v2074_v57, %v1418_v48  ;;  %v5173_v36 = vpop.eup %5172 }
 0x21d   :  { %v5175_v8 = vpop.eup %5174 }
 0x21e   :  { %5176 = vtanh.f32 %v2092_v40  ;;  %v6759_v50 = vpop.f32.mrf.mxu2 }
 0x21f   :  { %5178 = vtanh.f32 %v2108_v20  ;;  %v5006_v20 = vld [vmem:[%s7858_s0 + $0x118] sm:$0xff] }
 0x222   :  { %v6751_v0 = vpop.f32.mrf.mxu3 }
 0x223   :  { %7964 = vst [vmem:[#allocation101_spill] sm:$0xff] %v6751_v0  ;;  %v6756_v38 = vpop.f32.mrf.mxu0  ;;  %v1463_v0 = vadd.f32 %v6543_v37, %v6725_v26 }
 0x224   :  { %v5177_v10 = vpop.eup %5176 }
 0x225   :  { %v5179_v12 = vpop.eup %5178  ;;  %v2148_v42 = vpack.c.bf16 %v5177_v10, %v5173_v36 }
 0x226   :  { %4773 = vmatmul.msk.bf16.gmra.mxu0 %vm942_vm1, %v5005_v7  ;;  %v2221_v48 = vpack.c.bf16 %v5179_v12, %v5175_v8  ;;  %v6765_v57 = vpop.f32.mrf.mxu2  ;;  %v1421_v12 = vadd.f32 %v6543_v37, %v6493_v58 }
 0x227   :  { %2192 = vmatmul.bf16.gmra.mxu2 %v2148_v42  ;;  %v1461_v42 = vadd.f32 %v6543_v37, %v6710_v51 }
 0x228   :  { %2265 = vmatmul.bf16.gmra.mxu3 %v2221_v48 }
 0x22a   :  { %v6761_v21 = vpop.f32.mrf.mxu3 }
 0x22b   :  { %7965 = vst [vmem:[#allocation102_spill] sm:$0xff] %v6761_v21  ;;  %v6763_v52 = vpop.f32.mrf.mxu0  ;;  %v1423_v21 = vadd.f32 %v6543_v37, %v6511_v56 }
 0x232   :  { %v6767_v40 = vpop.f32.mrf.mxu3 }
 0x233   :  { %7966 = vst [vmem:[#allocation103_spill] sm:$0xff] %v6767_v40  ;;  %v6772_v36 = vpop.f32.mrf.mxu0 }
 0x236   :  { %4774 = vmatmul.msk.bf16.gmra.mxu0 %vm942_vm1, %v5006_v20  ;;  %v5007_v20 = vld [vmem:[%s7858_s0 + $0x120] sm:$0xff] }
 0x23a   :  { %v2158_v7 = vpop.f32.mrf.mxu2 }
 0x23b   :  { %v2231_v8 = vpop.f32.mrf.mxu3  ;;  %v6775_v10 = vpop.f32.mrf.mxu0  ;;  %v2198_v48 = vadd.f32 %v2158_v7, %v1421_v12 }
 0x23c   :  { %v2271_v40 = vadd.f32 %v2231_v8, %v1461_v42  ;;  %v1478_v23 = vadd.f32 %v6543_v37, %v6775_v10 }
 0x23d   :  { %5180 = vtanh.f32 %v2198_v48 }
 0x23e   :  { %5182 = vtanh.f32 %v2271_v40 }
 0x242   :  { %v2160_v18 = vpop.f32.mrf.mxu2 }
 0x243   :  { %v2199_v61 = vadd.f32 %v2160_v18, %v1423_v21  ;;  %v2233_v17 = vpop.f32.mrf.mxu3  ;;  %v6788_v58 = vpop.f32.mrf.mxu0  ;;  %v1426_v18 = vadd.f32 %v6543_v37, %v6522_v27  ;;  %v1428_v27 = vadd.f32 %v6543_v37, %v6536_v14 }
 0x244   :  { %v2272_v51 = vadd.f32 %v2233_v17, %v1463_v0  ;;  %v5181_v56 = vpop.eup %5180  ;;  %v1466_v17 = vadd.f32 %v6543_v37, %v6734_v3  ;;  %v6800_v0 = vld [vmem:[%s7860_s2 + $0x38] sm:$0xff] }
 0x245   :  { %5184 = vtanh.f32 %v2199_v61  ;;  %v5183_v7 = vpop.eup %5182 }
 0x246   :  { %5186 = vtanh.f32 %v2272_v51  ;;  %4775 = vmatmul.msk.bf16.gmra.mxu0 %vm942_vm1, %v5007_v20 }
 0x24a   :  { %v2163_v8 = vpop.f32.mrf.mxu2 }
 0x24b   :  { %v5185_v26 = vpop.eup %5184  ;;  %v2236_v12 = vpop.f32.mrf.mxu3  ;;  %v2200_v61 = vadd.f32 %v2163_v8, %v1426_v18 }
 0x24c   :  { %v6791_v42 = vpop.f32.mrf.mxu0  ;;  %v5187_v19 = vpop.eup %5186  ;;  %v2319_v24 = vpack.c.bf16 %v5185_v26, %v5181_v56  ;;  %v2273_v40 = vadd.f32 %v2236_v12, %v1466_v17  ;;  %v6816_v56 = vld [vmem:[%s7860_s2 + $0x30] sm:$0xff]  ;;  %v6833_v17 = vld [vmem:[%s7860_s2 + $0x20] sm:$0xff] }
 0x24d   :  { %v2392_v21 = vpack.c.bf16 %v5187_v19, %v5183_v7  ;;  %v1468_v19 = vadd.f32 %v6543_v37, %v6747_v25  ;;  %5188 = vtanh.f32 %v2200_v61  ;;  %v6824_v25 = vld [vmem:[%s7860_s2 + $0x28] sm:$0xff] }
 0x24e   :  { %2335 = vmatmul.bf16.vlgmr.msra.gmra.mxu1 %v2319_v24  ;;  %v5008_v24 = vld [vmem:[%s7858_s0 + $0x128] sm:$0xff]  ;;  %5190 = vtanh.f32 %v2273_v40 }
 0x24f   :  { %2408 = vmatmul.bf16.vlgmr.msra.gmra.mxu2 %v2392_v21  ;;  %2861 = vmatpush.bf16.msra.mxu1 %v6800_v0 }
 0x250   :  { %2934 = vmatpush.bf16.msra.mxu2 %v6800_v0 }
 0x252   :  { %v2165_v3 = vpop.f32.mrf.mxu2 }
 0x253   :  { %v2201_v48 = vadd.f32 %v2165_v3, %v1428_v27  ;;  %v2238_v20 = vpop.f32.mrf.mxu3  ;;  %2862 = vmatpush.bf16.msra.mxu1 %v6816_v56  ;;  %v5189_v7 = vpop.eup %5188  ;;  %v1431_v27 = vadd.f32 %v6543_v37, %v6550_v13  ;;  %v1471_v3 = vadd.f32 %v6543_v37, %v6756_v38  ;;  %v1433_v13 = vadd.f32 %v6543_v37, %v6569_v63 }
 0x254   :  { %v6811_v51 = vpop.f32.mrf.mxu0  ;;  %v2274_v14 = vadd.f32 %v2238_v20, %v1468_v19  ;;  %2935 = vmatpush.bf16.msra.mxu2 %v6816_v56  ;;  %v5191_v8 = vpop.eup %5190 }
 0x255   :  { %5192 = vtanh.f32 %v2201_v48  ;;  %v6844_v48 = vld [vmem:[%s7860_s2 + $0x18] sm:$0xff] }
 0x256   :  { %5194 = vtanh.f32 %v2274_v14  ;;  %4776 = vmatmul.msk.bf16.gmra.mxu0 %vm942_vm1, %v5008_v24  ;;  %v1473_v14 = vadd.f32 %v6543_v37, %v6763_v52  ;;  %v6868_v52 = vld [vmem:[%s7860_s2 + $0x8] sm:$0xff] }
 0x257   :  { %2863 = vmatpush.bf16.msra.mxu1 %v6824_v25 }
 0x258   :  { %2936 = vmatpush.bf16.msra.mxu2 %v6824_v25 }
 0x25a   :  { %v2168_v26 = vpop.f32.mrf.mxu2 }
 0x25b   :  { %v5193_v12 = vpop.eup %5192  ;;  %v2241_v18 = vpop.f32.mrf.mxu3  ;;  %2864 = vmatpush.bf16.msra.mxu1 %v6833_v17  ;;  %v2202_v24 = vadd.f32 %v2168_v26, %v1431_v27 }
 0x25c   :  { %v6828_v21 = vpop.f32.mrf.mxu0  ;;  %v5195_v61 = vpop.eup %5194  ;;  %v2320_v40 = vpack.c.bf16 %v5193_v12, %v5189_v7  ;;  %2937 = vmatpush.bf16.msra.mxu2 %v6833_v17  ;;  %v2275_v20 = vadd.f32 %v2241_v18, %v1471_v3  ;;  %v5009_v7 = vld [vmem:[%s7858_s0 + $0x130] sm:$0xff] }
 0x25d   :  { %v2393_v19 = vpack.c.bf16 %v5195_v61, %v5191_v8  ;;  %5196 = vtanh.f32 %v2202_v24  ;;  %v6860_v18 = vld [vmem:[%s7860_s2 + $0x10] sm:$0xff] }
 0x25e   :  { %2340 = vmatmul.bf16.gmra.mxu1 %v2320_v40  ;;  %5198 = vtanh.f32 %v2275_v20  ;;  %v6877_v20 = vld [vmem:[%s7860_s2] sm:$0xff] }
 0x25f   :  { %2413 = vmatmul.bf16.gmra.mxu2 %v2393_v19  ;;  %2865 = vmatpush.bf16.msra.mxu1 %v6844_v48 }
 0x260   :  { %2938 = vmatpush.bf16.msra.mxu2 %v6844_v48 }
 0x262   :  { %v2170_v38 = vpop.f32.mrf.mxu2 }
 0x263   :  { %v2203_v8 = vadd.f32 %v2170_v38, %v1433_v13  ;;  %v2243_v26 = vpop.f32.mrf.mxu3  ;;  %2866 = vmatpush.bf16.msra.mxu1 %v6860_v18  ;;  %v5197_v61 = vpop.eup %5196  ;;  %v1436_v38 = vadd.f32 %v6543_v37, %v6578_v47 }
 0x264   :  { %v6855_v12 = vpop.f32.mrf.mxu0  ;;  %v2276_v63 = vadd.f32 %v2243_v26, %v1473_v14  ;;  %2939 = vmatpush.bf16.msra.mxu2 %v6860_v18  ;;  %v5199_v40 = vpop.eup %5198 }
 0x265   :  { %5200 = vtanh.f32 %v2203_v8  ;;  %v1476_v8 = vadd.f32 %v6543_v37, %v6772_v36 }
 0x266   :  { %5202 = vtanh.f32 %v2276_v63  ;;  %4777 = vmatmul.msk.bf16.gmra.mxu0 %vm942_vm1, %v5009_v7 }
 0x267   :  { %2867 = vmatpush.bf16.msra.mxu1 %v6868_v52 }
 0x268   :  { %2940 = vmatpush.bf16.msra.mxu2 %v6868_v52 }
 0x26a   :  { %v2173_v27 = vpop.f32.mrf.mxu2 }
 0x26b   :  { %v5201_v19 = vpop.eup %5200  ;;  %v2246_v3 = vpop.f32.mrf.mxu3  ;;  %2868 = vmatpush.bf16.msra.mxu1 %v6877_v20  ;;  %v2204_v26 = vadd.f32 %v2173_v27, %v1436_v38 }
 0x26c   :  { %v6872_v24 = vpop.f32.mrf.mxu0  ;;  %v5203_v13 = vpop.eup %5202  ;;  %v2321_v14 = vpack.c.bf16 %v5201_v19, %v5197_v61  ;;  %2941 = vmatpush.bf16.msra.mxu2 %v6877_v20  ;;  %v2277_v63 = vadd.f32 %v2246_v3, %v1476_v8  ;;  %v5010_v19 = vld [vmem:[%s7858_s0 + $0x138] sm:$0xff] }
 0x26d   :  { %v2394_v7 = vpack.c.bf16 %v5203_v13, %v5199_v40  ;;  %5204 = vtanh.f32 %v2204_v26 }
 0x26e   :  { %2345 = vmatmul.bf16.gmra.mxu1 %v2321_v14  ;;  %5206 = vtanh.f32 %v2277_v63 }
 0x26f   :  { %2418 = vmatmul.bf16.gmra.mxu2 %v2394_v7 }
 0x272   :  { %v2175_v61 = vpop.f32.mrf.mxu2 }
 0x273   :  { %v2205_v47 = vadd.f32 %v2175_v61, %v1438_v31  ;;  %v2248_v40 = vpop.f32.mrf.mxu3  ;;  %v5205_v33 = vpop.eup %5204  ;;  %v1441_v31 = vadd.f32 %v6543_v37, %v6608_v6 }
 0x274   :  { %v6892_v13 = vpop.f32.mrf.mxu0  ;;  %v2278_v36 = vadd.f32 %v2248_v40, %v1478_v23  ;;  %v5207_v27 = vpop.eup %5206  ;;  %v1481_v23 = vadd.f32 %v6543_v37, %v6788_v58 }
 0x275   :  { %5208 = vtanh.f32 %v2205_v47  ;;  %v1483_v47 = vadd.f32 %v6543_v37, %v6791_v42 }
 0x276   :  { %5210 = vtanh.f32 %v2278_v36  ;;  %4778 = vmatmul.msk.bf16.gmra.mxu0 %vm942_vm1, %v5010_v19  ;;  %v1443_v19 = vadd.f32 %v6543_v37, %v6625_v22  ;;  %v5011_v36 = vld [vmem:[%s7858_s0 + $0x140] sm:$0xff] }
 0x27a   :  { %v2178_v3 = vpop.f32.mrf.mxu2 }
 0x27b   :  { %v5209_v10 = vpop.eup %5208  ;;  %v2251_v14 = vpop.f32.mrf.mxu3  ;;  %v2206_v63 = vadd.f32 %v2178_v3, %v1441_v31 }
 0x27c   :  { %v6895_v38 = vpop.f32.mrf.mxu0  ;;  %v5211_v7 = vpop.eup %5210  ;;  %v2322_v8 = vpack.c.bf16 %v5209_v10, %v5205_v33  ;;  %v2279_v61 = vadd.f32 %v2251_v14, %v1481_v23 }
 0x27d   :  { %v2395_v26 = vpack.c.bf16 %v5211_v7, %v5207_v27  ;;  %5212 = vtanh.f32 %v2206_v63  ;;  %v1486_v63 = vadd.f32 %v6543_v37, %v6811_v51 }
 0x27e   :  { %2350 = vmatmul.bf16.gmra.mxu1 %v2322_v8  ;;  %5214 = vtanh.f32 %v2279_v61 }
 0x27f   :  { %2423 = vmatmul.bf16.gmra.mxu2 %v2395_v26  ;;  %v1446_v26 = vadd.f32 %v6543_v37, %v6638_v55 }
 0x282   :  { %v2180_v40 = vpop.f32.mrf.mxu2 }
 0x283   :  { %v2207_v6 = vadd.f32 %v2180_v40, %v1443_v19  ;;  %v2253_v33 = vpop.f32.mrf.mxu3  ;;  %v5213_v22 = vpop.eup %5212  ;;  %v1488_v40 = vadd.f32 %v6543_v37, %v6828_v21 }
 0x284   :  { %v6908_v27 = vpop.f32.mrf.mxu0  ;;  %v2280_v58 = vadd.f32 %v2253_v33, %v1483_v47  ;;  %v5215_v3 = vpop.eup %5214  ;;  %v1448_v47 = vadd.f32 %v6543_v37, %v6655_v59 }
 0x285   :  { %5216 = vtanh.f32 %v2207_v6  ;;  %v5012_v6 = vld [vmem:[%s7858_s0 + $0x148] sm:$0xff] }
 0x286   :  { %5218 = vtanh.f32 %v2280_v58  ;;  %4779 = vmatmul.msk.bf16.gmra.mxu0 %vm942_vm1, %v5011_v36 }
 0x28a   :  { %v2183_v10 = vpop.f32.mrf.mxu2 }
 0x28b   :  { %v5217_v42 = vpop.eup %5216  ;;  %v2256_v14 = vpop.f32.mrf.mxu3  ;;  %v2208_v61 = vadd.f32 %v2183_v10, %v1446_v26 }
 0x28c   :  { %v6911_v7 = vpop.f32.mrf.mxu0  ;;  %v5219_v8 = vpop.eup %5218  ;;  %v2323_v31 = vpack.c.bf16 %v5217_v42, %v5213_v22  ;;  %v2281_v19 = vadd.f32 %v2256_v14, %v1486_v63 }
 0x28d   :  { %v2396_v23 = vpack.c.bf16 %v5219_v8, %v5215_v3  ;;  %5220 = vtanh.f32 %v2208_v61 }
 0x28e   :  { %2355 = vmatmul.bf16.gmra.mxu1 %v2323_v31  ;;  %5222 = vtanh.f32 %v2281_v19  ;;  %v1451_v31 = vadd.f32 %v6543_v37, %v6664_v60  ;;  %v1453_v19 = vadd.f32 %v6543_v37, %v6679_v5 }
 0x28f   :  { %2428 = vmatmul.bf16.gmra.mxu2 %v2396_v23  ;;  %v1491_v23 = vadd.f32 %v6543_v37, %v6855_v12 }
 0x292   :  { %v2185_v36 = vpop.f32.mrf.mxu2 }
 0x293   :  { %v2209_v55 = vadd.f32 %v2185_v36, %v1448_v47  ;;  %v2258_v33 = vpop.f32.mrf.mxu3  ;;  %v5221_v59 = vpop.eup %5220  ;;  %v1493_v47 = vadd.f32 %v6543_v37, %v6872_v24  ;;  %v5013_v36 = vld [vmem:[%s7858_s0 + $0x150] sm:$0xff] }
 0x294   :  { %v6924_v58 = vpop.f32.mrf.mxu0  ;;  %v2282_v51 = vadd.f32 %v2258_v33, %v1488_v40  ;;  %v5223_v22 = vpop.eup %5222 }
 0x295   :  { %5224 = vtanh.f32 %v2209_v55 }
 0x296   :  { %5226 = vtanh.f32 %v2282_v51  ;;  %4780 = vmatmul.msk.bf16.gmra.mxu0 %vm942_vm1, %v5012_v6 }
 0x29a   :  { %v2188_v3 = vpop.f32.mrf.mxu2 }
 0x29b   :  { %v5225_v21 = vpop.eup %5224  ;;  %v2261_v10 = vpop.f32.mrf.mxu3  ;;  %v2210_v63 = vadd.f32 %v2188_v3, %v1451_v31 }
 0x29c   :  { %v6927_v42 = vpop.f32.mrf.mxu0  ;;  %v5227_v14 = vpop.eup %5226  ;;  %v2324_v8 = vpack.c.bf16 %v5225_v21, %v5221_v59  ;;  %v2283_v61 = vadd.f32 %v2261_v10, %v1491_v23  ;;  %v1456_v10 = vadd.f32 %v6543_v37, %v6686_v4  ;;  %v1458_v23 = vadd.f32 %v6543_v37, %v6701_v15 }
 0x29d   :  { %v2397_v26 = vpack.c.bf16 %v5227_v14, %v5223_v22  ;;  %5228 = vtanh.f32 %v2210_v63  ;;  %v1498_v63 = vadd.f32 %v6543_v37, %v6895_v38 }
 0x29e   :  { %2360 = vmatmul.bf16.gmra.mxu1 %v2324_v8  ;;  %5230 = vtanh.f32 %v2283_v61  ;;  %v1496_v8 = vadd.f32 %v6543_v37, %v6892_v13 }
 0x29f   :  { %2433 = vmatmul.bf16.gmra.mxu2 %v2397_v26 }
 0x2a2   :  { %v2190_v40 = vpop.f32.mrf.mxu2 }
 0x2a3   :  { %v2211_v60 = vadd.f32 %v2190_v40, %v1453_v19  ;;  %v2263_v6 = vpop.f32.mrf.mxu3  ;;  %v5229_v5 = vpop.eup %5228  ;;  %v5014_v19 = vld [vmem:[%s7858_s0 + $0x158] sm:$0xff] }
 0x2a4   :  { %v6940_v55 = vpop.f32.mrf.mxu0  ;;  %v2284_v12 = vadd.f32 %v2263_v6, %v1493_v47  ;;  %v5231_v33 = vpop.eup %5230 }
 0x2a5   :  { %5232 = vtanh.f32 %v2211_v60 }
 0x2a6   :  { %5234 = vtanh.f32 %v2284_v12  ;;  %4781 = vmatmul.msk.bf16.gmra.mxu0 %vm942_vm1, %v5013_v36 }
 0x2aa   :  { %v2193_v51 = vpop.f32.mrf.mxu2 }
 0x2ab   :  { %v5233_v24 = vpop.eup %5232  ;;  %v2266_v59 = vpop.f32.mrf.mxu3  ;;  %v2212_v31 = vadd.f32 %v2193_v51, %v1456_v10 }
 0x2ac   :  { %v6943_v22 = vpop.f32.mrf.mxu0  ;;  %v5235_v3 = vpop.eup %5234  ;;  %v2325_v21 = vpack.c.bf16 %v5233_v24, %v5229_v5  ;;  %v2285_v26 = vadd.f32 %v2266_v59, %v1496_v8  ;;  %v5015_v5 = vld [vmem:[%s7858_s0 + $0x160] sm:$0xff] }
 0x2ad   :  { %v2398_v14 = vpack.c.bf16 %v5235_v3, %v5231_v33  ;;  %5236 = vtanh.f32 %v2212_v31  ;;  %v6972_v59 = vld [vmem:[%s7861_s3] ss:$0 sm:$0xff] }
 0x2ae   :  { %2365 = vmatmul.bf16.gmra.mxu1 %v2325_v21  ;;  %5238 = vtanh.f32 %v2285_v26  ;;  %v1501_v3 = vadd.f32 %v6972_v59, %v6908_v27  ;;  %v1503_v10 = vadd.f32 %v6972_v59, %v6911_v7  ;;  %v1506_v7 = vadd.f32 %v6972_v59, %v6924_v58 }
 0x2af   :  { %2438 = vmatmul.bf16.gmra.mxu2 %v2398_v14  ;;  %v5016_v14 = vld [vmem:[%s7858_s0 + $0x168] sm:$0xff] }
 0x2b2   :  { %v2195_v61 = vpop.f32.mrf.mxu2 }
 0x2b3   :  { %v2213_v4 = vadd.f32 %v2195_v61, %v1458_v23  ;;  %v2268_v47 = vpop.f32.mrf.mxu3  ;;  %v5237_v15 = vpop.eup %5236 }
 0x2b4   :  { %v6956_v40 = vpop.f32.mrf.mxu0  ;;  %v2286_v13 = vadd.f32 %v2268_v47, %v1498_v63  ;;  %v5239_v36 = vpop.eup %5238  ;;  %v1508_v47 = vadd.f32 %v6972_v59, %v6927_v42 }
 0x2b5   :  { %5240 = vtanh.f32 %v2213_v4 }
 0x2b6   :  { %5242 = vtanh.f32 %v2286_v13  ;;  %4782 = vmatmul.msk.bf16.gmra.mxu0 %vm942_vm1, %v5014_v19  ;;  %v5017_v13 = vld [vmem:[%s7858_s0 + $0x170] sm:$0xff] }
 0x2bb   :  { %v5241_v60 = vpop.eup %5240 }
 0x2bc   :  { %v6959_v37 = vpop.f32.mrf.mxu0  ;;  %v5243_v38 = vpop.eup %5242  ;;  %v2326_v6 = vpack.c.bf16 %v5241_v60, %v5237_v15 }
 0x2bd   :  { %v2399_v12 = vpack.c.bf16 %v5243_v38, %v5239_v36 }
 0x2be   :  { %2370 = vmatmul.bf16.gmra.mxu1 %v2326_v6 }
 0x2bf   :  { %2443 = vmatmul.bf16.gmra.mxu2 %v2399_v12 }
 0x2c4   :  { %v6964_v33 = vpop.f32.mrf.mxu0 }
 0x2c6   :  { %4783 = vmatmul.msk.bf16.gmra.mxu0 %vm942_vm1, %v5015_v5 }
 0x2cb   :  { %v2336_v24 = vpop.f32.mrf.mxu1 }
 0x2cc   :  { %v6967_v51 = vpop.f32.mrf.mxu0  ;;  %v2376_v21 = vadd.f32 %v2336_v24, %v1501_v3  ;;  %v1511_v24 = vadd.f32 %v6972_v59, %v6940_v55 }
 0x2ce   :  { %5244 = vtanh.f32 %v2376_v21 }
 0x2d2   :  { %v2409_v38 = vpop.f32.mrf.mxu2 }
 0x2d3   :  { %v2338_v31 = vpop.f32.mrf.mxu1 }
 0x2d4   :  { %v6981_v8 = vpop.f32.mrf.mxu0  ;;  %v2377_v26 = vadd.f32 %v2338_v31, %v1503_v10  ;;  %v5245_v23 = vpop.eup %5244  ;;  %v1513_v10 = vadd.f32 %v6972_v59, %v6943_v22 }
 0x2d6   :  { %5246 = vtanh.f32 %v2377_v26  ;;  %4784 = vmatmul.msk.bf16.gmra.mxu0 %vm942_vm1, %v5016_v14  ;;  %v5018_v14 = vld [vmem:[%s7858_s0 + $0x178] sm:$0xff] }
 0x2da   :  { %v2411_v3 = vpop.f32.mrf.mxu2 }
 0x2db   :  { %v2341_v27 = vpop.f32.mrf.mxu1 }
 0x2dc   :  { %v6984_v63 = vpop.f32.mrf.mxu0  ;;  %v5247_v61 = vpop.eup %5246  ;;  %v2378_v4 = vadd.f32 %v2341_v27, %v1506_v7 }
 0x2dd   :  { %v2497_v19 = vpack.c.bf16 %v5247_v61, %v5245_v23 }
 0x2de   :  { %5248 = vtanh.f32 %v2378_v4  ;;  %v1516_v4 = vadd.f32 %v6972_v59, %v6956_v40 }
 0x2df   :  { %2513 = vmatmul.bf16.vlgmr.msra.gmra.mxu3 %v2497_v19 }
 0x2e0   :  { %3039 = vmatpush.bf16.msra.mxu3 %v6800_v0 }
 0x2e2   :  { %v2414_v55 = vpop.f32.mrf.mxu2 }
 0x2e3   :  { %v2343_v36 = vpop.f32.mrf.mxu1 }
 0x2e4   :  { %v6994_v15 = vpop.f32.mrf.mxu0  ;;  %v2379_v60 = vadd.f32 %v2343_v36, %v1508_v47  ;;  %3040 = vmatpush.bf16.msra.mxu3 %v6816_v56  ;;  %v5249_v58 = vpop.eup %5248  ;;  %v5019_v36 = vld [vmem:[%s7858_s0 + $0x180] sm:$0xff] }
 0x2e6   :  { %5250 = vtanh.f32 %v2379_v60  ;;  %4785 = vmatmul.msk.bf16.gmra.mxu0 %vm942_vm1, %v5017_v13  ;;  %v1518_v13 = vadd.f32 %v6972_v59, %v6959_v37 }
 0x2e8   :  { %3041 = vmatpush.bf16.msra.mxu3 %v6824_v25 }
 0x2eb   :  { %v2346_v42 = vpop.f32.mrf.mxu1 }
 0x2ec   :  { %v6999_v6 = vpop.f32.mrf.mxu0  ;;  %v5251_v12 = vpop.eup %5250  ;;  %3042 = vmatpush.bf16.msra.mxu3 %v6833_v17  ;;  %v2380_v21 = vadd.f32 %v2346_v42, %v1511_v24 }
 0x2ed   :  { %v2498_v5 = vpack.c.bf16 %v5251_v12, %v5249_v58  ;;  %v2416_v42 = vpop.f32.mrf.mxu2 }
 0x2ee   :  { %5252 = vtanh.f32 %v2380_v21 }
 0x2ef   :  { %2518 = vmatmul.bf16.gmra.mxu3 %v2498_v5 }
 0x2f0   :  { %3043 = vmatpush.bf16.msra.mxu3 %v6844_v48 }
 0x2f3   :  { %v2348_v26 = vpop.f32.mrf.mxu1 }
 0x2f4   :  { %v7010_v31 = vpop.f32.mrf.mxu0  ;;  %v2381_v23 = vadd.f32 %v2348_v26, %v1513_v10  ;;  %3044 = vmatpush.bf16.msra.mxu3 %v6860_v18  ;;  %v5253_v27 = vpop.eup %5252 }
 0x2f6   :  { %5254 = vtanh.f32 %v2381_v23  ;;  %4786 = vmatmul.msk.bf16.gmra.mxu0 %vm942_vm1, %v5018_v14  ;;  %v2419_v23 = vpop.f32.mrf.mxu2 }
 0x2f8   :  { %3045 = vmatpush.bf16.msra.mxu3 %v6868_v52 }
 0x2fb   :  { %v2351_v22 = vpop.f32.mrf.mxu1 }
 0x2fc   :  { %v7015_v61 = vpop.f32.mrf.mxu0  ;;  %v5255_v19 = vpop.eup %5254  ;;  %3046 = vmatpush.bf16.msra.mxu3 %v6877_v20  ;;  %v2382_v47 = vadd.f32 %v2351_v22, %v1516_v4  ;;  %v1521_v22 = vadd.f32 %v6972_v59, %v6964_v33 }
 0x2fd   :  { %v2499_v7 = vpack.c.bf16 %v5255_v19, %v5253_v27 }
 0x2fe   :  { %5256 = vtanh.f32 %v2382_v47 }
 0x2ff   :  { %2523 = vmatmul.bf16.gmra.mxu3 %v2499_v7  ;;  %v1523_v7 = vadd.f32 %v6972_v59, %v6967_v51 }
 0x303   :  { %v2353_v58 = vpop.f32.mrf.mxu1 }
 0x304   :  { %v1540_v60 = vpop.f32.mrf.mxu0  ;;  %v2383_v12 = vadd.f32 %v2353_v58, %v1518_v13  ;;  %v5257_v40 = vpop.eup %5256 }
 0x305   :  { %v1541_v5 = vadd.f32 %v6972_v59, %v1540_v60  ;;  %v2421_v58 = vpop.f32.mrf.mxu2 }
 0x306   :  { %5258 = vtanh.f32 %v2383_v12  ;;  %4787 = vmatmul.msk.bf16.gmra.mxu0 %vm942_vm1, %v5019_v36 }
 0x307   :  { %v2449_v24 = vadd.f32 %v2409_v38, %v1541_v5  ;;  %v5020_v38 = vld [vmem:[%s7858_s0 + $0x188] sm:$0xff] }
 0x309   :  { %5260 = vtanh.f32 %v2449_v24 }
 0x30b   :  { %v2356_v10 = vpop.f32.mrf.mxu1 }
 0x30c   :  { %v1542_v21 = vpop.f32.mrf.mxu0  ;;  %v5259_v14 = vpop.eup %5258  ;;  %v2384_v19 = vadd.f32 %v2356_v10, %v1521_v22  ;;  %v5021_v22 = vld [vmem:[%s7858_s0 + $0x190] sm:$0xff] }
 0x30d   :  { %v1543_v37 = vadd.f32 %v6972_v59, %v1542_v21  ;;  %v2500_v26 = vpack.c.bf16 %v5259_v14, %v5257_v40 }
 0x30f   :  { %v2450_v27 = vadd.f32 %v2411_v3, %v1543_v37  ;;  %2528 = vmatmul.bf16.gmra.mxu3 %v2500_v26  ;;  %v5261_v36 = vpop.eup %5260  ;;  %v1526_v37 = vadd.f32 %v6972_v59, %v6981_v8 }
 0x311   :  { %5262 = vtanh.f32 %v2450_v27  ;;  %v1528_v27 = vadd.f32 %v6972_v59, %v6984_v63 }
 0x312   :  { %5264 = vtanh.f32 %v2384_v19 }
 0x313   :  { %v2358_v47 = vpop.f32.mrf.mxu1 }
 0x314   :  { %v1545_v4 = vpop.f32.mrf.mxu0  ;;  %v2385_v13 = vadd.f32 %v2358_v47, %v1523_v7 }
 0x315   :  { %v1546_v60 = vadd.f32 %v6972_v59, %v1545_v4 }
 0x316   :  { %5266 = vtanh.f32 %v2385_v13  ;;  %4788 = vmatmul.msk.bf16.gmra.mxu0 %vm942_vm1, %v5020_v38 }
 0x317   :  { %v5263_v3 = vpop.eup %5262  ;;  %v2451_v12 = vadd.f32 %v2414_v55, %v1546_v60  ;;  %v2424_v55 = vpop.f32.mrf.mxu2 }
 0x318   :  { %v2570_v33 = vpack.c.bf16 %v5263_v3, %v5261_v36  ;;  %v5265_v51 = vpop.eup %5264 }
 0x319   :  { %5268 = vtanh.f32 %v2451_v12 }
 0x31a   :  { %2586 = vmatmul.bf16.vlgmr.msrb.gmra.mxu1 %v2570_v33 }
 0x31b   :  { %3112 = vmatpush.bf16.msrb.mxu1 %v6800_v0  ;;  %v2361_v40 = vpop.f32.mrf.mxu1 }
 0x31c   :  { %v1547_v5 = vpop.f32.mrf.mxu0  ;;  %v5267_v24 = vpop.eup %5266  ;;  %v2386_v26 = vadd.f32 %v2361_v40, %v1526_v37  ;;  %v1531_v40 = vadd.f32 %v6972_v59, %v6994_v15 }
 0x31d   :  { %v1548_v21 = vadd.f32 %v6972_v59, %v1547_v5  ;;  %v2501_v10 = vpack.c.bf16 %v5267_v24, %v5265_v51 }
 0x31f   :  { %v2452_v14 = vadd.f32 %v2416_v42, %v1548_v21  ;;  %3113 = vmatpush.bf16.msrb.mxu1 %v6816_v56  ;;  %2533 = vmatmul.bf16.gmra.mxu3 %v2501_v10  ;;  %v5269_v38 = vpop.eup %5268  ;;  %v2426_v51 = vpop.f32.mrf.mxu2  ;;  %v5022_v21 = vld [vmem:[%s7858_s0 + $0x198] sm:$0xff] }
 0x321   :  { %5270 = vtanh.f32 %v2452_v14 }
 0x322   :  { %5272 = vtanh.f32 %v2386_v26 }
 0x323   :  { %3114 = vmatpush.bf16.msrb.mxu1 %v6824_v25  ;;  %v2363_v19 = vpop.f32.mrf.mxu1 }
 0x324   :  { %v1550_v42 = vpop.f32.mrf.mxu0  ;;  %v2387_v7 = vadd.f32 %v2363_v19, %v1528_v27 }
 0x325   :  { %v1551_v63 = vadd.f32 %v6972_v59, %v1550_v42 }
 0x326   :  { %5274 = vtanh.f32 %v2387_v7  ;;  %4789 = vmatmul.msk.bf16.gmra.mxu0 %vm942_vm1, %v5021_v22 }
 0x327   :  { %v5271_v8 = vpop.eup %5270  ;;  %3115 = vmatpush.bf16.msrb.mxu1 %v6833_v17  ;;  %v2453_v13 = vadd.f32 %v2419_v23, %v1551_v63  ;;  %v1533_v23 = vadd.f32 %v6972_v59, %v6999_v6  ;;  %v2429_v15 = vpop.f32.mrf.mxu2 }
 0x328   :  { %v2571_v4 = vpack.c.bf16 %v5271_v8, %v5269_v38  ;;  %v5273_v47 = vpop.eup %5272 }
 0x329   :  { %5276 = vtanh.f32 %v2453_v13 }
 0x32a   :  { %2591 = vmatmul.bf16.gmra.mxu1 %v2571_v4 }
 0x32b   :  { %3116 = vmatpush.bf16.msrb.mxu1 %v6844_v48  ;;  %v2366_v3 = vpop.f32.mrf.mxu1 }
 0x32c   :  { %v1552_v36 = vpop.f32.mrf.mxu0  ;;  %v5275_v33 = vpop.eup %5274  ;;  %v2388_v24 = vadd.f32 %v2366_v3, %v1531_v40  ;;  %v1538_v3 = vadd.f32 %v6972_v59, %v7015_v61 }
 0x32d   :  { %v1553_v60 = vadd.f32 %v6972_v59, %v1552_v36  ;;  %v2502_v12 = vpack.c.bf16 %v5275_v33, %v5273_v47  ;;  %v1536_v47 = vadd.f32 %v6972_v59, %v7010_v31 }
 0x32f   :  { %v2454_v5 = vadd.f32 %v2421_v58, %v1553_v60  ;;  %3117 = vmatpush.bf16.msrb.mxu1 %v6860_v18  ;;  %2538 = vmatmul.bf16.gmra.mxu3 %v2502_v12  ;;  %v5277_v37 = vpop.eup %5276  ;;  %v2431_v13 = vpop.f32.mrf.mxu2 }
 0x331   :  { %5278 = vtanh.f32 %v2454_v5 }
 0x332   :  { %5280 = vtanh.f32 %v2388_v24 }
 0x333   :  { %3118 = vmatpush.bf16.msrb.mxu1 %v6868_v52  ;;  %v2368_v58 = vpop.f32.mrf.mxu1 }
 0x334   :  { %v1555_v10 = vpop.f32.mrf.mxu0  ;;  %v2389_v14 = vadd.f32 %v2368_v58, %v1533_v23 }
 0x335   :  { %v1556_v6 = vadd.f32 %v6972_v59, %v1555_v10 }
 0x336   :  { %5282 = vtanh.f32 %v2389_v14  ;;  %4790 = vmatmul.msk.bf16.gmra.mxu0 %vm942_vm1, %v5022_v21 }
 0x337   :  { %v5279_v26 = vpop.eup %5278  ;;  %3119 = vmatpush.bf16.msrb.mxu1 %v6877_v20  ;;  %v2455_v42 = vadd.f32 %v2424_v55, %v1556_v6  ;;  %v5023_v55 = vld [vmem:[%s7858_s0 + $0x1a0] sm:$0xff]  ;;  %v2434_v23 = vpop.f32.mrf.mxu2 }
 0x338   :  { %v2572_v27 = vpack.c.bf16 %v5279_v26, %v5277_v37  ;;  %v5281_v22 = vpop.eup %5280  ;;  %v5024_v26 = vld [vmem:[%s7858_s0 + $0x1a8] sm:$0xff] }
 0x339   :  { %5284 = vtanh.f32 %v2455_v42 }
 0x33a   :  { %2596 = vmatmul.bf16.gmra.mxu1 %v2572_v27 }
 0x33b   :  { %v2371_v7 = vpop.f32.mrf.mxu1 }
 0x33c   :  { %v1557_v19 = vpop.f32.mrf.mxu0  ;;  %v5283_v38 = vpop.eup %5282  ;;  %v2390_v36 = vadd.f32 %v2371_v7, %v1536_v47  ;;  %v5025_v47 = vld [vmem:[%s7858_s0 + $0x1b0] sm:$0xff] }
 0x33d   :  { %v1558_v8 = vadd.f32 %v6972_v59, %v1557_v19  ;;  %v2503_v63 = vpack.c.bf16 %v5283_v38, %v5281_v22 }
 0x33f   :  { %v2456_v4 = vadd.f32 %v2426_v51, %v1558_v8  ;;  %2543 = vmatmul.bf16.gmra.mxu3 %v2503_v63  ;;  %v5285_v5 = vpop.eup %5284  ;;  %v2436_v22 = vpop.f32.mrf.mxu2 }
 0x341   :  { %5286 = vtanh.f32 %v2456_v4 }
 0x342   :  { %5288 = vtanh.f32 %v2390_v36 }
 0x343   :  { %v2373_v60 = vpop.f32.mrf.mxu1 }
 0x344   :  { %v1560_v33 = vpop.f32.mrf.mxu0  ;;  %v2391_v12 = vadd.f32 %v2373_v60, %v1538_v3 }
 0x345   :  { %v1561_v31 = vadd.f32 %v6972_v59, %v1560_v33 }
 0x346   :  { %5290 = vtanh.f32 %v2391_v12  ;;  %4791 = vmatmul.msk.bf16.gmra.mxu0 %vm942_vm1, %v5023_v55 }
 0x347   :  { %v5287_v51 = vpop.eup %5286  ;;  %v2457_v61 = vadd.f32 %v2429_v15, %v1561_v31  ;;  %v2439_v4 = vpop.f32.mrf.mxu2 }
 0x348   :  { %v2573_v40 = vpack.c.bf16 %v5287_v51, %v5285_v5  ;;  %v5289_v24 = vpop.eup %5288 }
 0x349   :  { %5292 = vtanh.f32 %v2457_v61 }
 0x34a   :  { %2601 = vmatmul.bf16.gmra.mxu1 %v2573_v40 }
 0x34c   :  { %v1562_v21 = vpop.f32.mrf.mxu0  ;;  %v5291_v10 = vpop.eup %5290 }
 0x34d   :  { %v1563_v58 = vadd.f32 %v6972_v59, %v1562_v21  ;;  %v2504_v14 = vpack.c.bf16 %v5291_v10, %v5289_v24 }
 0x34f   :  { %v2458_v37 = vadd.f32 %v2431_v13, %v1563_v58  ;;  %2548 = vmatmul.bf16.gmra.mxu3 %v2504_v14  ;;  %v5293_v27 = vpop.eup %5292  ;;  %v2441_v12 = vpop.f32.mrf.mxu2 }
 0x351   :  { %5294 = vtanh.f32 %v2458_v37 }
 0x354   :  { %v1565_v6 = vpop.f32.mrf.mxu0 }
 0x355   :  { %v1566_v15 = vadd.f32 %v6972_v59, %v1565_v6 }
 0x356   :  { %4792 = vmatmul.msk.bf16.gmra.mxu0 %vm942_vm1, %v5024_v26 }
 0x357   :  { %v5295_v42 = vpop.eup %5294  ;;  %v2459_v7 = vadd.f32 %v2434_v23, %v1566_v15  ;;  %v5026_v23 = vld [vmem:[%s7858_s0 + $0x1b8] sm:$0xff]  ;;  %v2444_v61 = vpop.f32.mrf.mxu2 }
 0x358   :  { %v2574_v19 = vpack.c.bf16 %v5295_v42, %v5293_v27 }
 0x359   :  { %5296 = vtanh.f32 %v2459_v7 }
 0x35a   :  { %2606 = vmatmul.bf16.gmra.mxu1 %v2574_v19  ;;  %v5027_v19 = vld [vmem:[%s7858_s0 + $0x1c0] sm:$0xff] }
 0x35c   :  { %v1567_v38 = vpop.f32.mrf.mxu0 }
 0x35d   :  { %v1568_v8 = vadd.f32 %v6972_v59, %v1567_v38 }
 0x35f   :  { %v2460_v63 = vadd.f32 %v2436_v22, %v1568_v8  ;;  %v5297_v36 = vpop.eup %5296  ;;  %v2446_v42 = vpop.f32.mrf.mxu2 }
 0x361   :  { %5298 = vtanh.f32 %v2460_v63 }
 0x362   :  { %v2514_v55 = vpop.f32.mrf.mxu3 }
 0x364   :  { %v1570_v13 = vpop.f32.mrf.mxu0 }
 0x365   :  { %v1571_v33 = vadd.f32 %v6972_v59, %v1570_v13 }
 0x366   :  { %4793 = vmatmul.msk.bf16.gmra.mxu0 %vm942_vm1, %v5025_v47 }
 0x367   :  { %v5299_v3 = vpop.eup %5298  ;;  %v2461_v5 = vadd.f32 %v2439_v4, %v1571_v33 }
 0x368   :  { %v2575_v60 = vpack.c.bf16 %v5299_v3, %v5297_v36 }
 0x369   :  { %5300 = vtanh.f32 %v2461_v5 }
 0x36a   :  { %2611 = vmatmul.bf16.gmra.mxu1 %v2575_v60  ;;  %v2516_v24 = vpop.f32.mrf.mxu3 }
 0x36c   :  { %v1572_v51 = vpop.f32.mrf.mxu0 }
 0x36d   :  { %v1573_v31 = vadd.f32 %v6972_v59, %v1572_v51 }
 0x36f   :  { %v2462_v40 = vadd.f32 %v2441_v12, %v1573_v31  ;;  %v5301_v10 = vpop.eup %5300  ;;  %v5028_v12 = vld [vmem:[%s7858_s0 + $0x1c8] sm:$0xff] }
 0x371   :  { %5302 = vtanh.f32 %v2462_v40 }
 0x372   :  { %v2519_v26 = vpop.f32.mrf.mxu3 }
 0x374   :  { %v1575_v21 = vpop.f32.mrf.mxu0 }
 0x375   :  { %v1576_v14 = vadd.f32 %v6972_v59, %v1575_v21 }
 0x376   :  { %4794 = vmatmul.msk.bf16.gmra.mxu0 %vm942_vm1, %v5026_v23 }
 0x377   :  { %v5303_v58 = vpop.eup %5302  ;;  %v2463_v6 = vadd.f32 %v2444_v61, %v1576_v14 }
 0x378   :  { %v2576_v37 = vpack.c.bf16 %v5303_v58, %v5301_v10  ;;  %v5029_v58 = vld [vmem:[%s7858_s0 + $0x1d0] sm:$0xff] }
 0x379   :  { %5304 = vtanh.f32 %v2463_v6 }
 0x37a   :  { %2616 = vmatmul.bf16.gmra.mxu1 %v2576_v37  ;;  %v2521_v8 = vpop.f32.mrf.mxu3 }
 0x37c   :  { %v1577_v27 = vpop.f32.mrf.mxu0 }
 0x37d   :  { %v1578_v22 = vadd.f32 %v6972_v59, %v1577_v27 }
 0x37f   :  { %v2464_v15 = vadd.f32 %v2446_v42, %v1578_v22  ;;  %v5305_v38 = vpop.eup %5304 }
 0x381   :  { %5306 = vtanh.f32 %v2464_v15 }
 0x382   :  { %v2524_v60 = vpop.f32.mrf.mxu3 }
 0x384   :  { %v1580_v7 = vpop.f32.mrf.mxu0 }
 0x385   :  { %v1581_v4 = vadd.f32 %v6972_v59, %v1580_v7 }
 0x386   :  { %4795 = vmatmul.msk.bf16.gmra.mxu0 %vm942_vm1, %v5027_v19 }
 0x387   :  { %v5307_v63 = vpop.eup %5306  ;;  %v2554_v13 = vadd.f32 %v2514_v55, %v1581_v4 }
 0x388   :  { %v2577_v47 = vpack.c.bf16 %v5307_v63, %v5305_v38 }
 0x389   :  { %5308 = vtanh.f32 %v2554_v13 }
 0x38a   :  { %2621 = vmatmul.bf16.gmra.mxu1 %v2577_v47  ;;  %v2526_v55 = vpop.f32.mrf.mxu3 }
 0x38c   :  { %v1582_v36 = vpop.f32.mrf.mxu0 }
 0x38d   :  { %v1583_v3 = vadd.f32 %v6972_v59, %v1582_v36  ;;  %v5031_v36 = vld [vmem:[%s7858_s0 + $0x1e0] sm:$0xff] }
 0x38f   :  { %v2555_v33 = vadd.f32 %v2516_v24, %v1583_v3  ;;  %v5309_v51 = vpop.eup %5308 }
 0x391   :  { %5310 = vtanh.f32 %v2555_v33 }
 0x392   :  { %v2529_v14 = vpop.f32.mrf.mxu3 }
 0x394   :  { %v1585_v5 = vpop.f32.mrf.mxu0 }
 0x395   :  { %v1586_v23 = vadd.f32 %v6972_v59, %v1585_v5 }
 0x396   :  { %4796 = vmatmul.msk.bf16.gmra.mxu0 %vm942_vm1, %v5028_v12 }
 0x397   :  { %v5311_v31 = vpop.eup %5310  ;;  %v2556_v24 = vadd.f32 %v2519_v26, %v1586_v23 }
 0x398   :  { %v2675_v40 = vpack.c.bf16 %v5311_v31, %v5309_v51 }
 0x399   :  { %5312 = vtanh.f32 %v2556_v24 }
 0x39a   :  { %2691 = vmatmul.bf16.vlgmr.msrb.gmra.mxu2 %v2675_v40  ;;  %v2531_v15 = vpop.f32.mrf.mxu3 }
 0x39b   :  { %3217 = vmatpush.bf16.msrb.mxu2 %v6800_v0 }
 0x39c   :  { %v1587_v61 = vpop.f32.mrf.mxu0 }
 0x39d   :  { %v1588_v21 = vadd.f32 %v6972_v59, %v1587_v61 }
 0x39f   :  { %v2557_v10 = vadd.f32 %v2521_v8, %v1588_v21  ;;  %3218 = vmatpush.bf16.msrb.mxu2 %v6816_v56  ;;  %v5313_v6 = vpop.eup %5312 }
 0x3a1   :  { %5314 = vtanh.f32 %v2557_v10 }
 0x3a3   :  { %3219 = vmatpush.bf16.msrb.mxu2 %v6824_v25 }
 0x3a4   :  { %v1590_v37 = vpop.f32.mrf.mxu0 }
 0x3a5   :  { %v1591_v0 = vadd.f32 %v6972_v59, %v1590_v37 }
 0x3a6   :  { %4797 = vmatmul.msk.bf16.gmra.mxu0 %vm942_vm1, %v5029_v58 }
 0x3a7   :  { %v5315_v27 = vpop.eup %5314  ;;  %3220 = vmatpush.bf16.msrb.mxu2 %v6833_v17  ;;  %v2558_v56 = vadd.f32 %v2524_v60, %v1591_v0  ;;  %v5030_v17 = vld [vmem:[%s7858_s0 + $0x1d8] sm:$0xff] }
 0x3a8   :  { %v2676_v26 = vpack.c.bf16 %v5315_v27, %v5313_v6 }
 0x3a9   :  { %5316 = vtanh.f32 %v2558_v56  ;;  %v5033_v56 = vld [vmem:[%s7858_s0 + $0x1f0] sm:$0xff] }
 0x3aa   :  { %2696 = vmatmul.bf16.gmra.mxu2 %v2676_v26 }
 0x3ab   :  { %3221 = vmatpush.bf16.msrb.mxu2 %v6844_v48  ;;  %v2534_v48 = vpop.f32.mrf.mxu3 }
 0x3ac   :  { %v1592_v22 = vpop.f32.mrf.mxu0 }
 0x3ad   :  { %v1593_v42 = vadd.f32 %v6972_v59, %v1592_v22 }
 0x3af   :  { %v2559_v25 = vadd.f32 %v2526_v55, %v1593_v42  ;;  %3222 = vmatpush.bf16.msrb.mxu2 %v6860_v18  ;;  %v5317_v7 = vpop.eup %5316  ;;  %v5032_v55 = vld [vmem:[%s7858_s0 + $0x1e8] sm:$0xff] }
 0x3b1   :  { %5318 = vtanh.f32 %v2559_v25  ;;  %v2587_v25 = vpop.f32.mrf.mxu1 }
 0x3b3   :  { %3223 = vmatpush.bf16.msrb.mxu2 %v6868_v52  ;;  %v2536_v52 = vpop.f32.mrf.mxu3 }
 0x3b4   :  { %v1595_v19 = vpop.f32.mrf.mxu0 }
 0x3b5   :  { %v1596_v8 = vadd.f32 %v6972_v59, %v1595_v19 }
 0x3b6   :  { %4798 = vmatmul.msk.bf16.gmra.mxu0 %vm942_vm1, %v5030_v17 }
 0x3b7   :  { %v5319_v38 = vpop.eup %5318  ;;  %3224 = vmatpush.bf16.msrb.mxu2 %v6877_v20  ;;  %v2560_v18 = vadd.f32 %v2529_v14, %v1596_v8 }
 0x3b8   :  { %v2677_v63 = vpack.c.bf16 %v5319_v38, %v5317_v7 }
 0x3b9   :  { %5320 = vtanh.f32 %v2560_v18  ;;  %v2589_v18 = vpop.f32.mrf.mxu1 }
 0x3ba   :  { %2701 = vmatmul.bf16.gmra.mxu2 %v2677_v63 }
 0x3bb   :  { %v2539_v5 = vpop.f32.mrf.mxu3 }
 0x3bc   :  { %v1597_v4 = vpop.f32.mrf.mxu0 }
 0x3bd   :  { %v1598_v47 = vadd.f32 %v6972_v59, %v1597_v4  ;;  %v5034_v4 = vld [vmem:[%s7858_s0 + $0x1f8] sm:$0xff] }
 0x3bf   :  { %v2561_v13 = vadd.f32 %v2531_v15, %v1598_v47  ;;  %v5321_v33 = vpop.eup %5320 }
 0x3c1   :  { %5322 = vtanh.f32 %v2561_v13 }
 0x3c3   :  { %v2541_v21 = vpop.f32.mrf.mxu3 }
 0x3c4   :  { %v1600_v3 = vpop.f32.mrf.mxu0 }
 0x3c5   :  { %v1601_v60 = vadd.f32 %v6972_v59, %v1600_v3 }
 0x3c6   :  { %4799 = vmatmul.msk.bf16.gmra.mxu0 %vm942_vm1, %v5031_v36 }
 0x3c7   :  { %v5323_v20 = vpop.eup %5322  ;;  %v2562_v51 = vadd.f32 %v2534_v48, %v1601_v60 }
 0x3c8   :  { %v2678_v12 = vpack.c.bf16 %v5323_v20, %v5321_v33  ;;  %v2592_v20 = vpop.f32.mrf.mxu1 }
 0x3c9   :  { %5324 = vtanh.f32 %v2562_v51 }
 0x3ca   :  { %2706 = vmatmul.bf16.gmra.mxu2 %v2678_v12 }
 0x3cb   :  { %v2544_v26 = vpop.f32.mrf.mxu3 }
 0x3cc   :  { %v1602_v31 = vpop.f32.mrf.mxu0 }
 0x3cd   :  { %v1603_v40 = vadd.f32 %v6972_v59, %v1602_v31 }
 0x3cf   :  { %v2563_v23 = vadd.f32 %v2536_v52, %v1603_v40  ;;  %v5325_v61 = vpop.eup %5324  ;;  %v5035_v40 = vld [vmem:[%s7858_s0 + $0x200] sm:$0xff] }
 0x3d1   :  { %5326 = vtanh.f32 %v2563_v23 }
 0x3d3   :  { %v2546_v7 = vpop.f32.mrf.mxu3 }
 0x3d4   :  { %v1605_v24 = vpop.f32.mrf.mxu0 }
 0x3d5   :  { %v1606_v58 = vadd.f32 %v6972_v59, %v1605_v24  ;;  %v2594_v24 = vpop.f32.mrf.mxu1 }
 0x3d6   :  { %4800 = vmatmul.msk.bf16.gmra.mxu0 %vm942_vm1, %v5032_v55 }
 0x3d7   :  { %v5327_v10 = vpop.eup %5326  ;;  %v2564_v37 = vadd.f32 %v2539_v5, %v1606_v58 }
 0x3d8   :  { %v2679_v14 = vpack.c.bf16 %v5327_v10, %v5325_v61 }
 0x3d9   :  { %5328 = vtanh.f32 %v2564_v37 }
 0x3da   :  { %2711 = vmatmul.bf16.gmra.mxu2 %v2679_v14 }
 0x3db   :  { %v2549_v47 = vpop.f32.mrf.mxu3 }
 0x3dc   :  { %v1607_v6 = vpop.f32.mrf.mxu0 }
 0x3dd   :  { %v1608_v27 = vadd.f32 %v6972_v59, %v1607_v6 }
 0x3df   :  { %v2565_v0 = vadd.f32 %v2541_v21, %v1608_v27  ;;  %v5329_v42 = vpop.eup %5328  ;;  %v2597_v27 = vpop.f32.mrf.mxu1 }
 0x3e1   :  { %5330 = vtanh.f32 %v2565_v0  ;;  %v5036_v0 = vld [vmem:[%s7858_s0 + $0x208] sm:$0xff] }
 0x3e3   :  { %v2551_v51 = vpop.f32.mrf.mxu3 }
 0x3e4   :  { %v1610_v22 = vpop.f32.mrf.mxu0 }
 0x3e5   :  { %v1611_v17 = vadd.f32 %v6972_v59, %v1610_v22 }
 0x3e6   :  { %4801 = vmatmul.msk.bf16.gmra.mxu0 %vm942_vm1, %v5033_v56 }
 0x3e7   :  { %v5331_v15 = vpop.eup %5330  ;;  %v2566_v38 = vadd.f32 %v2544_v26, %v1611_v17  ;;  %v5765_v17 = vld [vmem:[%s7860_s2 + $0x38] sm:$0xff] }
 0x3e8   :  { %v2680_v19 = vpack.c.bf16 %v5331_v15, %v5329_v42 }
 0x3e9   :  { %5332 = vtanh.f32 %v2566_v38 }
 0x3ea   :  { %2716 = vmatmul.bf16.gmra.mxu2 %v2680_v19 }
 0x3ec   :  { %v1612_v48 = vpop.f32.mrf.mxu0 }
 0x3ed   :  { %v1613_v8 = vadd.f32 %v6972_v59, %v1612_v48 }
 0x3ef   :  { %v2567_v63 = vadd.f32 %v2546_v7, %v1613_v8  ;;  %v5333_v52 = vpop.eup %5332 }
 0x3f1   :  { %5334 = vtanh.f32 %v2567_v63  ;;  %v5766_v63 = vld [vmem:[%s7860_s2 + $0x30] sm:$0xff] }
 0x3f4   :  { %v1615_v13 = vpop.f32.mrf.mxu0 }
 0x3f5   :  { %v1616_v3 = vadd.f32 %v6972_v59, %v1615_v13 }
 0x3f6   :  { %4802 = vmatmul.msk.bf16.gmra.mxu0 %vm942_vm1, %v5034_v4  ;;  %v5767_v4 = vld [vmem:[%s7860_s2 + $0x28] sm:$0xff] }
 0x3f7   :  { %v5335_v36 = vpop.eup %5334  ;;  %v2568_v60 = vadd.f32 %v2549_v47, %v1616_v3 }
 0x3f8   :  { %v2681_v33 = vpack.c.bf16 %v5335_v36, %v5333_v52 }
 0x3f9   :  { %5336 = vtanh.f32 %v2568_v60 }
 0x3fa   :  { %2721 = vmatmul.bf16.gmra.mxu2 %v2681_v33  ;;  %v5768_v33 = vld [vmem:[%s7860_s2 + $0x20] sm:$0xff] }
 0x3fc   :  { %v1617_v12 = vpop.f32.mrf.mxu0 }
 0x3fd   :  { %v1618_v5 = vadd.f32 %v6972_v59, %v1617_v12  ;;  %v5769_v12 = vld [vmem:[%s7860_s2 + $0x18] sm:$0xff] }
 0x3ff   :  { %v2569_v31 = vadd.f32 %v2551_v51, %v1618_v5  ;;  %v5337_v55 = vpop.eup %5336 }
 0x401   :  { %5338 = vtanh.f32 %v2569_v31 }
 0x404   :  { %v1620_v23 = vpop.f32.mrf.mxu0 }
 0x405   :  { %v1621_v21 = vadd.f32 %v6972_v59, %v1620_v23 }
 0x406   :  { %4803 = vmatmul.msk.bf16.gmra.mxu0 %vm942_vm1, %v5035_v40 }
 0x407   :  { %v5339_v61 = vpop.eup %5338  ;;  %v2627_v58 = vadd.f32 %v2587_v25, %v1621_v21  ;;  %v2599_v25 = vpop.f32.mrf.mxu1 }
 0x408   :  { %v2682_v10 = vpack.c.bf16 %v5339_v61, %v5337_v55  ;;  %v5771_v61 = vld [vmem:[%s7860_s2 + $0x8] sm:$0xff] }
 0x409   :  { %5340 = vtanh.f32 %v2627_v58 }
 0x40a   :  { %2726 = vmatmul.bf16.gmra.mxu2 %v2682_v10 }
 0x40c   :  { %v1622_v14 = vpop.f32.mrf.mxu0 }
 0x40d   :  { %v1623_v37 = vadd.f32 %v6972_v59, %v1622_v14 }
 0x40f   :  { %v2628_v6 = vadd.f32 %v2589_v18, %v1623_v37  ;;  %v5341_v56 = vpop.eup %5340  ;;  %v5037_v18 = vld [vmem:[%s7858_s0 + $0x210] sm:$0xff]  ;;  %v2602_v47 = vpop.f32.mrf.mxu1  ;;  %v5772_v37 = vld [vmem:[%s7860_s2] sm:$0xff] }
 0x411   :  { %5342 = vtanh.f32 %v2628_v6 }
 0x414   :  { %v1625_v26 = vpop.f32.mrf.mxu0 }
 0x415   :  { %v1626_v15 = vadd.f32 %v6972_v59, %v1625_v26 }
 0x416   :  { %4804 = vmatmul.msk.bf16.gmra.mxu0 %vm942_vm1, %v5036_v0 }
 0x417   :  { %v5343_v22 = vpop.eup %5342  ;;  %v2629_v19 = vadd.f32 %v2592_v20, %v1626_v15  ;;  %v2604_v23 = vpop.f32.mrf.mxu1 }
 0x418   :  { %v2748_v42 = vpack.c.bf16 %v5343_v22, %v5341_v56 }
 0x419   :  { %5344 = vtanh.f32 %v2629_v19 }
 0x41a   :  { %2764 = vmatmul.bf16.vlgmr.msrb.gmra.mxu3 %v2748_v42 }
 0x41b   :  { %3290 = vmatpush.bf16.msrb.mxu3 %v5765_v17 }
 0x41c   :  { %v1627_v7 = vpop.f32.mrf.mxu0 }
 0x41d   :  { %v1628_v38 = vadd.f32 %v6972_v59, %v1627_v7  ;;  %v7165_v48 = vpop.f32.mrf.mxu2 }
 0x41f   :  { %v2630_v8 = vadd.f32 %v2594_v24, %v1628_v38  ;;  %3291 = vmatpush.bf16.msrb.mxu3 %v5766_v63  ;;  %v5345_v36 = vpop.eup %5344  ;;  %v5770_v24 = vld [vmem:[%s7860_s2 + $0x10] sm:$0xff]  ;;  %v2607_v6 = vpop.f32.mrf.mxu1  ;;  %s5805_s2 = smov 8  }
 0x421   :  { %5346 = vtanh.f32 %v2630_v8 }
 0x423   :  { %3292 = vmatpush.bf16.msrb.mxu3 %v5767_v4 }
 0x424   :  { %v1630_v13 = vpop.f32.mrf.mxu0 }
 0x425   :  { %v7176_v52 = vpop.f32.mrf.mxu2  ;;  %v1631_v20 = vadd.f32 %v6972_v59, %v1630_v13 }
 0x426   :  { %4805 = vmatmul.msk.bf16.gmra.mxu0 %vm942_vm1, %v5037_v18 }
 0x427   :  { %v5347_v3 = vpop.eup %5346  ;;  %3293 = vmatpush.bf16.msrb.mxu3 %v5768_v33  ;;  %v2631_v5 = vadd.f32 %v2597_v27, %v1631_v20  ;;  %v1676_v33 = vadd.f32 %v6972_v59, %v5948_v29 }
 0x428   :  { %v2749_v60 = vpack.c.bf16 %v5347_v3, %v5345_v36 }
 0x429   :  { %5348 = vtanh.f32 %v2631_v5 }
 0x42a   :  { %2769 = vmatmul.bf16.gmra.mxu3 %v2749_v60  ;;  %v1678_v60 = vadd.f32 %v6972_v59, %v5968_v34 }
 0x42b   :  { %3294 = vmatpush.bf16.msrb.mxu3 %v5769_v12 }
 0x42c   :  { %v1632_v51 = vpop.f32.mrf.mxu0 }
 0x42d   :  { %v1633_v31 = vadd.f32 %v6972_v59, %v1632_v51  ;;  %v7187_v40 = vpop.f32.mrf.mxu2 }
 0x42f   :  { %v2632_v55 = vadd.f32 %v2599_v25, %v1633_v31  ;;  %3295 = vmatpush.bf16.msrb.mxu3 %v5770_v24  ;;  %v5349_v58 = vpop.eup %5348  ;;  %v2609_v25 = vpop.f32.mrf.mxu1 }
 0x431   :  { %5350 = vtanh.f32 %v2632_v55 }
 0x433   :  { %3296 = vmatpush.bf16.msrb.mxu3 %v5771_v61 }
 0x434   :  { %v1635_v21 = vpop.f32.mrf.mxu0 }
 0x435   :  { %v7195_v10 = vpop.f32.mrf.mxu2  ;;  %v1636_v27 = vadd.f32 %v6972_v59, %v1635_v21 }
 0x437   :  { %v5351_v14 = vpop.eup %5350  ;;  %3297 = vmatpush.bf16.msrb.mxu3 %v5772_v37  ;;  %v2633_v26 = vadd.f32 %v2602_v47, %v1636_v27  ;;  %v2612_v18 = vpop.f32.mrf.mxu1 }
 0x438   :  { %v2750_v0 = vpack.c.bf16 %v5351_v14, %v5349_v58 }
 0x439   :  { %5352 = vtanh.f32 %v2633_v26  ;;  %v1681_v26 = vadd.f32 %v6972_v59, %v5980_v39 }
 0x43a   :  { %2774 = vmatmul.bf16.gmra.mxu3 %v2750_v0 }
 0x43c   :  { %v1637_v56 = vpop.f32.mrf.mxu0 }
 0x43d   :  { %v1638_v22 = vadd.f32 %v6972_v59, %v1637_v56  ;;  %v7202_v42 = vpop.f32.mrf.mxu2 }
 0x43f   :  { %v2634_v15 = vadd.f32 %v2604_v23, %v1638_v22  ;;  %v5353_v7 = vpop.eup %5352  ;;  %v2614_v31 = vpop.f32.mrf.mxu1  ;;  %v1683_v22 = vadd.f32 %v6972_v59, %v5996_v44  ;;  %v7230_v44 = vld [vmem:[%s7861_s3] ss:$0 sm:$0xff] }
 0x441   :  { %5354 = vtanh.f32 %v2634_v15 }
 0x444   :  { %v1640_v17 = vpop.f32.mrf.mxu0 }
 0x445   :  { %v7204_v19 = vpop.f32.mrf.mxu2  ;;  %v1641_v8 = vadd.f32 %v6972_v59, %v1640_v17 }
 0x447   :  { %v5355_v38 = vpop.eup %5354  ;;  %v2635_v4 = vadd.f32 %v2607_v6, %v1641_v8  ;;  %v2617_v0 = vpop.f32.mrf.mxu1 }
 0x448   :  { %v2751_v63 = vpack.c.bf16 %v5355_v38, %v5353_v7 }
 0x449   :  { %5356 = vtanh.f32 %v2635_v4 }
 0x44a   :  { %2779 = vmatmul.bf16.gmra.mxu3 %v2751_v63 }
 0x44c   :  { %v1642_v47 = vpop.f32.mrf.mxu0 }
 0x44d   :  { %v1643_v13 = vadd.f32 %v6972_v59, %v1642_v47  ;;  %v2707_v36 = vpop.f32.mrf.mxu2 }
 0x44e   :  { %v2738_v20 = vadd.f32 %v2707_v36, %v1676_v33 }
 0x44f   :  { %v2636_v3 = vadd.f32 %v2609_v25, %v1643_v13  ;;  %v5357_v51 = vpop.eup %5356 }
 0x451   :  { %5358 = vtanh.f32 %v2636_v3 }
 0x452   :  { %5360 = vtanh.f32 %v2738_v20  ;;  %v1686_v20 = vadd.f32 %v7230_v44, %v6008_v49 }
 0x454   :  { %v1645_v12 = vpop.f32.mrf.mxu0 }
 0x455   :  { %v2709_v5 = vpop.f32.mrf.mxu2  ;;  %v1646_v24 = vadd.f32 %v6972_v59, %v1645_v12  ;;  %v1688_v12 = vadd.f32 %v7230_v44, %v6024_v54 }
 0x456   :  { %v2739_v23 = vadd.f32 %v2709_v5, %v1678_v60 }
 0x457   :  { %v5359_v55 = vpop.eup %5358  ;;  %v2637_v21 = vadd.f32 %v2612_v18, %v1646_v24  ;;  %v2619_v18 = vpop.f32.mrf.mxu1 }
 0x458   :  { %5362 = vtanh.f32 %v2739_v23  ;;  %v2752_v61 = vpack.c.bf16 %v5359_v55, %v5357_v51  ;;  %v7213_v29 = vpop.eup %5360 }
 0x459   :  { %5364 = vtanh.f32 %v2637_v21 }
 0x45a   :  { %2784 = vmatmul.bf16.gmra.mxu3 %v2752_v61 }
 0x45c   :  { %v1647_v58 = vpop.f32.mrf.mxu0 }
 0x45d   :  { %v1648_v14 = vadd.f32 %v6972_v59, %v1647_v58  ;;  %v2712_v37 = vpop.f32.mrf.mxu2 }
 0x45e   :  { %v7216_v34 = vpop.eup %5362  ;;  %v2740_v56 = vadd.f32 %v2712_v37, %v1681_v26 }
 0x45f   :  { %v2638_v6 = vadd.f32 %v2614_v31, %v1648_v14  ;;  %v2856_v27 = vpack.c.bf16 %v7216_v34, %v7213_v29  ;;  %v5365_v17 = vpop.eup %5364  ;;  %v2622_v5 = vpop.f32.mrf.mxu1 }
 0x461   :  { %5366 = vtanh.f32 %v2638_v6 }
 0x462   :  { %5368 = vtanh.f32 %v2740_v56 }
 0x464   :  { %v1650_v15 = vpop.f32.mrf.mxu0 }
 0x465   :  { %v2714_v25 = vpop.f32.mrf.mxu2  ;;  %v1651_v8 = vadd.f32 %v6972_v59, %v1650_v15 }
 0x466   :  { %v2741_v7 = vadd.f32 %v2714_v25, %v1683_v22  ;;  %v7967_v22 = vld [vmem:[#allocation11_spill] sm:$0xff] }
 0x467   :  { %v5367_v38 = vpop.eup %5366  ;;  %v2639_v4 = vadd.f32 %v2617_v0, %v1651_v8  ;;  %v2624_v0 = vpop.f32.mrf.mxu1  ;;  %v1691_v15 = vadd.f32 %v7230_v44, %v7967_v22 }
 0x468   :  { %5370 = vtanh.f32 %v2741_v7  ;;  %v2753_v63 = vpack.c.bf16 %v5367_v38, %v5365_v17  ;;  %v7225_v39 = vpop.eup %5368  ;;  %v7968_v17 = vld [vmem:[#allocation13_spill] sm:$0xff] }
 0x469   :  { %5372 = vtanh.f32 %v2639_v4  ;;  %v1693_v7 = vadd.f32 %v7230_v44, %v7968_v17 }
 0x46a   :  { %2789 = vmatmul.bf16.gmra.mxu3 %v2753_v63 }
 0x46c   :  { %v1652_v47 = vpop.f32.mrf.mxu0 }
 0x46d   :  { %v1653_v13 = vadd.f32 %v7230_v44, %v1652_v47  ;;  %v2717_v36 = vpop.f32.mrf.mxu2 }
 0x46e   :  { %v7233_v3 = vpop.eup %5370  ;;  %v2742_v60 = vadd.f32 %v2717_v36, %v1686_v20 }
 0x46f   :  { %v2640_v33 = vadd.f32 %v2619_v18, %v1653_v13  ;;  %v2857_v59 = vpack.c.bf16 %v7233_v3, %v7225_v39  ;;  %v5373_v23 = vpop.eup %5372 }
 0x471   :  { %5374 = vtanh.f32 %v2640_v33 }
 0x472   :  { %5376 = vtanh.f32 %v2742_v60 }
 0x474   :  { %v1655_v51 = vpop.f32.mrf.mxu0 }
 0x475   :  { %v2719_v31 = vpop.f32.mrf.mxu2  ;;  %v1656_v61 = vadd.f32 %v7230_v44, %v1655_v51 }
 0x476   :  { %v2743_v55 = vadd.f32 %v2719_v31, %v1688_v12 }
 0x477   :  { %v5375_v24 = vpop.eup %5374  ;;  %v2641_v58 = vadd.f32 %v2622_v5, %v1656_v61 }
 0x478   :  { %5378 = vtanh.f32 %v2743_v55  ;;  %v2754_v21 = vpack.c.bf16 %v5375_v24, %v5373_v23  ;;  %v7242_v49 = vpop.eup %5376  ;;  %v7969_v23 = vld [vmem:[#allocation15_spill] sm:$0xff] }
 0x479   :  { %5380 = vtanh.f32 %v2641_v58  ;;  %v1696_v55 = vadd.f32 %v7230_v44, %v7969_v23 }
 0x47a   :  { %2794 = vmatmul.bf16.gmra.mxu3 %v2754_v21 }
 0x47c   :  { %v1657_v14 = vpop.f32.mrf.mxu0 }
 0x47d   :  { %v1658_v37 = vadd.f32 %v7230_v44, %v1657_v14  ;;  %v2722_v6 = vpop.f32.mrf.mxu2 }
 0x47e   :  { %v7245_v54 = vpop.eup %5378  ;;  %v2744_v25 = vadd.f32 %v2722_v6, %v1691_v15 }
 0x47f   :  { %v2642_v26 = vadd.f32 %v2624_v0, %v1658_v37  ;;  %v2858_v56 = vpack.c.bf16 %v7245_v54, %v7242_v49  ;;  %v5381_v63 = vpop.eup %5380 }
 0x481   :  { %5382 = vtanh.f32 %v2642_v26 }
 0x482   :  { %5384 = vtanh.f32 %v2744_v25 }
 0x484   :  { %v1660_v38 = vpop.f32.mrf.mxu0 }
 0x485   :  { %v2724_v8 = vpop.f32.mrf.mxu2  ;;  %v1661_v47 = vadd.f32 %v7230_v44, %v1660_v38 }
 0x486   :  { %v2745_v18 = vadd.f32 %v2724_v8, %v1693_v7 }
 0x487   :  { %v5383_v4 = vpop.eup %5382  ;;  %v2732_v36 = vadd.f32 %v7165_v48, %v1661_v47  ;;  %v7970_v48 = vld [vmem:[#allocation17_spill] sm:$0xff] }
 0x488   :  { %5386 = vtanh.f32 %v2745_v18  ;;  %v2755_v13 = vpack.c.bf16 %v5383_v4, %v5381_v63  ;;  %v7255_v20 = vpop.eup %5384  ;;  %v1698_v61 = vadd.f32 %v7230_v44, %v7970_v48  ;;  %v7971_v63 = vld [vmem:[#allocation19_spill] sm:$0xff] }
 0x489   :  { %5388 = vtanh.f32 %v2732_v36  ;;  %v1701_v18 = vadd.f32 %v7230_v44, %v7971_v63 }
 0x48a   :  { %2799 = vmatmul.bf16.gmra.mxu3 %v2755_v13 }
 0x48c   :  { %v1662_v33 = vpop.f32.mrf.mxu0 }
 0x48d   :  { %v1663_v60 = vadd.f32 %v7230_v44, %v1662_v33  ;;  %v2727_v12 = vpop.f32.mrf.mxu2 }
 0x48e   :  { %v7258_v5 = vpop.eup %5386  ;;  %v2746_v24 = vadd.f32 %v2727_v12, %v1696_v55 }
 0x48f   :  { %v2733_v51 = vadd.f32 %v7176_v52, %v1663_v60  ;;  %v2859_v31 = vpack.c.bf16 %v7258_v5, %v7255_v20  ;;  %v5389_v14 = vpop.eup %5388 }
 0x491   :  { %5390 = vtanh.f32 %v2733_v51 }
 0x492   :  { %5392 = vtanh.f32 %v2746_v24 }
 0x494   :  { %v1665_v21 = vpop.f32.mrf.mxu0 }
 0x495   :  { %v2729_v58 = vpop.f32.mrf.mxu2  ;;  %v1666_v52 = vadd.f32 %v7230_v44, %v1665_v21 }
 0x496   :  { %v2747_v37 = vadd.f32 %v2729_v58, %v1698_v61 }
 0x497   :  { %v5391_v6 = vpop.eup %5390  ;;  %v2734_v26 = vadd.f32 %v7187_v40, %v1666_v52  ;;  %v7972_v40 = vld [vmem:[#allocation21_spill] sm:$0xff] }
 0x498   :  { %v2853_v0 = vpack.c.bf16 %v5391_v6, %v5389_v14  ;;  %5394 = vtanh.f32 %v2747_v37  ;;  %v7269_v15 = vpop.eup %5392  ;;  %v1703_v47 = vadd.f32 %v7230_v44, %v7972_v40  ;;  %v7973_v37 = vld [vmem:[#allocation23_spill] sm:$0xff]  ;;  %v7974_v52 = vld [vmem:[#allocation25_spill] sm:$0xff] }
 0x499   :  { %5396 = vtanh.f32 %v2734_v26  ;;  %v1706_v6 = vadd.f32 %v7230_v44, %v7973_v37  ;;  %v1708_v26 = vadd.f32 %v7230_v44, %v7974_v52  ;;  %v7975_v40 = vld [vmem:[#allocation27_spill] sm:$0xff] }
 0x49a   :  { %2869 = vmatmul.bf16.vlgmr.msra.gmra.mxu1 %v2853_v0 }
 0x49c   :  { %v1667_v22 = vpop.f32.mrf.mxu0 }
 0x49d   :  { %v1668_v25 = vadd.f32 %v7230_v44, %v1667_v22  ;;  %v2765_v17 = vpop.f32.mrf.mxu3 }
 0x49e   :  { %v7272_v7 = vpop.eup %5394  ;;  %v2805_v4 = vadd.f32 %v2765_v17, %v1701_v18 }
 0x49f   :  { %v2735_v38 = vadd.f32 %v7195_v10, %v1668_v25  ;;  %v2860_v8 = vpack.c.bf16 %v7272_v7, %v7269_v15  ;;  %v5397_v33 = vpop.eup %5396 }
 0x4a1   :  { %5398 = vtanh.f32 %v2735_v38 }
 0x4a2   :  { %5400 = vtanh.f32 %v2805_v4 }
 0x4a4   :  { %v1670_v13 = vpop.f32.mrf.mxu0 }
 0x4a5   :  { %v2767_v36 = vpop.f32.mrf.mxu3  ;;  %v1671_v10 = vadd.f32 %v7230_v44, %v1670_v13 }
 0x4a6   :  { %v2806_v60 = vadd.f32 %v2767_v36, %v1703_v47  ;;  %v1711_v47 = vadd.f32 %v7230_v44, %v7975_v40  ;;  %v7976_v36 = vld [vmem:[#allocation29_spill] sm:$0xff] }
 0x4a7   :  { %v5399_v12 = vpop.eup %5398  ;;  %v2736_v23 = vadd.f32 %v7202_v42, %v1671_v10 }
 0x4a8   :  { %5402 = vtanh.f32 %v2806_v60  ;;  %v2854_v51 = vpack.c.bf16 %v5399_v12, %v5397_v33  ;;  %v5401_v24 = vpop.eup %5400  ;;  %v1713_v33 = vadd.f32 %v7230_v44, %v7976_v36 }
 0x4a9   :  { %5404 = vtanh.f32 %v2736_v23 }
 0x4aa   :  { %2874 = vmatmul.bf16.gmra.mxu1 %v2854_v51 }
 0x4ac   :  { %v1672_v55 = vpop.f32.mrf.mxu0 }
 0x4ad   :  { %v1673_v48 = vadd.f32 %v7230_v44, %v1672_v55  ;;  %v2770_v61 = vpop.f32.mrf.mxu3 }
 0x4ae   :  { %v5403_v21 = vpop.eup %5402  ;;  %v2807_v0 = vadd.f32 %v2770_v61, %v1706_v6 }
 0x4af   :  { %v2926_v58 = vpack.c.bf16 %v5403_v21, %v5401_v24  ;;  %v2737_v14 = vadd.f32 %v7204_v19, %v1673_v48  ;;  %v5405_v22 = vpop.eup %5404  ;;  %v7977_v24 = vld [vmem:[#allocation31_spill] sm:$0xff]  ;;  %v7978_v21 = vld [vmem:[#allocation33_spill] sm:$0xff] }
 0x4b0   :  { %v1716_v48 = vadd.f32 %v7230_v44, %v7977_v24 }
 0x4b1   :  { %5406 = vtanh.f32 %v2737_v14  ;;  %2942 = vmatmul.bf16.vlgmr.msra.gmra.mxu2 %v2926_v58  ;;  %v1718_v58 = vadd.f32 %v7230_v44, %v7978_v21 }
 0x4b2   :  { %5408 = vtanh.f32 %v2807_v0  ;;  %v7979_v0 = vld [vmem:[#allocation35_spill] sm:$0xff] }
 0x4b3   :  { %v1721_v52 = vadd.f32 %v7230_v44, %v7979_v0  ;;  %v7988_v0 = vld [vmem:[#allocation62_spill] sm:$0xff] }
 0x4b5   :  { %v2772_v42 = vpop.f32.mrf.mxu3 }
 0x4b6   :  { %v2808_v25 = vadd.f32 %v2772_v42, %v1708_v26  ;;  %v7980_v42 = vld [vmem:[#allocation38_spill] sm:$0xff] }
 0x4b7   :  { %v5407_v17 = vpop.eup %5406 }
 0x4b8   :  { %5410 = vtanh.f32 %v2808_v25  ;;  %v2855_v38 = vpack.c.bf16 %v5407_v17, %v5405_v22  ;;  %v5409_v63 = vpop.eup %5408  ;;  %v1723_v22 = vadd.f32 %v7230_v44, %v7980_v42 }
 0x4ba   :  { %2879 = vmatmul.bf16.gmra.mxu1 %v2855_v38 }
 0x4bd   :  { %v2775_v19 = vpop.f32.mrf.mxu3 }
 0x4be   :  { %v5411_v18 = vpop.eup %5410  ;;  %v2809_v13 = vadd.f32 %v2775_v19, %v1711_v47 }
 0x4bf   :  { %v2927_v4 = vpack.c.bf16 %v5411_v18, %v5409_v63  ;;  %v7981_v63 = vld [vmem:[#allocation41_spill] sm:$0xff] }
 0x4c0   :  { %5412 = vtanh.f32 %v2809_v13  ;;  %v1726_v19 = vadd.f32 %v7230_v44, %v7981_v63 }
 0x4c1   :  { %2947 = vmatmul.bf16.gmra.mxu2 %v2927_v4  ;;  %v7982_v4 = vld [vmem:[#allocation44_spill] sm:$0xff] }
 0x4c2   :  { %v1728_v40 = vadd.f32 %v7230_v44, %v7982_v4 }
 0x4c5   :  { %v2777_v60 = vpop.f32.mrf.mxu3 }
 0x4c6   :  { %v2810_v12 = vadd.f32 %v2777_v60, %v1713_v33  ;;  %v5413_v10 = vpop.eup %5412  ;;  %v7983_v33 = vld [vmem:[#allocation47_spill] sm:$0xff] }
 0x4c7   :  { %v1731_v60 = vadd.f32 %v7230_v44, %v7983_v33 }
 0x4c8   :  { %5414 = vtanh.f32 %v2810_v12 }
 0x4ca   :  { %2884 = vmatmul.bf16.gmra.mxu1 %v2856_v27 }
 0x4cd   :  { %v2780_v51 = vpop.f32.mrf.mxu3 }
 0x4ce   :  { %v5415_v23 = vpop.eup %5414  ;;  %v2811_v61 = vadd.f32 %v2780_v51, %v1716_v48  ;;  %v7985_v48 = vld [vmem:[#allocation53_spill] sm:$0xff] }
 0x4cf   :  { %v2928_v55 = vpack.c.bf16 %v5415_v23, %v5413_v10  ;;  %v7984_v10 = vld [vmem:[#allocation50_spill] sm:$0xff] }
 0x4d0   :  { %5416 = vtanh.f32 %v2811_v61  ;;  %v1733_v51 = vadd.f32 %v7230_v44, %v7984_v10  ;;  %v1736_v61 = vadd.f32 %v7230_v44, %v7985_v48 }
 0x4d1   :  { %2952 = vmatmul.bf16.gmra.mxu2 %v2928_v55 }
 0x4d5   :  { %v2782_v14 = vpop.f32.mrf.mxu3 }
 0x4d6   :  { %v2812_v37 = vadd.f32 %v2782_v14, %v1718_v58  ;;  %v5417_v29 = vpop.eup %5416  ;;  %v7986_v58 = vld [vmem:[#allocation56_spill] sm:$0xff] }
 0x4d7   :  { %v1738_v14 = vadd.f32 %v7230_v44, %v7986_v58 }
 0x4d8   :  { %5418 = vtanh.f32 %v2812_v37 }
 0x4da   :  { %2889 = vmatmul.bf16.gmra.mxu1 %v2857_v59 }
 0x4dd   :  { %v2785_v34 = vpop.f32.mrf.mxu3 }
 0x4de   :  { %v5419_v27 = vpop.eup %5418  ;;  %v2813_v26 = vadd.f32 %v2785_v34, %v1721_v52  ;;  %v1743_v52 = vadd.f32 %v7230_v44, %v7988_v0  ;;  %v7996_v0 = vld [vmem:[#allocation64_spill] sm:$0xff] }
 0x4df   :  { %v2929_v6 = vpack.c.bf16 %v5419_v27, %v5417_v29  ;;  %v7987_v27 = vld [vmem:[#allocation59_spill] sm:$0xff] }
 0x4e0   :  { %5420 = vtanh.f32 %v2813_v26  ;;  %v1741_v15 = vadd.f32 %v7230_v44, %v7987_v27 }
 0x4e1   :  { %2957 = vmatmul.bf16.gmra.mxu2 %v2929_v6 }
 0x4e5   :  { %v2787_v25 = vpop.f32.mrf.mxu3 }
 0x4e6   :  { %v2814_v17 = vadd.f32 %v2787_v25, %v1723_v22  ;;  %v5421_v39 = vpop.eup %5420 }
 0x4e8   :  { %5422 = vtanh.f32 %v2814_v17 }
 0x4ea   :  { %2894 = vmatmul.bf16.gmra.mxu1 %v2858_v56 }
 0x4ed   :  { %v2790_v3 = vpop.f32.mrf.mxu3 }
 0x4ee   :  { %v5423_v59 = vpop.eup %5422  ;;  %v2815_v18 = vadd.f32 %v2790_v3, %v1726_v19  ;;  %v7990_v19 = vld [vmem:[#allocation68_spill] sm:$0xff] }
 0x4ef   :  { %v2930_v38 = vpack.c.bf16 %v5423_v59, %v5421_v39  ;;  %v7989_v59 = vld [vmem:[#allocation65_spill] sm:$0xff] }
 0x4f0   :  { %5424 = vtanh.f32 %v2815_v18  ;;  %v1748_v18 = vadd.f32 %v7230_v44, %v7990_v19 }
 0x4f1   :  { %2962 = vmatmul.bf16.gmra.mxu2 %v2930_v38  ;;  %v1746_v38 = vadd.f32 %v7230_v44, %v7989_v59 }
 0x4f5   :  { %v2792_v47 = vpop.f32.mrf.mxu3 }
 0x4f6   :  { %v2816_v13 = vadd.f32 %v2792_v47, %v1728_v40  ;;  %v5425_v49 = vpop.eup %5424 }
 0x4f8   :  { %5426 = vtanh.f32 %v2816_v13 }
 0x4fa   :  { %2899 = vmatmul.bf16.gmra.mxu1 %v2859_v31 }
 0x4fd   :  { %v2795_v54 = vpop.f32.mrf.mxu3 }
 0x4fe   :  { %v5427_v56 = vpop.eup %5426  ;;  %v2817_v12 = vadd.f32 %v2795_v54, %v1731_v60 }
 0x4ff   :  { %v2931_v36 = vpack.c.bf16 %v5427_v56, %v5425_v49  ;;  %v7991_v56 = vld [vmem:[#allocation55_spill] sm:$0xff] }
 0x500   :  { %5428 = vtanh.f32 %v2817_v12  ;;  %v7992_v12 = vld [vmem:[#allocation58_spill] sm:$0xff] }
 0x501   :  { %2967 = vmatmul.bf16.gmra.mxu2 %v2931_v36  ;;  %v1781_v36 = vadd.f32 %v7230_v44, %v7991_v56  ;;  %v1783_v10 = vadd.f32 %v7230_v44, %v7992_v12  ;;  %v8001_v12 = vld [vmem:[#allocation83_spill] sm:$0xff] }
 0x505   :  { %v2797_v23 = vpop.f32.mrf.mxu3 }
 0x506   :  { %v2818_v55 = vadd.f32 %v2797_v23, %v1733_v51  ;;  %v5429_v20 = vpop.eup %5428  ;;  %v7993_v51 = vld [vmem:[#allocation71_spill] sm:$0xff] }
 0x507   :  { %v1751_v23 = vadd.f32 %v7230_v44, %v7993_v51 }
 0x508   :  { %5430 = vtanh.f32 %v2818_v55 }
 0x50a   :  { %2904 = vmatmul.bf16.gmra.mxu1 %v2860_v8 }
 0x50d   :  { %v2800_v5 = vpop.f32.mrf.mxu3 }
 0x50e   :  { %v5431_v31 = vpop.eup %5430  ;;  %v2819_v21 = vadd.f32 %v2800_v5, %v1736_v61 }
 0x50f   :  { %v2932_v24 = vpack.c.bf16 %v5431_v31, %v5429_v20  ;;  %v7994_v31 = vld [vmem:[#allocation74_spill] sm:$0xff] }
 0x510   :  { %5432 = vtanh.f32 %v2819_v21 }
 0x511   :  { %2972 = vmatmul.bf16.gmra.mxu2 %v2932_v24  ;;  %v1753_v24 = vadd.f32 %v7230_v44, %v7994_v31 }
 0x515   :  { %v2802_v37 = vpop.f32.mrf.mxu3 }
 0x516   :  { %v2820_v29 = vadd.f32 %v2802_v37, %v1738_v14  ;;  %v5433_v7 = vpop.eup %5432 }
 0x517   :  { %v2870_v34 = vpop.f32.mrf.mxu1 }
 0x518   :  { %5434 = vtanh.f32 %v2820_v29  ;;  %v2910_v8 = vadd.f32 %v2870_v34, %v1741_v15  ;;  %v7995_v15 = vld [vmem:[#allocation61_spill] sm:$0xff] }
 0x51a   :  { %5436 = vtanh.f32 %v2910_v8 }
 0x51e   :  { %v5435_v6 = vpop.eup %5434 }
 0x51f   :  { %v2872_v26 = vpop.f32.mrf.mxu1  ;;  %v2933_v42 = vpack.c.bf16 %v5435_v6, %v5433_v7  ;;  %v1786_v7 = vadd.f32 %v7230_v44, %v7995_v15 }
 0x520   :  { %v2911_v22 = vadd.f32 %v2872_v26, %v1743_v52  ;;  %v5437_v25 = vpop.eup %5436  ;;  %v1788_v52 = vadd.f32 %v7230_v44, %v7996_v0  ;;  %v7997_v26 = vld [vmem:[#allocation77_spill] sm:$0xff]  ;;  %v8005_v0 = vld [vmem:[#allocation76_spill] sm:$0xff] }
 0x521   :  { %2977 = vmatmul.bf16.gmra.mxu2 %v2933_v42  ;;  %v1756_v42 = vadd.f32 %v7230_v44, %v7997_v26 }
 0x522   :  { %5438 = vtanh.f32 %v2911_v22 }
 0x527   :  { %v2875_v17 = vpop.f32.mrf.mxu1 }
 0x528   :  { %v5439_v39 = vpop.eup %5438  ;;  %v2912_v63 = vadd.f32 %v2875_v17, %v1746_v38 }
 0x529   :  { %v3031_v3 = vpack.c.bf16 %v5439_v39, %v5437_v25  ;;  %v7998_v39 = vld [vmem:[#allocation80_spill] sm:$0xff] }
 0x52a   :  { %5440 = vtanh.f32 %v2912_v63 }
 0x52b   :  { %3047 = vmatmul.bf16.vlgmr.msra.gmra.mxu3 %v3031_v3  ;;  %v1758_v3 = vadd.f32 %v7230_v44, %v7998_v39 }
 0x52f   :  { %v2877_v4 = vpop.f32.mrf.mxu1 }
 0x530   :  { %v2913_v40 = vadd.f32 %v2877_v4, %v1748_v18  ;;  %v5441_v13 = vpop.eup %5440 }
 0x532   :  { %5442 = vtanh.f32 %v2913_v40 }
 0x534   :  { %v2943_v47 = vpop.f32.mrf.mxu2 }
 0x535   :  { %v2983_v60 = vadd.f32 %v2943_v47, %v1781_v36 }
 0x537   :  { %v2880_v49 = vpop.f32.mrf.mxu1  ;;  %5444 = vtanh.f32 %v2983_v60 }
 0x538   :  { %v5443_v54 = vpop.eup %5442  ;;  %v2914_v20 = vadd.f32 %v2880_v49, %v1751_v23  ;;  %v7999_v49 = vld [vmem:[#allocation67_spill] sm:$0xff] }
 0x539   :  { %v3032_v33 = vpack.c.bf16 %v5443_v54, %v5441_v13  ;;  %v1791_v54 = vadd.f32 %v7230_v44, %v7999_v49 }
 0x53b   :  { %3052 = vmatmul.bf16.gmra.mxu3 %v3032_v33  ;;  %v8000_v33 = vld [vmem:[#allocation70_spill] sm:$0xff] }
 0x53c   :  { %v2945_v55 = vpop.f32.mrf.mxu2  ;;  %v1793_v60 = vadd.f32 %v7230_v44, %v8000_v33  ;;  %v8009_v33 = vld [vmem:[#allocation82_spill] sm:$0xff] }
 0x53d   :  { %v2984_v5 = vadd.f32 %v2945_v55, %v1783_v10  ;;  %v5445_v21 = vpop.eup %5444  ;;  %v1761_v10 = vadd.f32 %v7230_v44, %v8001_v12 }
 0x53f   :  { %5446 = vtanh.f32 %v2984_v5  ;;  %v2882_v48 = vpop.f32.mrf.mxu1 }
 0x540   :  { %v2915_v61 = vadd.f32 %v2882_v48, %v1753_v24  ;;  %5448 = vtanh.f32 %v2914_v20  ;;  %v8002_v20 = vld [vmem:[#allocation86_spill] sm:$0xff] }
 0x541   :  { %v1763_v5 = vadd.f32 %v7230_v44, %v8002_v20 }
 0x542   :  { %5450 = vtanh.f32 %v2915_v61 }
 0x544   :  { %v2948_v58 = vpop.f32.mrf.mxu2 }
 0x545   :  { %v5447_v14 = vpop.eup %5446  ;;  %v2985_v6 = vadd.f32 %v2948_v58, %v1786_v7 }
 0x546   :  { %v3104_v37 = vpack.c.bf16 %v5447_v14, %v5445_v21  ;;  %v5449_v29 = vpop.eup %5448 }
 0x547   :  { %v2885_v34 = vpop.f32.mrf.mxu1  ;;  %5452 = vtanh.f32 %v2985_v6 }
 0x548   :  { %v5451_v27 = vpop.eup %5450  ;;  %3120 = vmatmul.bf16.vlgmr.msrb.gmra.mxu1 %v3104_v37  ;;  %v2916_v25 = vadd.f32 %v2885_v34, %v1756_v42  ;;  %v8003_v34 = vld [vmem:[#allocation73_spill] sm:$0xff] }
 0x549   :  { %v3033_v8 = vpack.c.bf16 %v5451_v27, %v5449_v29  ;;  %v1796_v27 = vadd.f32 %v7230_v44, %v8003_v34 }
 0x54b   :  { %3057 = vmatmul.bf16.gmra.mxu3 %v3033_v8  ;;  %v8004_v8 = vld [vmem:[#allocation37_spill] sm:$0xff] }
 0x54c   :  { %v2950_v22 = vpop.f32.mrf.mxu2  ;;  %v1766_v6 = vadd.f32 %v7230_v44, %v8004_v8  ;;  %v8013_v8 = vld [vmem:[#allocation88_spill] sm:$0xff] }
 0x54d   :  { %v2986_v17 = vadd.f32 %v2950_v22, %v1788_v52  ;;  %v5453_v63 = vpop.eup %5452  ;;  %v1798_v52 = vadd.f32 %v7230_v44, %v8005_v0 }
 0x54f   :  { %5454 = vtanh.f32 %v2986_v17  ;;  %v2887_v59 = vpop.f32.mrf.mxu1 }
 0x550   :  { %v2917_v38 = vadd.f32 %v2887_v59, %v1758_v3  ;;  %5456 = vtanh.f32 %v2916_v25  ;;  %v8006_v25 = vld [vmem:[#allocation40_spill] sm:$0xff] }
 0x551   :  { %v1768_v17 = vadd.f32 %v7230_v44, %v8006_v25 }
 0x552   :  { %5458 = vtanh.f32 %v2917_v38 }
 0x554   :  { %v2953_v19 = vpop.f32.mrf.mxu2 }
 0x555   :  { %v5455_v18 = vpop.eup %5454  ;;  %v2987_v36 = vadd.f32 %v2953_v19, %v1791_v54 }
 0x556   :  { %v3105_v4 = vpack.c.bf16 %v5455_v18, %v5453_v63  ;;  %v5457_v40 = vpop.eup %5456 }
 0x557   :  { %v2890_v47 = vpop.f32.mrf.mxu1  ;;  %5460 = vtanh.f32 %v2987_v36 }
 0x558   :  { %v5459_v13 = vpop.eup %5458  ;;  %3125 = vmatmul.bf16.gmra.mxu1 %v3105_v4  ;;  %v2918_v23 = vadd.f32 %v2890_v47, %v1761_v10  ;;  %v8007_v47 = vld [vmem:[#allocation79_spill] sm:$0xff] }
 0x559   :  { %v3034_v56 = vpack.c.bf16 %v5459_v13, %v5457_v40  ;;  %v1801_v13 = vadd.f32 %v7230_v44, %v8007_v47  ;;  %v1813_v47 = vadd.f32 %v7230_v44, %v6585_v9 }
 0x55b   :  { %3062 = vmatmul.bf16.gmra.mxu3 %v3034_v56  ;;  %v8008_v56 = vld [vmem:[#allocation43_spill] sm:$0xff] }
 0x55c   :  { %v2955_v51 = vpop.f32.mrf.mxu2  ;;  %v1771_v36 = vadd.f32 %v7230_v44, %v8008_v56 }
 0x55d   :  { %v2988_v55 = vadd.f32 %v2955_v51, %v1793_v60  ;;  %v5461_v48 = vpop.eup %5460  ;;  %v1803_v60 = vadd.f32 %v7230_v44, %v8009_v33 }
 0x55f   :  { %5462 = vtanh.f32 %v2988_v55  ;;  %v2892_v31 = vpop.f32.mrf.mxu1 }
 0x560   :  { %v2919_v24 = vadd.f32 %v2892_v31, %v1763_v5  ;;  %5464 = vtanh.f32 %v2918_v23  ;;  %v8010_v23 = vld [vmem:[#allocation46_spill] sm:$0xff] }
 0x561   :  { %v1773_v55 = vadd.f32 %v7230_v44, %v8010_v23  ;;  %v1821_v23 = vadd.f32 %v7230_v44, %v6645_v1 }
 0x562   :  { %5466 = vtanh.f32 %v2919_v24 }
 0x564   :  { %v2958_v61 = vpop.f32.mrf.mxu2 }
 0x565   :  { %v5463_v21 = vpop.eup %5462  ;;  %v2989_v7 = vadd.f32 %v2958_v61, %v1796_v27 }
 0x566   :  { %v3106_v58 = vpack.c.bf16 %v5463_v21, %v5461_v48  ;;  %v5465_v14 = vpop.eup %5464 }
 0x567   :  { %v2895_v37 = vpop.f32.mrf.mxu1  ;;  %5468 = vtanh.f32 %v2989_v7 }
 0x568   :  { %v5467_v29 = vpop.eup %5466  ;;  %3130 = vmatmul.bf16.gmra.mxu1 %v3106_v58  ;;  %v2920_v42 = vadd.f32 %v2895_v37, %v1766_v6  ;;  %v8011_v37 = vld [vmem:[#allocation85_spill] sm:$0xff]  ;;  %v1808_v6 = vadd.f32 %v7230_v44, %v8013_v8  ;;  %v8016_v8 = vld [vmem:[#allocation14_spill] sm:$0xff] }
 0x569   :  { %v3035_v15 = vpack.c.bf16 %v5467_v29, %v5465_v14  ;;  %v1806_v29 = vadd.f32 %v7230_v44, %v8011_v37  ;;  %v1828_v37 = vadd.f32 %v7230_v44, %v6688_v28 }
 0x56b   :  { %3067 = vmatmul.bf16.gmra.mxu3 %v3035_v15  ;;  %v8012_v15 = vld [vmem:[#allocation49_spill] sm:$0xff] }
 0x56c   :  { %v2960_v26 = vpop.f32.mrf.mxu2  ;;  %v1776_v7 = vadd.f32 %v7230_v44, %v8012_v15 }
 0x56d   :  { %v2990_v22 = vadd.f32 %v2960_v26, %v1798_v52  ;;  %v5469_v59 = vpop.eup %5468 }
 0x56f   :  { %5470 = vtanh.f32 %v2990_v22  ;;  %v2897_v39 = vpop.f32.mrf.mxu1 }
 0x570   :  { %v2921_v3 = vadd.f32 %v2897_v39, %v1768_v17  ;;  %5472 = vtanh.f32 %v2920_v42  ;;  %v8014_v42 = vld [vmem:[#allocation52_spill] sm:$0xff] }
 0x571   :  { %v1778_v22 = vadd.f32 %v7230_v44, %v8014_v42 }
 0x572   :  { %5474 = vtanh.f32 %v2921_v3 }
 0x574   :  { %v2963_v38 = vpop.f32.mrf.mxu2 }
 0x575   :  { %v5471_v63 = vpop.eup %5470  ;;  %v2991_v54 = vadd.f32 %v2963_v38, %v1801_v13 }
 0x576   :  { %v3107_v19 = vpack.c.bf16 %v5471_v63, %v5469_v59  ;;  %v5473_v18 = vpop.eup %5472 }
 0x577   :  { %v2900_v4 = vpop.f32.mrf.mxu1  ;;  %5476 = vtanh.f32 %v2991_v54 }
 0x578   :  { %v5475_v40 = vpop.eup %5474  ;;  %3135 = vmatmul.bf16.gmra.mxu1 %v3107_v19  ;;  %v2922_v10 = vadd.f32 %v2900_v4, %v1771_v36 }
 0x579   :  { %v3036_v49 = vpack.c.bf16 %v5475_v40, %v5473_v18  ;;  %v1811_v18 = vadd.f32 %v7230_v44, %v6571_v30 }
 0x57b   :  { %3072 = vmatmul.bf16.gmra.mxu3 %v3036_v49 }
 0x57c   :  { %v2965_v12 = vpop.f32.mrf.mxu2 }
 0x57d   :  { %v2992_v51 = vadd.f32 %v2965_v12, %v1803_v60  ;;  %v5477_v31 = vpop.eup %5476  ;;  %v1816_v60 = vadd.f32 %v7230_v44, %v6606_v35  ;;  %v1818_v12 = vadd.f32 %v7230_v44, %v6627_v11 }
 0x57f   :  { %5478 = vtanh.f32 %v2992_v51  ;;  %v2902_v20 = vpop.f32.mrf.mxu1 }
 0x580   :  { %v2923_v5 = vadd.f32 %v2902_v20, %v1773_v55  ;;  %5480 = vtanh.f32 %v2922_v10 }
 0x582   :  { %5482 = vtanh.f32 %v2923_v5 }
 0x584   :  { %v2968_v24 = vpop.f32.mrf.mxu2 }
 0x585   :  { %v5479_v48 = vpop.eup %5478  ;;  %v2993_v27 = vadd.f32 %v2968_v24, %v1806_v29 }
 0x586   :  { %v3108_v61 = vpack.c.bf16 %v5479_v48, %v5477_v31  ;;  %v5481_v21 = vpop.eup %5480  ;;  %v1823_v31 = vadd.f32 %v7230_v44, %v6657_v32 }
 0x587   :  { %v2905_v58 = vpop.f32.mrf.mxu1  ;;  %5484 = vtanh.f32 %v2993_v27  ;;  %v8015_v27 = vld [vmem:[#allocation12_spill] sm:$0xff] }
 0x588   :  { %v5483_v14 = vpop.eup %5482  ;;  %3140 = vmatmul.bf16.gmra.mxu1 %v3108_v61  ;;  %v2924_v52 = vadd.f32 %v2905_v58, %v1776_v7  ;;  %v1861_v15 = vadd.f32 %v7230_v44, %v8015_v27 }
 0x589   :  { %v3037_v34 = vpack.c.bf16 %v5483_v14, %v5481_v21  ;;  %v1826_v14 = vadd.f32 %v7230_v44, %v6677_v53 }
 0x58b   :  { %3077 = vmatmul.bf16.gmra.mxu3 %v3037_v34 }
 0x58c   :  { %v2970_v0 = vpop.f32.mrf.mxu2 }
 0x58d   :  { %v2994_v26 = vadd.f32 %v2970_v0, %v1808_v6  ;;  %v5485_v39 = vpop.eup %5484  ;;  %v1863_v6 = vadd.f32 %v7230_v44, %v8016_v8 }
 0x58f   :  { %5486 = vtanh.f32 %v2994_v26  ;;  %v2907_v25 = vpop.f32.mrf.mxu1 }
 0x590   :  { %v2925_v17 = vadd.f32 %v2907_v25, %v1778_v22  ;;  %5488 = vtanh.f32 %v2924_v52  ;;  %v5106_v22 = vld [vmem:[%s7862_s4 + $0x38] sm:$0xff]  ;;  %v1831_v25 = vadd.f32 %v7230_v44, %v6703_v45 }
 0x591   :  { %3840 = vmatpush.bf16.msra.mxu2 %v5106_v22  ;;  %3463 = vmatpush.bf16.msra.mxu1 %v5106_v22 }
 0x592   :  { %5490 = vtanh.f32 %v2925_v17 }
 0x594   :  { %v2973_v3 = vpop.f32.mrf.mxu2 }
 0x595   :  { %v5487_v59 = vpop.eup %5486  ;;  %v2995_v40 = vadd.f32 %v2973_v3, %v1811_v18  ;;  %v1833_v3 = vadd.f32 %v7230_v44, %v6717_v2 }
 0x596   :  { %v3109_v38 = vpack.c.bf16 %v5487_v59, %v5485_v39  ;;  %v5489_v63 = vpop.eup %5488 }
 0x597   :  { %5492 = vtanh.f32 %v2995_v40 }
 0x598   :  { %v5491_v19 = vpop.eup %5490  ;;  %3145 = vmatmul.bf16.gmra.mxu1 %v3109_v38 }
 0x599   :  { %v3038_v4 = vpack.c.bf16 %v5491_v19, %v5489_v63 }
 0x59b   :  { %3082 = vmatmul.bf16.gmra.mxu3 %v3038_v4  ;;  %v8017_v4 = vld [vmem:[#allocation16_spill] sm:$0xff] }
 0x59c   :  { %v2975_v13 = vpop.f32.mrf.mxu2  ;;  %v1866_v40 = vadd.f32 %v7230_v44, %v8017_v4 }
 0x59d   :  { %v2996_v49 = vadd.f32 %v2975_v13, %v1813_v47  ;;  %v5493_v54 = vpop.eup %5492  ;;  %v8018_v47 = vld [vmem:[#allocation18_spill] sm:$0xff] }
 0x59e   :  { %v1868_v13 = vadd.f32 %v7230_v44, %v8018_v47 }
 0x59f   :  { %5494 = vtanh.f32 %v2996_v49 }
 0x5a4   :  { %v2978_v56 = vpop.f32.mrf.mxu2 }
 0x5a5   :  { %v5495_v36 = vpop.eup %5494  ;;  %v2997_v30 = vadd.f32 %v2978_v56, %v1816_v60  ;;  %v5105_v60 = vld [vmem:[%s7862_s4 + $0x30] sm:$0xff] }
 0x5a6   :  { %v3110_v33 = vpack.c.bf16 %v5495_v36, %v5493_v54  ;;  %3841 = vmatpush.bf16.msra.mxu2 %v5105_v60  ;;  %3464 = vmatpush.bf16.msra.mxu1 %v5105_v60 }
 0x5a7   :  { %5496 = vtanh.f32 %v2997_v30  ;;  %v1836_v30 = vadd.f32 %v7230_v44, %v6732_v46 }
 0x5a8   :  { %3150 = vmatmul.bf16.gmra.mxu1 %v3110_v33 }
 0x5ac   :  { %v2980_v10 = vpop.f32.mrf.mxu2 }
 0x5ad   :  { %v2998_v51 = vadd.f32 %v2980_v10, %v1818_v12  ;;  %v5497_v55 = vpop.eup %5496 }
 0x5ae   :  { %v3048_v9 = vpop.f32.mrf.mxu3 }
 0x5af   :  { %5498 = vtanh.f32 %v2998_v51  ;;  %v3088_v20 = vadd.f32 %v3048_v9, %v1821_v23  ;;  %v1838_v51 = vadd.f32 %v7230_v44, %v6749_v16 }
 0x5b1   :  { %5500 = vtanh.f32 %v3088_v20 }
 0x5b5   :  { %v5499_v5 = vpop.eup %5498 }
 0x5b6   :  { %v3050_v35 = vpop.f32.mrf.mxu3  ;;  %v3111_v24 = vpack.c.bf16 %v5499_v5, %v5497_v55 }
 0x5b7   :  { %v3089_v48 = vadd.f32 %v3050_v35, %v1823_v31  ;;  %v5501_v11 = vpop.eup %5500  ;;  %v8019_v31 = vld [vmem:[#allocation20_spill] sm:$0xff] }
 0x5b8   :  { %3155 = vmatmul.bf16.gmra.mxu1 %v3111_v24  ;;  %v1871_v35 = vadd.f32 %v7230_v44, %v8019_v31  ;;  %v8020_v24 = vld [vmem:[#allocation22_spill] sm:$0xff]  ;;  %v8028_v31 = vld [vmem:[#allocation8_spill] sm:$0xff] }
 0x5b9   :  { %5502 = vtanh.f32 %v3089_v48  ;;  %v1873_v48 = vadd.f32 %v7230_v44, %v8020_v24 }
 0x5be   :  { %v3053_v61 = vpop.f32.mrf.mxu3 }
 0x5bf   :  { %v5503_v21 = vpop.eup %5502  ;;  %v3090_v1 = vadd.f32 %v3053_v61, %v1826_v14 }
 0x5c0   :  { %v3209_v58 = vpack.c.bf16 %v5503_v21, %v5501_v11 }
 0x5c1   :  { %5504 = vtanh.f32 %v3090_v1  ;;  %v5104_v1 = vld [vmem:[%s7862_s4 + $0x28] sm:$0xff] }
 0x5c2   :  { %3225 = vmatmul.bf16.vlgmr.msrb.gmra.mxu2 %v3209_v58  ;;  %3465 = vmatpush.bf16.msra.mxu1 %v5104_v1 }
 0x5c3   :  { %3842 = vmatpush.bf16.msra.mxu2 %v5104_v1 }
 0x5c5   :  { %v3121_v29 = vpop.f32.mrf.mxu1 }
 0x5c6   :  { %v3055_v32 = vpop.f32.mrf.mxu3  ;;  %v3161_v7 = vadd.f32 %v3121_v29, %v1861_v15 }
 0x5c7   :  { %v3091_v34 = vadd.f32 %v3055_v32, %v1828_v37  ;;  %v5505_v52 = vpop.eup %5504  ;;  %v1841_v37 = vadd.f32 %v7230_v44, %v6759_v50 }
 0x5c9   :  { %5506 = vtanh.f32 %v3091_v34  ;;  %v1843_v34 = vadd.f32 %v7230_v44, %v6765_v57 }
 0x5ca   :  { %5508 = vtanh.f32 %v3161_v7 }
 0x5cd   :  { %v3123_v0 = vpop.f32.mrf.mxu1 }
 0x5ce   :  { %v3162_v53 = vadd.f32 %v3123_v0, %v1863_v6  ;;  %v3058_v26 = vpop.f32.mrf.mxu3  ;;  %v8021_v0 = vld [vmem:[#allocation24_spill] sm:$0xff] }
 0x5cf   :  { %v5507_v42 = vpop.eup %5506  ;;  %v3092_v17 = vadd.f32 %v3058_v26, %v1831_v25 }
 0x5d0   :  { %5510 = vtanh.f32 %v3162_v53  ;;  %v3210_v28 = vpack.c.bf16 %v5507_v42, %v5505_v52  ;;  %v5509_v39 = vpop.eup %5508  ;;  %v1876_v52 = vadd.f32 %v7230_v44, %v8021_v0  ;;  %v8022_v53 = vld [vmem:[#allocation26_spill] sm:$0xff] }
 0x5d1   :  { %5512 = vtanh.f32 %v3092_v17  ;;  %v1878_v26 = vadd.f32 %v7230_v44, %v8022_v53 }
 0x5d2   :  { %3230 = vmatmul.bf16.gmra.mxu2 %v3210_v28 }
 0x5d5   :  { %v3126_v59 = vpop.f32.mrf.mxu1 }
 0x5d6   :  { %v5511_v38 = vpop.eup %5510  ;;  %v3060_v63 = vpop.f32.mrf.mxu3  ;;  %v3163_v45 = vadd.f32 %v3126_v59, %v1866_v40 }
 0x5d7   :  { %v3282_v19 = vpack.c.bf16 %v5511_v38, %v5509_v39  ;;  %v3093_v18 = vadd.f32 %v3060_v63, %v1833_v3  ;;  %v5513_v54 = vpop.eup %5512  ;;  %v5103_v39 = vld [vmem:[%s7862_s4 + $0x20] sm:$0xff] }
 0x5d8   :  { %v8023_v3 = vld [vmem:[#allocation5_spill] sm:$0xff]  ;;  %3843 = vmatpush.bf16.msra.mxu2 %v5103_v39  ;;  %3466 = vmatpush.bf16.msra.mxu1 %v5103_v39 }
 0x5d9   :  { %5514 = vtanh.f32 %v3093_v18  ;;  %3298 = vmatmul.bf16.vlgmr.msrb.gmra.mxu3 %v3282_v19  ;;  %v1846_v59 = vadd.f32 %v7230_v44, %v8023_v3  ;;  %v8024_v19 = vld [vmem:[#allocation6_spill] sm:$0xff]  ;;  %v8034_v3 = vld [vmem:[#allocation39_spill] sm:$0xff] }
 0x5da   :  { %5516 = vtanh.f32 %v3163_v45  ;;  %v1848_v18 = vadd.f32 %v7230_v44, %v8024_v19 }
 0x5dd   :  { %v3128_v49 = vpop.f32.mrf.mxu1 }
 0x5de   :  { %v3164_v56 = vadd.f32 %v3128_v49, %v1868_v13  ;;  %v3063_v36 = vpop.f32.mrf.mxu3  ;;  %v7447_v49 = vld [vmem:[%s7861_s3] ss:$0 sm:$0xff] }
 0x5df   :  { %v5515_v2 = vpop.eup %5514  ;;  %v3094_v12 = vadd.f32 %v3063_v36, %v1836_v30 }
 0x5e0   :  { %5518 = vtanh.f32 %v3164_v56  ;;  %v3211_v33 = vpack.c.bf16 %v5515_v2, %v5513_v54  ;;  %v5517_v10 = vpop.eup %5516  ;;  %v8025_v54 = vld [vmem:[#allocation28_spill] sm:$0xff]  ;;  %v8026_v2 = vld [vmem:[#allocation30_spill] sm:$0xff] }
 0x5e1   :  { %5520 = vtanh.f32 %v3094_v12  ;;  %v1881_v56 = vadd.f32 %v7447_v49, %v8025_v54  ;;  %v1883_v44 = vadd.f32 %v7447_v49, %v8026_v2 }
 0x5e2   :  { %3235 = vmatmul.bf16.gmra.mxu2 %v3211_v33 }
 0x5e5   :  { %v3131_v9 = vpop.f32.mrf.mxu1 }
 0x5e6   :  { %v5519_v23 = vpop.eup %5518  ;;  %v3065_v55 = vpop.f32.mrf.mxu3  ;;  %v3165_v46 = vadd.f32 %v3131_v9, %v1871_v35  ;;  %v5102_v9 = vld [vmem:[%s7862_s4 + $0x18] sm:$0xff]  ;;  %v1853_v35 = vadd.f32 %v7447_v49, %v8028_v31  ;;  %v8038_v31 = vld [vmem:[#allocation51_spill] sm:$0xff] }
 0x5e7   :  { %v3095_v20 = vadd.f32 %v3065_v55, %v1838_v51  ;;  %v3283_v5 = vpack.c.bf16 %v5519_v23, %v5517_v10  ;;  %v5521_v61 = vpop.eup %5520  ;;  %v8027_v23 = vld [vmem:[#allocation7_spill] sm:$0xff]  ;;  %3467 = vmatpush.bf16.msra.mxu1 %v5102_v9  ;;  %3844 = vmatpush.bf16.msra.mxu2 %v5102_v9 }
 0x5e8   :  { %v1851_v55 = vadd.f32 %v7447_v49, %v8027_v23 }
 0x5e9   :  { %5522 = vtanh.f32 %v3095_v20  ;;  %3303 = vmatmul.bf16.gmra.mxu3 %v3283_v5 }
 0x5ea   :  { %5524 = vtanh.f32 %v3165_v46 }
 0x5ed   :  { %v3133_v11 = vpop.f32.mrf.mxu1 }
 0x5ee   :  { %v3166_v21 = vadd.f32 %v3133_v11, %v1873_v48  ;;  %v3068_v58 = vpop.f32.mrf.mxu3 }
 0x5ef   :  { %v5523_v16 = vpop.eup %5522  ;;  %v3096_v29 = vadd.f32 %v3068_v58, %v1841_v37 }
 0x5f0   :  { %5526 = vtanh.f32 %v3166_v21  ;;  %v3212_v14 = vpack.c.bf16 %v5523_v16, %v5521_v61  ;;  %v5525_v32 = vpop.eup %5524  ;;  %v8029_v21 = vld [vmem:[#allocation32_spill] sm:$0xff] }
 0x5f1   :  { %5528 = vtanh.f32 %v3096_v29  ;;  %v1886_v58 = vadd.f32 %v7447_v49, %v8029_v21 }
 0x5f2   :  { %3240 = vmatmul.bf16.gmra.mxu2 %v3212_v14  ;;  %v8030_v14 = vld [vmem:[#allocation34_spill] sm:$0xff] }
 0x5f3   :  { %v1888_v1 = vadd.f32 %v7447_v49, %v8030_v14 }
 0x5f5   :  { %v3136_v27 = vpop.f32.mrf.mxu1 }
 0x5f6   :  { %v5527_v15 = vpop.eup %5526  ;;  %v3070_v7 = vpop.f32.mrf.mxu3  ;;  %v3167_v50 = vadd.f32 %v3136_v27, %v1876_v52 }
 0x5f7   :  { %v3097_v8 = vadd.f32 %v3070_v7, %v1843_v34  ;;  %v3284_v6 = vpack.c.bf16 %v5527_v15, %v5525_v32  ;;  %v5529_v28 = vpop.eup %5528  ;;  %v5101_v7 = vld [vmem:[%s7862_s4 + $0x10] sm:$0xff] }
 0x5f8   :  { %3468 = vmatpush.bf16.msra.mxu1 %v5101_v7  ;;  %3845 = vmatpush.bf16.msra.mxu2 %v5101_v7  ;;  %v1943_v7 = vadd.f32 %v7447_v49, %v6601_v43 }
 0x5f9   :  { %5530 = vtanh.f32 %v3097_v8  ;;  %3308 = vmatmul.bf16.gmra.mxu3 %v3284_v6  ;;  %v8031_v8 = vld [vmem:[#allocation9_spill] sm:$0xff] }
 0x5fa   :  { %5532 = vtanh.f32 %v3167_v50  ;;  %v1856_v6 = vadd.f32 %v7447_v49, %v8031_v8  ;;  %v8032_v50 = vld [vmem:[#allocation10_spill] sm:$0xff] }
 0x5fb   :  { %v1858_v53 = vadd.f32 %v7447_v49, %v8032_v50 }
 0x5fd   :  { %v3138_v42 = vpop.f32.mrf.mxu1 }
 0x5fe   :  { %v3168_v22 = vadd.f32 %v3138_v42, %v1878_v26  ;;  %v3073_v25 = vpop.f32.mrf.mxu3 }
 0x5ff   :  { %v5531_v57 = vpop.eup %5530  ;;  %v3098_v38 = vadd.f32 %v3073_v25, %v1846_v59  ;;  %v1893_v59 = vadd.f32 %v7447_v49, %v8034_v3 }
 0x600   :  { %5534 = vtanh.f32 %v3168_v22  ;;  %v3213_v17 = vpack.c.bf16 %v5531_v57, %v5529_v28  ;;  %v5533_v63 = vpop.eup %5532  ;;  %v8033_v57 = vld [vmem:[#allocation36_spill] sm:$0xff] }
 0x601   :  { %5536 = vtanh.f32 %v3098_v38 }
 0x602   :  { %3245 = vmatmul.bf16.gmra.mxu2 %v3213_v17  ;;  %v1891_v17 = vadd.f32 %v7447_v49, %v8033_v57 }
 0x605   :  { %v3141_v4 = vpop.f32.mrf.mxu1 }
 0x606   :  { %v5535_v40 = vpop.eup %5534  ;;  %v3075_v45 = vpop.f32.mrf.mxu3  ;;  %v3169_v36 = vadd.f32 %v3141_v4, %v1881_v56 }
 0x607   :  { %v3099_v47 = vadd.f32 %v3075_v45, %v1848_v18  ;;  %v3285_v13 = vpack.c.bf16 %v5535_v40, %v5533_v63  ;;  %v5537_v60 = vpop.eup %5536  ;;  %v5100_v40 = vld [vmem:[%s7862_s4 + $0x8] sm:$0xff] }
 0x608   :  { %3846 = vmatpush.bf16.msra.mxu2 %v5100_v40  ;;  %3469 = vmatpush.bf16.msra.mxu1 %v5100_v40 }
 0x609   :  { %5538 = vtanh.f32 %v3099_v47  ;;  %3313 = vmatmul.bf16.gmra.mxu3 %v3285_v13  ;;  %v5099_v13 = vld [vmem:[%s7862_s4] sm:$0xff] }
 0x60a   :  { %5540 = vtanh.f32 %v3169_v36  ;;  %v8035_v36 = vld [vmem:[#allocation42_spill] sm:$0xff] }
 0x60b   :  { %v1896_v2 = vadd.f32 %v7447_v49, %v8035_v36 }
 0x60c   :  { %3470 = vmatpush.bf16.msra.mxu1 %v5099_v13  ;;  %3847 = vmatpush.bf16.msra.mxu2 %v5099_v13 }
 0x60d   :  { %v3143_v33 = vpop.f32.mrf.mxu1 }
 0x60e   :  { %v3170_v30 = vadd.f32 %v3143_v33, %v1883_v44  ;;  %v3078_v12 = vpop.f32.mrf.mxu3  ;;  %v8036_v33 = vld [vmem:[#allocation45_spill] sm:$0xff] }
 0x60f   :  { %v5539_v10 = vpop.eup %5538  ;;  %v3100_v20 = vadd.f32 %v3078_v12, %v1851_v55  ;;  %v8037_v55 = vld [vmem:[#allocation48_spill] sm:$0xff] }
 0x610   :  { %5542 = vtanh.f32 %v3170_v30  ;;  %v3214_v51 = vpack.c.bf16 %v5539_v10, %v5537_v60  ;;  %v5541_v5 = vpop.eup %5540  ;;  %v1898_v60 = vadd.f32 %v7447_v49, %v8036_v33 }
 0x611   :  { %5544 = vtanh.f32 %v3100_v20  ;;  %v1901_v20 = vadd.f32 %v7447_v49, %v8037_v55  ;;  %v8047_v55 = vld [vmem:[#allocation93_spill] sm:$0xff] }
 0x612   :  { %3250 = vmatmul.bf16.gmra.mxu2 %v3214_v51 }
 0x615   :  { %v3146_v46 = vpop.f32.mrf.mxu1 }
 0x616   :  { %v5543_v24 = vpop.eup %5542  ;;  %v3080_v48 = vpop.f32.mrf.mxu3  ;;  %v3171_v16 = vadd.f32 %v3146_v46, %v1886_v58  ;;  %v8039_v58 = vld [vmem:[#allocation54_spill] sm:$0xff] }
 0x617   :  { %v3101_v11 = vadd.f32 %v3080_v48, %v1853_v35  ;;  %v3286_v61 = vpack.c.bf16 %v5543_v24, %v5541_v5  ;;  %v5545_v29 = vpop.eup %5544  ;;  %v1903_v35 = vadd.f32 %v7447_v49, %v8038_v31 }
 0x619   :  { %5546 = vtanh.f32 %v3101_v11  ;;  %3318 = vmatmul.bf16.gmra.mxu3 %v3286_v61 }
 0x61a   :  { %5548 = vtanh.f32 %v3171_v16  ;;  %v1906_v16 = vadd.f32 %v7447_v49, %v8039_v58 }
 0x61d   :  { %v3148_v37 = vpop.f32.mrf.mxu1 }
 0x61e   :  { %v3172_v32 = vadd.f32 %v3148_v37, %v1888_v1  ;;  %v3083_v34 = vpop.f32.mrf.mxu3  ;;  %v8040_v1 = vld [vmem:[#allocation57_spill] sm:$0xff] }
 0x61f   :  { %v5547_v27 = vpop.eup %5546  ;;  %v3102_v0 = vadd.f32 %v3083_v34, %v1856_v6  ;;  %v1908_v37 = vadd.f32 %v7447_v49, %v8040_v1 }
 0x620   :  { %5550 = vtanh.f32 %v3172_v32  ;;  %v3215_v15 = vpack.c.bf16 %v5547_v27, %v5545_v29  ;;  %v5549_v52 = vpop.eup %5548  ;;  %v1941_v27 = vadd.f32 %v7447_v49, %v6593_v41  ;;  %v8042_v41 = vld [vmem:[#allocation63_spill] sm:$0xff] }
 0x621   :  { %5552 = vtanh.f32 %v3102_v0 }
 0x622   :  { %3255 = vmatmul.bf16.gmra.mxu2 %v3215_v15 }
 0x625   :  { %v3151_v26 = vpop.f32.mrf.mxu1 }
 0x626   :  { %v5551_v42 = vpop.eup %5550  ;;  %v3085_v28 = vpop.f32.mrf.mxu3  ;;  %v3173_v39 = vadd.f32 %v3151_v26, %v1891_v17  ;;  %v8041_v26 = vld [vmem:[#allocation60_spill] sm:$0xff] }
 0x627   :  { %v3103_v22 = vadd.f32 %v3085_v28, %v1858_v53  ;;  %v3287_v25 = vpack.c.bf16 %v5551_v42, %v5549_v52  ;;  %v5553_v63 = vpop.eup %5552  ;;  %v1911_v42 = vadd.f32 %v7447_v49, %v8041_v26 }
 0x629   :  { %5554 = vtanh.f32 %v3103_v22  ;;  %3323 = vmatmul.bf16.gmra.mxu3 %v3287_v25  ;;  %v1913_v25 = vadd.f32 %v7447_v49, %v8042_v41 }
 0x62a   :  { %5556 = vtanh.f32 %v3173_v39 }
 0x62d   :  { %v3153_v38 = vpop.f32.mrf.mxu1 }
 0x62e   :  { %v3174_v19 = vadd.f32 %v3153_v38, %v1893_v59  ;;  %v1946_v59 = vadd.f32 %v7447_v49, %v6623_v62 }
 0x62f   :  { %v5555_v18 = vpop.eup %5554 }
 0x630   :  { %5558 = vtanh.f32 %v3174_v19  ;;  %v3216_v4 = vpack.c.bf16 %v5555_v18, %v5553_v63  ;;  %v5557_v45 = vpop.eup %5556  ;;  %v8043_v63 = vld [vmem:[#allocation91_spill] sm:$0xff] }
 0x631   :  { %v1948_v19 = vadd.f32 %v7447_v49, %v8043_v63  ;;  %v8054_v63 = vld [vmem:[#allocation96_spill] sm:$0xff] }
 0x632   :  { %3260 = vmatmul.bf16.gmra.mxu2 %v3216_v4 }
 0x635   :  { %v3156_v47 = vpop.f32.mrf.mxu1 }
 0x636   :  { %v5559_v54 = vpop.eup %5558  ;;  %v3175_v44 = vadd.f32 %v3156_v47, %v1896_v2  ;;  %v8045_v2 = vld [vmem:[#allocation69_spill] sm:$0xff] }
 0x637   :  { %v3288_v56 = vpack.c.bf16 %v5559_v54, %v5557_v45  ;;  %v8044_v54 = vld [vmem:[#allocation66_spill] sm:$0xff] }
 0x638   :  { %5560 = vtanh.f32 %v3175_v44  ;;  %v1918_v44 = vadd.f32 %v7447_v49, %v8045_v2 }
 0x639   :  { %3328 = vmatmul.bf16.gmra.mxu3 %v3288_v56  ;;  %v1916_v56 = vadd.f32 %v7447_v49, %v8044_v54 }
 0x63d   :  { %v3158_v30 = vpop.f32.mrf.mxu1 }
 0x63e   :  { %v3176_v12 = vadd.f32 %v3158_v30, %v1898_v60  ;;  %v5561_v10 = vpop.eup %5560 }
 0x640   :  { %5562 = vtanh.f32 %v3176_v12 }
 0x645   :  { %v3226_v51 = vpop.f32.mrf.mxu2 }
 0x646   :  { %v5563_v9 = vpop.eup %5562  ;;  %v3266_v5 = vadd.f32 %v3226_v51, %v1901_v20  ;;  %v8046_v51 = vld [vmem:[#allocation92_spill] sm:$0xff]  ;;  %v1953_v20 = vadd.f32 %v7447_v49, %v8047_v55  ;;  %v8058_v55 = vld [vmem:[#allocation98_spill] sm:$0xff] }
 0x647   :  { %v3289_v23 = vpack.c.bf16 %v5563_v9, %v5561_v10  ;;  %v1951_v9 = vadd.f32 %v7447_v49, %v8046_v51 }
 0x648   :  { %5564 = vtanh.f32 %v3266_v5 }
 0x649   :  { %3333 = vmatmul.bf16.gmra.mxu3 %v3289_v23 }
 0x64d   :  { %v3228_v46 = vpop.f32.mrf.mxu2 }
 0x64e   :  { %v3267_v24 = vadd.f32 %v3228_v46, %v1903_v35  ;;  %v5565_v48 = vpop.eup %5564 }
 0x650   :  { %5566 = vtanh.f32 %v3267_v24 }
 0x655   :  { %v3231_v11 = vpop.f32.mrf.mxu2 }
 0x656   :  { %v5567_v61 = vpop.eup %5566  ;;  %v3268_v14 = vadd.f32 %v3231_v11, %v1906_v16  ;;  %v8048_v11 = vld [vmem:[#allocation72_spill] sm:$0xff]  ;;  %v8049_v16 = vld [vmem:[#allocation75_spill] sm:$0xff] }
 0x657   :  { %v3404_v21 = vpack.c.bf16 %v5567_v61, %v5565_v48  ;;  %v1921_v61 = vadd.f32 %v7447_v49, %v8048_v11 }
 0x658   :  { %5568 = vtanh.f32 %v3268_v14  ;;  %v1923_v14 = vadd.f32 %v7447_v49, %v8049_v16 }
 0x659   :  { %3471 = vmatmul.bf16.vlgmr.msra.gmra.mxu1 %v3404_v21 }
 0x65c   :  { %v3299_v29 = vpop.f32.mrf.mxu3 }
 0x65d   :  { %v3233_v32 = vpop.f32.mrf.mxu2  ;;  %v3339_v15 = vadd.f32 %v3299_v29, %v1941_v27  ;;  %v8050_v27 = vld [vmem:[#allocation94_spill] sm:$0xff] }
 0x65e   :  { %v3269_v34 = vadd.f32 %v3233_v32, %v1908_v37  ;;  %v5569_v6 = vpop.eup %5568 }
 0x660   :  { %5570 = vtanh.f32 %v3269_v34 }
 0x661   :  { %5572 = vtanh.f32 %v3339_v15  ;;  %v1956_v15 = vadd.f32 %v7447_v49, %v8050_v27 }
 0x664   :  { %v3301_v8 = vpop.f32.mrf.mxu3 }
 0x665   :  { %v3340_v0 = vadd.f32 %v3301_v8, %v1943_v7  ;;  %v3236_v52 = vpop.f32.mrf.mxu2  ;;  %v8051_v8 = vld [vmem:[#allocation95_spill] sm:$0xff] }
 0x666   :  { %v5571_v50 = vpop.eup %5570  ;;  %v3270_v28 = vadd.f32 %v3236_v52, %v1911_v42 }
 0x667   :  { %5574 = vtanh.f32 %v3340_v0  ;;  %v3405_v53 = vpack.c.bf16 %v5571_v50, %v5569_v6  ;;  %v5573_v22 = vpop.eup %5572  ;;  %v1958_v6 = vadd.f32 %v7447_v49, %v8051_v8  ;;  %v8062_v8 = vld [vmem:[#allocation100_spill] sm:$0xff] }
 0x668   :  { %5576 = vtanh.f32 %v3270_v28  ;;  %v8052_v28 = vld [vmem:[#allocation78_spill] sm:$0xff] }
 0x669   :  { %3476 = vmatmul.bf16.gmra.mxu1 %v3405_v53 }
 0x66c   :  { %v3304_v57 = vpop.f32.mrf.mxu3 }
 0x66d   :  { %v5575_v17 = vpop.eup %5574  ;;  %v3238_v43 = vpop.f32.mrf.mxu2  ;;  %v3341_v38 = vadd.f32 %v3304_v57, %v1946_v59  ;;  %v8053_v57 = vld [vmem:[#allocation81_spill] sm:$0xff] }
 0x66e   :  { %v3832_v39 = vpack.c.bf16 %v5575_v17, %v5573_v22  ;;  %v3271_v3 = vadd.f32 %v3238_v43, %v1913_v25  ;;  %v5577_v4 = vpop.eup %5576  ;;  %v1926_v22 = vadd.f32 %v7447_v49, %v8052_v28  ;;  %v1928_v17 = vadd.f32 %v7447_v49, %v8053_v57 }
 0x670   :  { %5578 = vtanh.f32 %v3271_v3  ;;  %3848 = vmatmul.bf16.vlgmr.msra.gmra.mxu2 %v3832_v39 }
 0x671   :  { %5580 = vtanh.f32 %v3341_v38 }
 0x674   :  { %v3306_v18 = vpop.f32.mrf.mxu3 }
 0x675   :  { %v3342_v40 = vadd.f32 %v3306_v18, %v1948_v19  ;;  %v3241_v45 = vpop.f32.mrf.mxu2  ;;  %v1961_v19 = vadd.f32 %v7447_v49, %v8054_v63  ;;  %v7552_v63 = vld [vmem:[%s7863_s5] ss:$0 sm:$0xff] }
 0x676   :  { %v5579_v47 = vpop.eup %5578  ;;  %v3272_v36 = vadd.f32 %v3241_v45, %v1916_v56 }
 0x677   :  { %5582 = vtanh.f32 %v3342_v40  ;;  %v3406_v13 = vpack.c.bf16 %v5579_v47, %v5577_v4  ;;  %v5581_v62 = vpop.eup %5580  ;;  %v8055_v4 = vld [vmem:[#allocation97_spill] sm:$0xff] }
 0x678   :  { %5584 = vtanh.f32 %v3272_v36  ;;  %v1963_v40 = vadd.f32 %v7447_v49, %v8055_v4 }
 0x679   :  { %3481 = vmatmul.bf16.gmra.mxu1 %v3406_v13 }
 0x67c   :  { %v3309_v33 = vpop.f32.mrf.mxu3 }
 0x67d   :  { %v5583_v60 = vpop.eup %5582  ;;  %v3243_v30 = vpop.f32.mrf.mxu2  ;;  %v3343_v23 = vadd.f32 %v3309_v33, %v1951_v9 }
 0x67e   :  { %v3273_v12 = vadd.f32 %v3243_v30, %v1918_v44  ;;  %v3833_v10 = vpack.c.bf16 %v5583_v60, %v5581_v62  ;;  %v5585_v31 = vpop.eup %5584  ;;  %v8056_v62 = vld [vmem:[#allocation84_spill] sm:$0xff]  ;;  %v8057_v60 = vld [vmem:[#allocation87_spill] sm:$0xff] }
 0x67f   :  { %v1931_v2 = vadd.f32 %v7447_v49, %v8056_v62  ;;  %v1933_v30 = vadd.f32 %v7447_v49, %v8057_v60 }
 0x680   :  { %5586 = vtanh.f32 %v3273_v12  ;;  %3853 = vmatmul.bf16.gmra.mxu2 %v3833_v10 }
 0x681   :  { %5588 = vtanh.f32 %v3343_v23 }
 0x684   :  { %v3311_v5 = vpop.f32.mrf.mxu3 }
 0x685   :  { %v3344_v35 = vadd.f32 %v3311_v5, %v1953_v20  ;;  %v3246_v46 = vpop.f32.mrf.mxu2  ;;  %v1966_v20 = vadd.f32 %v7447_v49, %v8058_v55 }
 0x686   :  { %v5587_v24 = vpop.eup %5586  ;;  %v3274_v21 = vadd.f32 %v3246_v46, %v1921_v61 }
 0x687   :  { %5590 = vtanh.f32 %v3344_v35  ;;  %v3407_v48 = vpack.c.bf16 %v5587_v24, %v5585_v31  ;;  %v5589_v58 = vpop.eup %5588  ;;  %v8059_v31 = vld [vmem:[#allocation99_spill] sm:$0xff] }
 0x688   :  { %5592 = vtanh.f32 %v3274_v21  ;;  %v1968_v35 = vadd.f32 %v7447_v49, %v8059_v31 }
 0x689   :  { %3486 = vmatmul.bf16.gmra.mxu1 %v3407_v48 }
 0x68c   :  { %v3314_v1 = vpop.f32.mrf.mxu3 }
 0x68d   :  { %v5591_v37 = vpop.eup %5590  ;;  %v3248_v29 = vpop.f32.mrf.mxu2  ;;  %v3345_v7 = vadd.f32 %v3314_v1, %v1956_v15 }
 0x68e   :  { %v3275_v32 = vadd.f32 %v3248_v29, %v1923_v14  ;;  %v3834_v34 = vpack.c.bf16 %v5591_v37, %v5589_v58  ;;  %v5593_v52 = vpop.eup %5592  ;;  %v8060_v58 = vld [vmem:[#allocation89_spill] sm:$0xff]  ;;  %v8061_v37 = vld [vmem:[#allocation90_spill] sm:$0xff] }
 0x68f   :  { %v1936_v16 = vadd.f32 %v7447_v49, %v8060_v58  ;;  %v1938_v29 = vadd.f32 %v7447_v49, %v8061_v37 }
 0x690   :  { %5594 = vtanh.f32 %v3275_v32  ;;  %3858 = vmatmul.bf16.gmra.mxu2 %v3834_v34 }
 0x691   :  { %5596 = vtanh.f32 %v3345_v7 }
 0x694   :  { %v3316_v0 = vpop.f32.mrf.mxu3 }
 0x695   :  { %v3346_v50 = vadd.f32 %v3316_v0, %v1958_v6  ;;  %v3251_v53 = vpop.f32.mrf.mxu2  ;;  %v1971_v6 = vadd.f32 %v7447_v49, %v8062_v8 }
 0x696   :  { %v5595_v26 = vpop.eup %5594  ;;  %v3276_v41 = vadd.f32 %v3251_v53, %v1926_v22 }
 0x697   :  { %5598 = vtanh.f32 %v3346_v50  ;;  %v3408_v42 = vpack.c.bf16 %v5595_v26, %v5593_v52  ;;  %v5597_v25 = vpop.eup %5596  ;;  %v8063_v52 = vld [vmem:[#allocation101_spill] sm:$0xff] }
 0x698   :  { %5600 = vtanh.f32 %v3276_v41  ;;  %v1973_v50 = vadd.f32 %v7447_v49, %v8063_v52 }
 0x699   :  { %3491 = vmatmul.bf16.gmra.mxu1 %v3408_v42 }
 0x69c   :  { %v3319_v43 = vpop.f32.mrf.mxu3 }
 0x69d   :  { %v5599_v39 = vpop.eup %5598  ;;  %v3253_v3 = vpop.f32.mrf.mxu2  ;;  %v3347_v18 = vadd.f32 %v3319_v43, %v1961_v19  ;;  %v8064_v43 = vld [vmem:[#allocation102_spill] sm:$0xff] }
 0x69e   :  { %v3277_v59 = vadd.f32 %v3253_v3, %v1928_v17  ;;  %v3835_v38 = vpack.c.bf16 %v5599_v39, %v5597_v25  ;;  %v5601_v47 = vpop.eup %5600  ;;  %v1976_v39 = vadd.f32 %v7447_v49, %v8064_v43 }
 0x6a0   :  { %5602 = vtanh.f32 %v3277_v59  ;;  %3863 = vmatmul.bf16.gmra.mxu2 %v3835_v38  ;;  %v8065_v59 = vld [vmem:[#allocation103_spill] sm:$0xff] }
 0x6a1   :  { %5604 = vtanh.f32 %v3347_v18  ;;  %v1978_v38 = vadd.f32 %v7447_v49, %v8065_v59 }
 0x6a4   :  { %v3321_v45 = vpop.f32.mrf.mxu3 }
 0x6a5   :  { %v3348_v13 = vadd.f32 %v3321_v45, %v1963_v40  ;;  %v3256_v54 = vpop.f32.mrf.mxu2 }
 0x6a6   :  { %v5603_v56 = vpop.eup %5602  ;;  %v3278_v44 = vadd.f32 %v3256_v54, %v1931_v2 }
 0x6a7   :  { %5606 = vtanh.f32 %v3348_v13  ;;  %v3409_v36 = vpack.c.bf16 %v5603_v56, %v5601_v47  ;;  %v5605_v33 = vpop.eup %5604 }
 0x6a8   :  { %5608 = vtanh.f32 %v3278_v44 }
 0x6a9   :  { %3496 = vmatmul.bf16.gmra.mxu1 %v3409_v36 }
 0x6ac   :  { %v3324_v12 = vpop.f32.mrf.mxu3 }
 0x6ad   :  { %v5607_v10 = vpop.eup %5606  ;;  %v3258_v51 = vpop.f32.mrf.mxu2  ;;  %v3349_v5 = vadd.f32 %v3324_v12, %v1966_v20 }
 0x6ae   :  { %v3279_v9 = vadd.f32 %v3258_v51, %v1933_v30  ;;  %v3836_v23 = vpack.c.bf16 %v5607_v10, %v5605_v33  ;;  %v5609_v24 = vpop.eup %5608 }
 0x6b0   :  { %5610 = vtanh.f32 %v3279_v9  ;;  %3868 = vmatmul.bf16.gmra.mxu2 %v3836_v23 }
 0x6b1   :  { %5612 = vtanh.f32 %v3349_v5 }
 0x6b4   :  { %v3326_v46 = vpop.f32.mrf.mxu3 }
 0x6b5   :  { %v3350_v48 = vadd.f32 %v3326_v46, %v1968_v35  ;;  %v3261_v11 = vpop.f32.mrf.mxu2 }
 0x6b6   :  { %v5611_v61 = vpop.eup %5610  ;;  %v3280_v14 = vadd.f32 %v3261_v11, %v1936_v16 }
 0x6b7   :  { %5614 = vtanh.f32 %v3350_v48  ;;  %v3410_v21 = vpack.c.bf16 %v5611_v61, %v5609_v24  ;;  %v5613_v1 = vpop.eup %5612 }
 0x6b8   :  { %5616 = vtanh.f32 %v3280_v14 }
 0x6b9   :  { %3501 = vmatmul.bf16.gmra.mxu1 %v3410_v21 }
 0x6bc   :  { %v3329_v32 = vpop.f32.mrf.mxu3 }
 0x6bd   :  { %v5615_v34 = vpop.eup %5614  ;;  %v3263_v27 = vpop.f32.mrf.mxu2  ;;  %v3351_v0 = vadd.f32 %v3329_v32, %v1971_v6 }
 0x6be   :  { %v3281_v15 = vadd.f32 %v3263_v27, %v1938_v29  ;;  %v3837_v7 = vpack.c.bf16 %v5615_v34, %v5613_v1  ;;  %v5617_v26 = vpop.eup %5616 }
 0x6c0   :  { %5618 = vtanh.f32 %v3281_v15  ;;  %3873 = vmatmul.bf16.gmra.mxu2 %v3837_v7 }
 0x6c1   :  { %5620 = vtanh.f32 %v3351_v0 }
 0x6c4   :  { %v3331_v53 = vpop.f32.mrf.mxu3 }
 0x6c5   :  { %v3352_v42 = vadd.f32 %v3331_v53, %v1973_v50 }
 0x6c6   :  { %v5619_v28 = vpop.eup %5618 }
 0x6c7   :  { %5622 = vtanh.f32 %v3352_v42  ;;  %v3411_v22 = vpack.c.bf16 %v5619_v28, %v5617_v26  ;;  %v5621_v41 = vpop.eup %5620 }
 0x6c9   :  { %3506 = vmatmul.bf16.gmra.mxu1 %v3411_v22 }
 0x6cc   :  { %v3334_v25 = vpop.f32.mrf.mxu3 }
 0x6cd   :  { %v5623_v57 = vpop.eup %5622  ;;  %v3353_v3 = vadd.f32 %v3334_v25, %v1976_v39 }
 0x6ce   :  { %v3838_v17 = vpack.c.bf16 %v5623_v57, %v5621_v41 }
 0x6cf   :  { %5624 = vtanh.f32 %v3353_v3 }
 0x6d0   :  { %3878 = vmatmul.bf16.gmra.mxu2 %v3838_v17 }
 0x6d4   :  { %v3336_v19 = vpop.f32.mrf.mxu3 }
 0x6d5   :  { %v3354_v18 = vadd.f32 %v3336_v19, %v1978_v38  ;;  %v5625_v47 = vpop.eup %5624 }
 0x6d6   :  { %v3472_v4 = vpop.f32.mrf.mxu1 }
 0x6d7   :  { %5626 = vtanh.f32 %v3354_v18  ;;  %v3473_v40 = vadd.f32 %v7552_v63, %v3472_v4 }
 0x6d9   :  { %v4931_v45 = vmul.f32 -1.442695, %v3473_v40 }
 0x6db   :  { %5628 = vpow2.f32 %v4931_v45 }
 0x6dd   :  { %v5627_v13 = vpop.eup %5626 }
 0x6de   :  { %v3474_v54 = vpop.f32.mrf.mxu1  ;;  %v3839_v56 = vpack.c.bf16 %v5627_v13, %v5625_v47 }
 0x6df   :  { %v3475_v49 = vadd.f32 %v7552_v63, %v3474_v54 }
 0x6e0   :  { %3883 = vmatmul.bf16.gmra.mxu2 %v3839_v56 }
 0x6e1   :  { %v5629_v36 = vpop.eup %5628  ;;  %v4932_v62 = vmul.f32 -1.442695, %v3475_v49 }
 0x6e2   :  { %v3560_v2 = vadd.f32 1.0, %v5629_v36 }
 0x6e3   :  { %5630 = vpow2.f32 %v4932_v62 }
 0x6e4   :  { %5632 = vrcp.f32 %v3560_v2  ;;  %v3587_v23 = vand.u32 2147483648, %v3560_v2  ;;  %v3585_v5 = vand.u32 2147483647, %v3560_v2  ;;  %vm3581_vm3 = vweird.f32 %v3560_v2 }
 0x6e6   :  { %v3477_v44 = vpop.f32.mrf.mxu1  ;;  %v3588_v11 = vor.u32 1.1754944e-38, %v3587_v23  ;;  %vm3586_vm5 = vcmp.eq.f32.partialorder %v3585_v5, 8.507059e+37 }
 0x6e7   :  { %v3478_v33 = vadd.f32 %v7552_v63, %v3477_v44 }
 0x6e9   :  { %v5631_v60 = vpop.eup %5630  ;;  %v4933_v30 = vmul.f32 -1.442695, %v3478_v33 }
 0x6ea   :  { %v5633_v12 = vpop.eup %5632  ;;  %v3561_v10 = vadd.f32 1.0, %v5631_v60 }
 0x6eb   :  { %v3577_v51 = vmul.f32 %v5633_v12, %v3560_v2  ;;  %5634 = vpow2.f32 %v4933_v30  ;;  %vm3582_vm2 = vweird.f32 %v5633_v12 }
 0x6ec   :  { %5636 = vrcp.f32 %v3561_v10  ;;  %vm3583_vm4 = vmor %vm3581_vm3, %vm3582_vm2  ;;  %v3600_v29 = vand.u32 2147483647, %v3561_v10  ;;  %v3602_v32 = vand.u32 2147483648, %v3561_v10  ;;  %vm3596_vm7 = vweird.f32 %v3561_v10 }
 0x6ed   :  { %v3578_v9 = vsub.f32 1.0, %v3577_v51 }
 0x6ee   :  { %v3479_v55 = vpop.f32.mrf.mxu1  ;;  %v3603_v50 = vor.u32 1.1754944e-38, %v3602_v32  ;;  %vm3601_vm9 = vcmp.eq.f32.partialorder %v3600_v29, 8.507059e+37 }
 0x6ef   :  { %v3579_v20 = vmul.f32 %v5633_v12, %v3578_v9  ;;  %v3480_v31 = vadd.f32 %v7552_v63, %v3479_v55 }
 0x6f1   :  { %v5635_v35 = vpop.eup %5634  ;;  %v3580_v46 = vadd.f32 %v5633_v12, %v3579_v20  ;;  %v4934_v24 = vmul.f32 -1.442695, %v3480_v31 }
 0x6f2   :  { %v5637_v48 = vpop.eup %5636  ;;  %v3562_v61 = vadd.f32 1.0, %v5635_v35 }
 0x6f3   :  { %v3584_v21 = vsel %vm3583_vm4, %v5633_v12, %v3580_v46  ;;  %v3592_v58 = vmul.f32 %v5637_v48, %v3561_v10  ;;  %5638 = vpow2.f32 %v4934_v24  ;;  %v3849_v16 = vpop.f32.mrf.mxu2  ;;  %vm3597_vm6 = vweird.f32 %v5637_v48 }
 0x6f4   :  { %v3589_v14 = vsel %vm3586_vm5, %v3588_v11, %v3584_v21  ;;  %5640 = vrcp.f32 %v3562_v61  ;;  %v3850_v37 = vadd.f32 %v7552_v63, %v3849_v16  ;;  %vm3598_vm8 = vmor %vm3596_vm7, %vm3597_vm6  ;;  %v3615_v57 = vand.u32 2147483647, %v3562_v61 }
 0x6f5   :  { %3816 = vst [vmem:[#allocation2] sm:$0xff] %v3589_v14  ;;  %v3593_v1 = vsub.f32 1.0, %v3592_v58  ;;  %v3617_v17 = vand.u32 2147483648, %v3562_v61  ;;  %vm3611_vm11 = vweird.f32 %v3562_v61 }
 0x6f6   :  { %v3482_v34 = vpop.f32.mrf.mxu1  ;;  %v4947_v15 = vmul.f32 -1.442695, %v3850_v37  ;;  %vm3616_vm13 = vcmp.eq.f32.partialorder %v3615_v57, 8.507059e+37 }
 0x6f7   :  { %v3594_v27 = vmul.f32 %v5637_v48, %v3593_v1  ;;  %v3483_v7 = vadd.f32 %v7552_v63, %v3482_v34  ;;  %v3618_v47 = vor.u32 1.1754944e-38, %v3617_v17 }
 0x6f8   :  { %5642 = vpow2.f32 %v4947_v15 }
 0x6f9   :  { %v5639_v8 = vpop.eup %5638  ;;  %v3595_v6 = vadd.f32 %v5637_v48, %v3594_v27  ;;  %v4935_v0 = vmul.f32 -1.442695, %v3483_v7 }
 0x6fa   :  { %v5641_v52 = vpop.eup %5640  ;;  %v3563_v53 = vadd.f32 1.0, %v5639_v8 }
 0x6fb   :  { %v3599_v26 = vsel %vm3598_vm8, %v5637_v48, %v3595_v6  ;;  %v3607_v42 = vmul.f32 %v5641_v52, %v3562_v61  ;;  %5644 = vpow2.f32 %v4935_v0  ;;  %v3851_v28 = vpop.f32.mrf.mxu2  ;;  %vm3612_vm10 = vweird.f32 %v5641_v52 }
 0x6fc   :  { %v3604_v22 = vsel %vm3601_vm9, %v3603_v50, %v3599_v26  ;;  %5646 = vrcp.f32 %v3563_v53  ;;  %v3852_v25 = vadd.f32 %v7552_v63, %v3851_v28  ;;  %vm3613_vm12 = vmor %vm3611_vm11, %vm3612_vm10  ;;  %v3630_v2 = vand.u32 2147483647, %v3563_v53 }
 0x6fd   :  { %3817 = vst [vmem:[#allocation2 + $0x8] sm:$0xff] %v3604_v22  ;;  %v3608_v41 = vsub.f32 1.0, %v3607_v42  ;;  %v3632_v44 = vand.u32 2147483648, %v3563_v53  ;;  %vm3626_vm15 = vweird.f32 %v3563_v53 }
 0x6fe   :  { %v3484_v43 = vpop.f32.mrf.mxu1  ;;  %v5643_v39 = vpop.eup %5642  ;;  %v4948_v59 = vmul.f32 -1.442695, %v3852_v25  ;;  %vm3631_vm1 = vcmp.eq.f32.partialorder %v3630_v2, 8.507059e+37 }
 0x6ff   :  { %v3609_v3 = vmul.f32 %v5641_v52, %v3608_v41  ;;  %v3485_v38 = vadd.f32 %v7552_v63, %v3484_v43  ;;  %v7562_v19 = vadd.f32 1.0, %v5643_v39  ;;  %v3633_v31 = vor.u32 1.1754944e-38, %v3632_v44 }
 0x700   :  { %5648 = vpow2.f32 %v4948_v59 }
 0x701   :  { %v5645_v18 = vpop.eup %5644  ;;  %v3610_v4 = vadd.f32 %v5641_v52, %v3609_v3  ;;  %v4936_v40 = vmul.f32 -1.442695, %v3485_v38  ;;  %5650 = vrcp.f32 %v7562_v19  ;;  %v3962_v58 = vand.u32 2147483647, %v7562_v19 }
 0x702   :  { %v5647_v45 = vpop.eup %5646  ;;  %v7565_v56 = vadd.f32 1.0, %v5645_v18  ;;  %v3964_v16 = vand.u32 2147483648, %v7562_v19  ;;  %vm3958_vm3 = vweird.f32 %v7562_v19 }
 0x703   :  { %v3614_v13 = vsel %vm3613_vm12, %v5641_v52, %v3610_v4  ;;  %v3622_v54 = vmul.f32 %v5647_v45, %v3563_v53  ;;  %v3854_v49 = vpop.f32.mrf.mxu2  ;;  %5652 = vpow2.f32 %v4936_v40  ;;  %vm3627_vm14 = vweird.f32 %v5647_v45 }
 0x704   :  { %v3619_v36 = vsel %vm3616_vm13, %v3618_v47, %v3614_v13  ;;  %5654 = vrcp.f32 %v7565_v56  ;;  %v3855_v33 = vadd.f32 %v7552_v63, %v3854_v49  ;;  %vm3628_vm0 = vmor %vm3626_vm15, %vm3627_vm14  ;;  %v3645_v29 = vand.u32 2147483647, %v7565_v56 }
 0x705   :  { %3818 = vst [vmem:[#allocation2 + $0x10] sm:$0xff] %v3619_v36  ;;  %v3623_v62 = vsub.f32 1.0, %v3622_v54  ;;  %v3647_v27 = vand.u32 2147483648, %v7565_v56  ;;  %vm3963_vm5 = vcmp.eq.f32.partialorder %v3962_v58, 8.507059e+37  ;;  %v3965_v6 = vor.u32 1.1754944e-38, %v3964_v16 }
 0x706   :  { %v3487_v60 = vpop.f32.mrf.mxu1  ;;  %v5649_v30 = vpop.eup %5648  ;;  %v4949_v23 = vmul.f32 -1.442695, %v3855_v33  ;;  %vm3641_vm7 = vweird.f32 %v7565_v56  ;;  %vm3646_vm9 = vcmp.eq.f32.partialorder %v3645_v29, 8.507059e+37 }
 0x707   :  { %v3624_v12 = vmul.f32 %v5647_v45, %v3623_v62  ;;  %v3488_v10 = vadd.f32 %v7552_v63, %v3487_v60  ;;  %v5651_v51 = vpop.eup %5650  ;;  %v7570_v9 = vadd.f32 1.0, %v5649_v30  ;;  %v3648_v57 = vor.u32 1.1754944e-38, %v3647_v27 }
 0x708   :  { %v3954_v20 = vmul.f32 %v5651_v51, %v7562_v19  ;;  %vm3959_vm2 = vweird.f32 %v5651_v51 }
 0x709   :  { %v3625_v55 = vadd.f32 %v5647_v45, %v3624_v12  ;;  %v5653_v5 = vpop.eup %5652  ;;  %5656 = vrcp.f32 %v7570_v9  ;;  %v4937_v35 = vmul.f32 -1.442695, %v3488_v10  ;;  %vm3960_vm4 = vmor %vm3958_vm3, %vm3959_vm2  ;;  %v3979_v59 = vand.u32 2147483648, %v7570_v9 }
 0x70a   :  { %v5655_v46 = vpop.eup %5654  ;;  %v3955_v48 = vsub.f32 1.0, %v3954_v20  ;;  %v7574_v11 = vadd.f32 1.0, %v5653_v5  ;;  %5658 = vpow2.f32 %v4949_v23  ;;  %v3977_v4 = vand.u32 2147483647, %v7570_v9 }
 0x70b   :  { %v3629_v24 = vsel %vm3628_vm0, %v5647_v45, %v3625_v55  ;;  %v3856_v61 = vpop.f32.mrf.mxu2  ;;  %v3637_v14 = vmul.f32 %v5655_v46, %v7565_v56  ;;  %vm3642_vm6 = vweird.f32 %v5655_v46  ;;  %vm3973_vm11 = vweird.f32 %v7570_v9 }
 0x70c   :  { %v3634_v21 = vsel %vm3631_vm1, %v3633_v31, %v3629_v24  ;;  %v3956_v1 = vmul.f32 %v5651_v51, %v3955_v48  ;;  %5660 = vrcp.f32 %v7574_v11  ;;  %v3857_v15 = vadd.f32 %v7552_v63, %v3856_v61  ;;  %vm3643_vm8 = vmor %vm3641_vm7, %vm3642_vm6 }
 0x70d   :  { %3819 = vst [vmem:[#allocation2 + $0x18] sm:$0xff] %v3634_v21  ;;  %v3638_v37 = vsub.f32 1.0, %v3637_v14  ;;  %5662 = vpow2.f32 %v4937_v35  ;;  %v3660_v54 = vand.u32 2147483647, %v7574_v11  ;;  %v3662_v56 = vand.u32 2147483648, %v7574_v11 }
 0x70e   :  { %v3489_v32 = vpop.f32.mrf.mxu1  ;;  %v3957_v34 = vadd.f32 %v5651_v51, %v3956_v1  ;;  %v4950_v26 = vmul.f32 -1.442695, %v3857_v15  ;;  %v3980_v36 = vor.u32 1.1754944e-38, %v3979_v59  ;;  %vm3978_vm14 = vcmp.eq.f32.partialorder %v3977_v4, 8.507059e+37 }
 0x70f   :  { %v3490_v7 = vadd.f32 %v7552_v63, %v3489_v32  ;;  %v5657_v8 = vpop.eup %5656  ;;  %v3639_v0 = vmul.f32 %v5655_v46, %v3638_v37  ;;  %vm3656_vm15 = vweird.f32 %v7574_v11  ;;  %vm3661_vm1 = vcmp.eq.f32.partialorder %v3660_v54, 8.507059e+37 }
 0x710   :  { %v5659_v52 = vpop.eup %5658  ;;  %v3961_v50 = vsel %vm3960_vm4, %v5651_v51, %v3957_v34  ;;  %v3969_v53 = vmul.f32 %v5657_v8, %v7570_v9  ;;  %5664 = vpow2.f32 %v4950_v26  ;;  %vm3974_vm10 = vweird.f32 %v5657_v8 }
 0x711   :  { %v3966_v42 = vsel %vm3963_vm5, %v3965_v6, %v3961_v50  ;;  %v3640_v28 = vadd.f32 %v5655_v46, %v3639_v0  ;;  %v7587_v22 = vadd.f32 1.0, %v5659_v52  ;;  %v4938_v41 = vmul.f32 -1.442695, %v3490_v7  ;;  %vm3975_vm12 = vmor %vm3973_vm11, %vm3974_vm10 }
 0x712   :  { %v5661_v25 = vpop.eup %5660  ;;  %4193 = vst [vmem:[#allocation2 + $0x80] sm:$0xff] %v3966_v42  ;;  %v3970_v17 = vsub.f32 1.0, %v3969_v53  ;;  %v3663_v9 = vor.u32 1.1754944e-38, %v3662_v56 }
 0x713   :  { %v3859_v43 = vpop.f32.mrf.mxu2  ;;  %v5663_v39 = vpop.eup %5662  ;;  %v3644_v3 = vsel %vm3643_vm8, %v5655_v46, %v3640_v28  ;;  %v3652_v38 = vmul.f32 %v5661_v25, %v7574_v11  ;;  %5666 = vrcp.f32 %v7587_v22  ;;  %vm3657_vm13 = vweird.f32 %v5661_v25 }
 0x714   :  { %v3649_v19 = vsel %vm3646_vm9, %v3648_v57, %v3644_v3  ;;  %v3971_v18 = vmul.f32 %v5657_v8, %v3970_v17  ;;  %v7594_v45 = vadd.f32 1.0, %v5663_v39  ;;  %5668 = vpow2.f32 %v4938_v41  ;;  %vm3658_vm0 = vmor %vm3656_vm15, %vm3657_vm13 }
 0x715   :  { %3820 = vst [vmem:[#allocation2 + $0x20] sm:$0xff] %v3649_v19  ;;  %v3653_v40 = vsub.f32 1.0, %v3652_v38  ;;  %v3860_v49 = vadd.f32 %v7552_v63, %v3859_v43  ;;  %v3992_v31 = vand.u32 2147483647, %v7587_v22  ;;  %v3994_v35 = vand.u32 2147483648, %v7587_v22 }
 0x716   :  { %v3492_v47 = vpop.f32.mrf.mxu1  ;;  %v3972_v13 = vadd.f32 %v5657_v8, %v3971_v18  ;;  %5670 = vrcp.f32 %v7594_v45  ;;  %v5665_v2 = vpop.eup %5664  ;;  %v3675_v21 = vand.u32 2147483647, %v7594_v45  ;;  %vm3988_vm3 = vweird.f32 %v7587_v22 }
 0x717   :  { %v3654_v62 = vmul.f32 %v5661_v25, %v3653_v40  ;;  %v3493_v33 = vadd.f32 %v7552_v63, %v3492_v47  ;;  %v7602_v10 = vadd.f32 1.0, %v5665_v2  ;;  %v4951_v51 = vmul.f32 -1.442695, %v3860_v49 }
 0x718   :  { %v3976_v44 = vsel %vm3975_vm12, %v5657_v8, %v3972_v13  ;;  %vm7614_vm4 = vcmp.eq.f32.partialorder %v3992_v31, 8.507059e+37  ;;  %v3995_v29 = vor.u32 1.1754944e-38, %v3994_v35  ;;  %vm3671_vm6 = vweird.f32 %v7594_v45 }
 0x719   :  { %v5667_v60 = vpop.eup %5666  ;;  %v3981_v30 = vsel %vm3978_vm14, %v3980_v36, %v3976_v44  ;;  %v3655_v12 = vadd.f32 %v5661_v25, %v3654_v62  ;;  %5672 = vrcp.f32 %v7602_v10  ;;  %v4939_v11 = vmul.f32 -1.442695, %v3493_v33 }
 0x71a   :  { %4194 = vst [vmem:[#allocation2 + $0x88] sm:$0xff] %v3981_v30  ;;  %v3984_v23 = vmul.f32 %v5667_v60, %v7587_v22  ;;  %v5669_v20 = vpop.eup %5668  ;;  %5674 = vpow2.f32 %v4951_v51  ;;  %vm3989_vm2 = vweird.f32 %v5667_v60  ;;  %vm7620_vm7 = vcmp.eq.f32.partialorder %v3675_v21, 8.507059e+37 }
 0x71b   :  { %v3861_v55 = vpop.f32.mrf.mxu2  ;;  %v3659_v5 = vsel %vm3658_vm0, %v5661_v25, %v3655_v12  ;;  %v7608_v48 = vadd.f32 1.0, %v5669_v20  ;;  %vm3990_vm5 = vmor %vm3988_vm3, %vm3989_vm2  ;;  %v3677_v8 = vand.u32 2147483648, %v7594_v45  ;;  %v4007_v57 = vand.u32 2147483647, %v7602_v10 }
 0x71c   :  { %v3664_v46 = vsel %vm3661_vm1, %v3663_v9, %v3659_v5  ;;  %v3985_v24 = vsub.f32 1.0, %v3984_v23  ;;  %v5671_v61 = vpop.eup %5670  ;;  %v3862_v58 = vadd.f32 %v7552_v63, %v3861_v55  ;;  %v4009_v3 = vand.u32 2147483648, %v7602_v10 }
 0x71d   :  { %3821 = vst [vmem:[#allocation2 + $0x28] sm:$0xff] %v3664_v46  ;;  %v3667_v1 = vmul.f32 %v5671_v61, %v7594_v45  ;;  %5676 = vrcp.f32 %v7608_v48  ;;  %vm3672_vm8 = vweird.f32 %v5671_v61  ;;  %v3678_v39 = vor.u32 1.1754944e-38, %v3677_v8 }
 0x71e   :  { %v3494_v16 = vpop.f32.mrf.mxu1  ;;  %v3986_v14 = vmul.f32 %v5667_v60, %v3985_v24  ;;  %5678 = vpow2.f32 %v4939_v11  ;;  %v4952_v27 = vmul.f32 -1.442695, %v3862_v58  ;;  %vm3673_vm9 = vmor %vm3671_vm6, %vm3672_vm8  ;;  %vm4003_vm11 = vweird.f32 %v7602_v10 }
 0x71f   :  { %v3668_v34 = vsub.f32 1.0, %v3667_v1  ;;  %v5673_v15 = vpop.eup %5672  ;;  %v3495_v6 = vadd.f32 %v7552_v63, %v3494_v16  ;;  %vm4008_vm12 = vcmp.eq.f32.partialorder %v4007_v57, 8.507059e+37  ;;  %v4010_v49 = vor.u32 1.1754944e-38, %v4009_v3 }
 0x720   :  { %v3987_v32 = vadd.f32 %v5667_v60, %v3986_v14  ;;  %v3999_v50 = vmul.f32 %v5673_v15, %v7602_v10  ;;  %v5675_v26 = vpop.eup %5674  ;;  %5680 = vpow2.f32 %v4952_v27  ;;  %vm4004_vm10 = vweird.f32 %v5673_v15 }
 0x721   :  { %v3669_v52 = vmul.f32 %v5671_v61, %v3668_v34  ;;  %v4940_v28 = vmul.f32 -1.442695, %v3495_v6  ;;  %v7631_v17 = vadd.f32 1.0, %v5675_v26  ;;  %vm4005_vm13 = vmor %vm4003_vm11, %vm4004_vm10  ;;  %v3690_v36 = vand.u32 2147483647, %v7608_v48 }
 0x722   :  { %v3991_v0 = vsel %vm3990_vm5, %v5667_v60, %v3987_v32  ;;  %v4000_v25 = vsub.f32 1.0, %v3999_v50  ;;  %v3692_v62 = vand.u32 2147483648, %v7608_v48  ;;  %vm3686_vm15 = vweird.f32 %v7608_v48 }
 0x723   :  { %v3864_v53 = vpop.f32.mrf.mxu2  ;;  %v3996_v42 = vsel %vm7614_vm4, %v3995_v29, %v3991_v0  ;;  %v3670_v41 = vadd.f32 %v5671_v61, %v3669_v52  ;;  %v5677_v43 = vpop.eup %5676  ;;  %5682 = vpow2.f32 %v4940_v28  ;;  %v4022_v51 = vand.u32 2147483647, %v7631_v17 }
 0x724   :  { %v3865_v22 = vadd.f32 %v7552_v63, %v3864_v53  ;;  %4195 = vst [vmem:[#allocation2 + $0x90] sm:$0xff] %v3996_v42  ;;  %v5679_v19 = vpop.eup %5678  ;;  %v4001_v4 = vmul.f32 %v5673_v15, %v4000_v25  ;;  %v3682_v40 = vmul.f32 %v5677_v43, %v7608_v48  ;;  %5684 = vrcp.f32 %v7631_v17 }
 0x725   :  { %v3674_v18 = vsel %vm3673_vm9, %v5671_v61, %v3670_v41  ;;  %v7641_v54 = vadd.f32 1.0, %v5679_v19  ;;  %vm3687_vm14 = vweird.f32 %v5677_v43  ;;  %vm3691_vm1 = vcmp.eq.f32.partialorder %v3690_v36, 8.507059e+37 }
 0x726   :  { %v4953_v59 = vmul.f32 -1.442695, %v3865_v22  ;;  %v3497_v38 = vpop.f32.mrf.mxu1  ;;  %v3679_v47 = vsel %vm7620_vm7, %v3678_v39, %v3674_v18  ;;  %v4002_v45 = vadd.f32 %v5673_v15, %v4001_v4  ;;  %v3683_v13 = vsub.f32 1.0, %v3682_v40  ;;  %v5681_v56 = vpop.eup %5680  ;;  %vm3688_vm0 = vmor %vm3686_vm15, %vm3687_vm14 }
 0x727   :  { %3822 = vst [vmem:[#allocation2 + $0x30] sm:$0xff] %v3679_v47  ;;  %v3498_v12 = vadd.f32 %v7552_v63, %v3497_v38  ;;  %v7649_v9 = vadd.f32 1.0, %v5681_v56  ;;  %v3693_v20 = vor.u32 1.1754944e-38, %v3692_v62  ;;  %v4024_v5 = vand.u32 2147483648, %v7631_v17 }
 0x728   :  { %5686 = vpow2.f32 %v4953_v59  ;;  %v4006_v2 = vsel %vm4005_vm13, %v5673_v15, %v4002_v45  ;;  %v3684_v44 = vmul.f32 %v5677_v43, %v3683_v13  ;;  %v3705_v31 = vand.u32 2147483647, %v7641_v54 }
 0x729   :  { %5688 = vrcp.f32 %v7641_v54  ;;  %v5683_v60 = vpop.eup %5682  ;;  %v4011_v30 = vsel %vm4008_vm12, %v4010_v49, %v4006_v2  ;;  %v3707_v48 = vand.u32 2147483648, %v7641_v54  ;;  %v4941_v21 = vmul.f32 -1.442695, %v3498_v12 }
 0x72a   :  { %4196 = vst [vmem:[#allocation2 + $0x98] sm:$0xff] %v4011_v30  ;;  %v3685_v10 = vadd.f32 %v5677_v43, %v3684_v44  ;;  %v7651_v23 = vadd.f32 1.0, %v5683_v60  ;;  %v5685_v55 = vpop.eup %5684  ;;  %5690 = vrcp.f32 %v7649_v9  ;;  %vm4018_vm2 = vweird.f32 %v7631_v17 }
 0x72b   :  { %v3866_v33 = vpop.f32.mrf.mxu2  ;;  %v4014_v24 = vmul.f32 %v5685_v55, %v7631_v17  ;;  %vm7660_vm3 = vcmp.eq.f32.partialorder %v4022_v51, 8.507059e+37  ;;  %v4025_v37 = vor.u32 1.1754944e-38, %v4024_v5  ;;  %vm3701_vm4 = vweird.f32 %v7641_v54 }
 0x72c   :  { %v3689_v46 = vsel %vm3688_vm0, %v5677_v43, %v3685_v10  ;;  %v3867_v58 = vadd.f32 %v7552_v63, %v3866_v33  ;;  %5692 = vrcp.f32 %v7651_v23  ;;  %vm7667_vm5 = vcmp.eq.f32.partialorder %v3705_v31, 8.507059e+37 }
 0x72d   :  { %v3694_v61 = vsel %vm3691_vm1, %v3693_v20, %v3689_v46  ;;  %v4015_v14 = vsub.f32 1.0, %v4014_v24  ;;  %vm4019_vm6 = vweird.f32 %v5685_v55  ;;  %v3708_v27 = vor.u32 1.1754944e-38, %v3707_v48 }
 0x72e   :  { %v3499_v35 = vpop.f32.mrf.mxu1  ;;  %v5687_v11 = vpop.eup %5686  ;;  %3823 = vst [vmem:[#allocation2 + $0x38] sm:$0xff] %v3694_v61  ;;  %5694 = vpow2.f32 %v4941_v21  ;;  %v4954_v6 = vmul.f32 -1.442695, %v3867_v58  ;;  %vm4033_vm7 = vweird.f32 %v7649_v9  ;;  %v4037_v53 = vand.u32 2147483647, %v7649_v9  ;;  %vm4020_vm8 = vmor %vm4018_vm2, %vm4019_vm6 }
 0x72f   :  { %v5689_v16 = vpop.eup %5688  ;;  %v4016_v34 = vmul.f32 %v5685_v55, %v4015_v14  ;;  %v7671_v15 = vadd.f32 1.0, %v5687_v11  ;;  %v3500_v0 = vadd.f32 %v7552_v63, %v3499_v35  ;;  %v4039_v28 = vand.u32 2147483648, %v7649_v9 }
 0x730   :  { %v3697_v29 = vmul.f32 %v5689_v16, %v7641_v54  ;;  %v5691_v52 = vpop.eup %5690  ;;  %vm3702_vm9 = vweird.f32 %v5689_v16  ;;  %vm3716_vm10 = vweird.f32 %v7651_v23  ;;  %vm7687_vm12 = vcmp.eq.f32.partialorder %v4037_v53, 8.507059e+37 }
 0x731   :  { %v4017_v50 = vadd.f32 %v5685_v55, %v4016_v34  ;;  %5696 = vrcp.f32 %v7671_v15  ;;  %v4029_v42 = vmul.f32 %v5691_v52, %v7649_v9  ;;  %v4942_v57 = vmul.f32 -1.442695, %v3500_v0  ;;  %vm3703_vm11 = vmor %vm3701_vm4, %vm3702_vm9 }
 0x732   :  { %v3698_v8 = vsub.f32 1.0, %v3697_v29  ;;  %v5693_v41 = vpop.eup %5692  ;;  %5698 = vpow2.f32 %v4954_v6  ;;  %v3720_v38 = vand.u32 2147483647, %v7651_v23  ;;  %v3722_v19 = vand.u32 2147483648, %v7651_v23 }
 0x733   :  { %v3869_v7 = vpop.f32.mrf.mxu2  ;;  %v4021_v25 = vsel %vm4020_vm8, %v5685_v55, %v4017_v50  ;;  %v4030_v3 = vsub.f32 1.0, %v4029_v42  ;;  %v3712_v17 = vmul.f32 %v5693_v41, %v7651_v23  ;;  %5700 = vpow2.f32 %v4942_v57 }
 0x734   :  { %v3699_v26 = vmul.f32 %v5689_v16, %v3698_v8  ;;  %v4026_v43 = vsel %vm7660_vm3, %v4025_v37, %v4021_v25  ;;  %v5695_v18 = vpop.eup %5694  ;;  %vm4034_vm13 = vweird.f32 %v5691_v52  ;;  %v4040_v54 = vor.u32 1.1754944e-38, %v4039_v28 }
 0x735   :  { %4197 = vst [vmem:[#allocation2 + $0xa0] sm:$0xff] %v4026_v43  ;;  %v4031_v40 = vmul.f32 %v5691_v52, %v4030_v3  ;;  %v3713_v47 = vsub.f32 1.0, %v3712_v17  ;;  %v7695_v56 = vadd.f32 1.0, %v5695_v18  ;;  %v3870_v49 = vadd.f32 %v7552_v63, %v3869_v7  ;;  %vm4035_vm15 = vmor %vm4033_vm7, %vm4034_vm13 }
 0x736   :  { %v3502_v22 = vpop.f32.mrf.mxu1  ;;  %v3700_v39 = vadd.f32 %v5689_v16, %v3699_v26  ;;  %vm3717_vm14 = vweird.f32 %v5693_v41  ;;  %vm7701_vm0 = vcmp.eq.f32.partialorder %v3720_v38, 8.507059e+37  ;;  %v3723_v30 = vor.u32 1.1754944e-38, %v3722_v19 }
 0x737   :  { %v5697_v45 = vpop.eup %5696  ;;  %v4032_v62 = vadd.f32 %v5691_v52, %v4031_v40  ;;  %v3714_v2 = vmul.f32 %v5693_v41, %v3713_v47  ;;  %5702 = vrcp.f32 %v7695_v56  ;;  %v3503_v12 = vadd.f32 %v7552_v63, %v3502_v22  ;;  %vm3718_vm1 = vmor %vm3716_vm10, %vm3717_vm14 }
 0x738   :  { %v3704_v4 = vsel %vm3703_vm11, %v5689_v16, %v3700_v39  ;;  %v4044_v44 = vmul.f32 %v5697_v45, %v7671_v15  ;;  %v5699_v33 = vpop.eup %5698  ;;  %v4052_v9 = vand.u32 2147483647, %v7671_v15  ;;  %v4054_v35 = vand.u32 2147483648, %v7671_v15 }
 0x739   :  { %v3709_v13 = vsel %vm7667_vm5, %v3708_v27, %v3704_v4  ;;  %v4036_v10 = vsel %vm4035_vm15, %v5691_v52, %v4032_v62  ;;  %v3715_v51 = vadd.f32 %v5693_v41, %v3714_v2  ;;  %v7707_v20 = vadd.f32 1.0, %v5699_v33  ;;  %v5701_v5 = vpop.eup %5700 }
 0x73a   :  { %3824 = vst [vmem:[#allocation2 + $0x40] sm:$0xff] %v3709_v13  ;;  %v4045_v55 = vsub.f32 1.0, %v4044_v44  ;;  %v4041_v31 = vsel %vm7687_vm12, %v4040_v54, %v4036_v10  ;;  %v4955_v46 = vmul.f32 -1.442695, %v3870_v49  ;;  %vm4049_vm2 = vweird.f32 %v5697_v45 }
 0x73b   :  { %v3871_v36 = vpop.f32.mrf.mxu2  ;;  %4198 = vst [vmem:[#allocation2 + $0xa8] sm:$0xff] %v4041_v31  ;;  %v3719_v48 = vsel %vm3718_vm1, %v5693_v41, %v3715_v51  ;;  %5704 = vrcp.f32 %v7707_v20  ;;  %vm4048_vm3 = vweird.f32 %v7671_v15  ;;  %v7719_v21 = vadd.f32 1.0, %v5701_v5 }
 0x73c   :  { %v4046_v11 = vmul.f32 %v5697_v45, %v4045_v55  ;;  %v3724_v61 = vsel %vm7701_vm0, %v3723_v30, %v3719_v48  ;;  %5706 = vpow2.f32 %v4955_v46  ;;  %v4943_v58 = vmul.f32 -1.442695, %v3503_v12  ;;  %vm4050_vm4 = vmor %vm4048_vm3, %vm4049_vm2 }
 0x73d   :  { %3825 = vst [vmem:[#allocation2 + $0x48] sm:$0xff] %v3724_v61  ;;  %v3872_v16 = vadd.f32 %v7552_v63, %v3871_v36  ;;  %v5703_v14 = vpop.eup %5702  ;;  %v4055_v1 = vor.u32 1.1754944e-38, %v4054_v35  ;;  %v3735_v37 = vand.u32 2147483647, %v7695_v56  ;;  %v3737_v29 = vand.u32 2147483648, %v7695_v56 }
 0x73e   :  { %v3504_v24 = vpop.f32.mrf.mxu1  ;;  %v4047_v23 = vadd.f32 %v5697_v45, %v4046_v11  ;;  %5708 = vrcp.f32 %v7719_v21  ;;  %vm4053_vm5 = vcmp.eq.f32.partialorder %v4052_v9, 8.507059e+37  ;;  %v3727_v27 = vmul.f32 %v5703_v14, %v7695_v56 }
 0x73f   :  { %5710 = vpow2.f32 %v4943_v58  ;;  %v4956_v7 = vmul.f32 -1.442695, %v3872_v16  ;;  %vm3731_vm6 = vweird.f32 %v7695_v56  ;;  %v3505_v0 = vadd.f32 %v7552_v63, %v3504_v24 }
 0x740   :  { %v4051_v34 = vsel %vm4050_vm4, %v5697_v45, %v4047_v23  ;;  %v3728_v6 = vsub.f32 1.0, %v3727_v27  ;;  %vm7729_vm7 = vcmp.eq.f32.partialorder %v3735_v37, 8.507059e+37  ;;  %v3738_v53 = vor.u32 1.1754944e-38, %v3737_v29 }
 0x741   :  { %v4056_v15 = vsel %vm4053_vm5, %v4055_v1, %v4051_v34  ;;  %v5705_v8 = vpop.eup %5704  ;;  %5712 = vpow2.f32 %v4956_v7  ;;  %vm3732_vm8 = vweird.f32 %v5703_v14  ;;  %vm4063_vm9 = vweird.f32 %v7707_v20 }
 0x742   :  { %4199 = vst [vmem:[#allocation2 + $0xb0] sm:$0xff] %v4056_v15  ;;  %v4059_v26 = vmul.f32 %v5705_v8, %v7707_v20  ;;  %v5707_v42 = vpop.eup %5706  ;;  %v3729_v28 = vmul.f32 %v5703_v14, %v3728_v6  ;;  %v4944_v22 = vmul.f32 -1.442695, %v3505_v0  ;;  %v4067_v57 = vand.u32 2147483647, %v7707_v20  ;;  %vm3733_vm10 = vmor %vm3731_vm6, %vm3732_vm8 }
 0x743   :  { %v3874_v32 = vpop.f32.mrf.mxu2  ;;  %v7736_v43 = vadd.f32 1.0, %v5707_v42  ;;  %v4069_v59 = vand.u32 2147483648, %v7707_v20  ;;  %vm4064_vm11 = vweird.f32 %v5705_v8  ;;  %v3750_v4 = vand.u32 2147483647, %v7719_v21 }
 0x744   :  { %v3875_v52 = vadd.f32 %v7552_v63, %v3874_v32  ;;  %v5709_v41 = vpop.eup %5708  ;;  %v4060_v25 = vsub.f32 1.0, %v4059_v26  ;;  %v3730_v17 = vadd.f32 %v5703_v14, %v3729_v28  ;;  %5714 = vpow2.f32 %v4944_v22  ;;  %vm4065_vm12 = vmor %vm4063_vm9, %vm4064_vm11 }
 0x745   :  { %v3742_v38 = vmul.f32 %v5709_v41, %v7719_v21  ;;  %v5711_v19 = vpop.eup %5710  ;;  %5716 = vrcp.f32 %v7736_v43  ;;  %v3752_v56 = vand.u32 2147483648, %v7719_v21  ;;  %v4070_v2 = vor.u32 1.1754944e-38, %v4069_v59 }
 0x746   :  { %v4957_v39 = vmul.f32 -1.442695, %v3875_v52  ;;  %v3507_v3 = vpop.f32.mrf.mxu1  ;;  %v4061_v18 = vmul.f32 %v5705_v8, %v4060_v25  ;;  %v3734_v47 = vsel %vm3733_vm10, %v5703_v14, %v3730_v17  ;;  %v7744_v13 = vadd.f32 1.0, %v5711_v19 }
 0x747   :  { %v3743_v45 = vsub.f32 1.0, %v3742_v38  ;;  %v3508_v54 = vadd.f32 %v7552_v63, %v3507_v3  ;;  %v5713_v49 = vpop.eup %5712  ;;  %v3739_v36 = vsel %vm7729_vm7, %v3738_v53, %v3734_v47  ;;  %vm3747_vm13 = vweird.f32 %v5709_v41 }
 0x748   :  { %v4062_v62 = vadd.f32 %v5705_v8, %v4061_v18  ;;  %5718 = vpow2.f32 %v4957_v39  ;;  %3826 = vst [vmem:[#allocation2 + $0x50] sm:$0xff] %v3739_v36  ;;  %vm4068_vm14 = vcmp.eq.f32.partialorder %v4067_v57, 8.507059e+37  ;;  %vm3746_vm15 = vweird.f32 %v7719_v21 }
 0x749   :  { %v3744_v44 = vmul.f32 %v5709_v41, %v3743_v45  ;;  %5720 = vrcp.f32 %v7744_v13  ;;  %v7754_v60 = vadd.f32 1.0, %v5713_v49  ;;  %v4082_v51 = vand.u32 2147483647, %v7736_v43  ;;  %vm3748_vm0 = vmor %vm3746_vm15, %vm3747_vm13 }
 0x74a   :  { %v4066_v33 = vsel %vm4065_vm12, %v5705_v8, %v4062_v62  ;;  %v5715_v30 = vpop.eup %5714  ;;  %v4945_v55 = vmul.f32 -1.442695, %v3508_v54  ;;  %vm3751_vm1 = vcmp.eq.f32.partialorder %v3750_v4, 8.507059e+37  ;;  %v3753_v20 = vor.u32 1.1754944e-38, %v3752_v56 }
 0x74b   :  { %v3876_v40 = vpop.f32.mrf.mxu2  ;;  %v4071_v12 = vsel %vm4068_vm14, %v4070_v2, %v4066_v33  ;;  %v3745_v10 = vadd.f32 %v5709_v41, %v3744_v44  ;;  %v5717_v5 = vpop.eup %5716  ;;  %vm4078_vm2 = vweird.f32 %v7736_v43  ;;  %5722 = vrcp.f32 %v7754_v60 }
 0x74c   :  { %4200 = vst [vmem:[#allocation2 + $0xb8] sm:$0xff] %v4071_v12  ;;  %v4074_v9 = vmul.f32 %v5717_v5, %v7736_v43  ;;  %v4084_v35 = vand.u32 2147483648, %v7736_v43  ;;  %v3877_v46 = vadd.f32 %v7552_v63, %v3876_v40  ;;  %v3765_v11 = vand.u32 2147483647, %v7744_v13  ;;  %v7800_v43 = vld [vmem:[%s7863_s5] ss:$0 sm:$0xff] }
 0x74d   :  { %v3749_v31 = vsel %vm3748_vm0, %v5709_v41, %v3745_v10  ;;  %v7763_v61 = vadd.f32 1.0, %v5715_v30  ;;  %5724 = vpow2.f32 %v4945_v55  ;;  %vm7767_vm3 = vcmp.eq.f32.partialorder %v4082_v51, 8.507059e+37  ;;  %s5803_s5 = smov [#allocation2]  }
 0x74e   :  { %v5719_v24 = vpop.eup %5718  ;;  %v3754_v48 = vsel %vm3751_vm1, %v3753_v20, %v3749_v31  ;;  %v4075_v58 = vsub.f32 1.0, %v4074_v9  ;;  %v3767_v14 = vand.u32 2147483648, %v7744_v13  ;;  %v4097_v37 = vand.u32 2147483647, %v7754_v60  ;;  %v3509_v50 = vpop.f32.mrf.mxu1  ;;  %s4213_s25 = sshll.u32 %s5803_s5, 4  ;;  %s4214_s25 = int_to_ptr.vmem [resolvable:$true] %s4213_s25 }
 0x74f   :  { %v5721_v23 = vpop.eup %5720  ;;  %3827 = vst [vmem:[#allocation2 + $0x58] sm:$0xff] %v3754_v48  ;;  %v7772_v1 = vadd.f32 1.0, %v5719_v24  ;;  %v4099_v29 = vand.u32 2147483648, %v7754_v60  ;;  %5726 = vrcp.f32 %v7763_v61  ;;  %vm4079_vm4 = vweird.f32 %v5717_v5 }
 0x750   :  { %v3757_v63 = vmul.f32 %v5721_v23, %v7744_v13  ;;  %v4076_v32 = vmul.f32 %v5717_v5, %v4075_v58  ;;  %v4085_v34 = vor.u32 1.1754944e-38, %v4084_v35  ;;  %v4958_v27 = vmul.f32 -1.442695, %v3877_v46  ;;  %vm4080_vm8 = vmor %vm4078_vm2, %vm4079_vm4 }
 0x751   :  { %v5723_v15 = vpop.eup %5722  ;;  %vm3761_vm5 = vweird.f32 %v7744_v13  ;;  %vm7779_vm6 = vcmp.eq.f32.partialorder %v3765_v11, 8.507059e+37  ;;  %5728 = vrcp.f32 %v7772_v1  ;;  %v3768_v0 = vor.u32 1.1754944e-38, %v3767_v14 }
 0x752   :  { %v3758_v7 = vsub.f32 1.0, %v3757_v63  ;;  %v4077_v6 = vadd.f32 %v5717_v5, %v4076_v32  ;;  %v4089_v52 = vmul.f32 %v5723_v15, %v7754_v60  ;;  %vm4093_vm7 = vweird.f32 %v7754_v60 }
 0x753   :  { %v7765_v21 = vpop.f32.mrf.mxu2  ;;  %v5725_v53 = vpop.eup %5724  ;;  %vm3762_vm9 = vweird.f32 %v5721_v23  ;;  %vm7788_vm10 = vcmp.eq.f32.partialorder %v4097_v37, 8.507059e+37  ;;  %v4100_v28 = vor.u32 1.1754944e-38, %v4099_v29  ;;  %5730 = vpow2.f32 %v4958_v27 }
 0x754   :  { %v3759_v26 = vmul.f32 %v5721_v23, %v3758_v7  ;;  %v4081_v22 = vsel %vm4080_vm8, %v5717_v5, %v4077_v6  ;;  %v4090_v41 = vsub.f32 1.0, %v4089_v52  ;;  %v7792_v25 = vadd.f32 1.0, %v5725_v53  ;;  %vm3763_vm12 = vmor %vm3761_vm5, %vm3762_vm9 }
 0x755   :  { %v5727_v57 = vpop.eup %5726  ;;  %v4086_v39 = vsel %vm7767_vm3, %v4085_v34, %v4081_v22  ;;  %vm3776_vm11 = vweird.f32 %v7763_v61  ;;  %v3510_v17 = vadd.f32 %v7800_v43, %v3509_v50  ;;  %vm4094_vm13 = vweird.f32 %v5723_v15 }
 0x756   :  { %v3760_v3 = vadd.f32 %v5721_v23, %v3759_v26  ;;  %4201 = vst [vmem:[#allocation2 + $0xc0] sm:$0xff] %v4086_v39  ;;  %v4091_v38 = vmul.f32 %v5723_v15, %v4090_v41  ;;  %v3772_v19 = vmul.f32 %v5727_v57, %v7763_v61  ;;  %5732 = vrcp.f32 %v7792_v25  ;;  %vm4095_vm15 = vmor %vm4093_vm7, %vm4094_vm13 }
 0x757   :  { %v5729_v18 = vpop.eup %5728  ;;  %v3780_v40 = vand.u32 2147483647, %v7763_v61  ;;  %v3782_v47 = vand.u32 2147483648, %v7763_v61  ;;  %vm4108_vm14 = vweird.f32 %v7772_v1  ;;  %vm3777_vm0 = vweird.f32 %v5727_v57 }
 0x758   :  { %v3764_v4 = vsel %vm3763_vm12, %v5721_v23, %v3760_v3  ;;  %v4092_v54 = vadd.f32 %v5723_v15, %v4091_v38  ;;  %v3773_v13 = vsub.f32 1.0, %v3772_v19  ;;  %v4104_v49 = vmul.f32 %v5729_v18, %v7772_v1  ;;  %vm3778_vm2 = vmor %vm3776_vm11, %vm3777_vm0 }
 0x759   :  { %v3769_v45 = vsel %vm7779_vm6, %v3768_v0, %v3764_v4  ;;  %v4112_v36 = vand.u32 2147483647, %v7772_v1  ;;  %v4114_v62 = vand.u32 2147483648, %v7772_v1  ;;  %v4946_v56 = vmul.f32 -1.442695, %v3510_v17  ;;  %v5731_v2 = vpop.eup %5730 }
 0x75a   :  { %3828 = vst [vmem:[#allocation2 + $0x60] sm:$0xff] %v3769_v45  ;;  %v4096_v44 = vsel %vm4095_vm15, %v5723_v15, %v4092_v54  ;;  %v3774_v33 = vmul.f32 %v5727_v57, %v3773_v13  ;;  %v4105_v30 = vsub.f32 1.0, %v4104_v49  ;;  %v3880_v12 = vadd.f32 %v7800_v43, %v7765_v21 }
 0x75b   :  { %v3881_v59 = vpop.f32.mrf.mxu2  ;;  %v4101_v10 = vsel %vm7788_vm10, %v4100_v28, %v4096_v44  ;;  %v7822_v51 = vadd.f32 1.0, %v5731_v2  ;;  %5734 = vpow2.f32 %v4946_v56  ;;  %vm4109_vm1 = vweird.f32 %v5729_v18 }
 0x75c   :  { %v3882_v60 = vadd.f32 %v7800_v43, %v3881_v59  ;;  %v5733_v55 = vpop.eup %5732  ;;  %4202 = vst [vmem:[#allocation2 + $0xc8] sm:$0xff] %v4101_v10  ;;  %v3775_v5 = vadd.f32 %v5727_v57, %v3774_v33  ;;  %v4106_v20 = vmul.f32 %v5729_v18, %v4105_v30  ;;  %v4959_v31 = vmul.f32 -1.442695, %v3880_v12  ;;  %vm4110_vm5 = vmor %vm4108_vm14, %vm4109_vm1 }
 0x75d   :  { %vm3781_vm3 = vcmp.eq.f32.partialorder %v3780_v40, 8.507059e+37  ;;  %v3783_v9 = vor.u32 1.1754944e-38, %v3782_v47  ;;  %v3787_v35 = vmul.f32 %v5733_v55, %v7792_v25  ;;  %5736 = vrcp.f32 %v7822_v51 }
 0x75e   :  { %v3779_v24 = vsel %vm3778_vm2, %v5727_v57, %v3775_v5  ;;  %v4107_v48 = vadd.f32 %v5729_v18, %v4106_v20  ;;  %vm4113_vm4 = vcmp.eq.f32.partialorder %v4112_v36, 8.507059e+37  ;;  %v4115_v11 = vor.u32 1.1754944e-38, %v4114_v62 }
 0x75f   :  { %v3784_v21 = vsel %vm3781_vm3, %v3783_v9, %v3779_v24  ;;  %v3788_v23 = vsub.f32 1.0, %v3787_v35  ;;  %5738 = vpow2.f32 %v4959_v31  ;;  %v4960_v58 = vmul.f32 -1.442695, %v3882_v60 }
 0x760   :  { %3829 = vst [vmem:[#allocation2 + $0x68] sm:$0xff] %v3784_v21  ;;  %v4111_v61 = vsel %vm4110_vm5, %v5729_v18, %v4107_v48  ;;  %v3795_v16 = vand.u32 2147483647, %v7792_v25  ;;  %v3797_v14 = vand.u32 2147483648, %v7792_v25  ;;  %vm3792_vm6 = vweird.f32 %v5733_v55 }
 0x761   :  { %v5735_v37 = vpop.eup %5734  ;;  %v4116_v29 = vsel %vm4113_vm4, %v4115_v11, %v4111_v61  ;;  %v3789_v32 = vmul.f32 %v5733_v55, %v3788_v23  ;;  %5740 = vpow2.f32 %v4960_v58  ;;  %vm3791_vm7 = vweird.f32 %v7792_v25 }
 0x762   :  { %4203 = vst [vmem:[#allocation2 + $0xd0] sm:$0xff] %v4116_v29  ;;  %v3575_v34 = vadd.f32 1.0, %v5735_v37  ;;  %vm3793_vm8 = vmor %vm3791_vm7, %vm3792_vm6  ;;  %v3798_v7 = vor.u32 1.1754944e-38, %v3797_v14  ;;  %vm3796_vm9 = vcmp.eq.f32.partialorder %v3795_v16, 8.507059e+37  ;;  %v4129_v22 = vand.u32 2147483648, %v7822_v51 }
 0x763   :  { %v3884_v46 = vpop.f32.mrf.mxu2  ;;  %v5737_v27 = vpop.eup %5736  ;;  %v3790_v15 = vadd.f32 %v5733_v55, %v3789_v32  ;;  %v4127_v25 = vand.u32 2147483647, %v7822_v51  ;;  %vm4123_vm11 = vweird.f32 %v7822_v51 }
 0x764   :  { %v3885_v63 = vadd.f32 %v7800_v43, %v3884_v46  ;;  %v4119_v8 = vmul.f32 %v5737_v27, %v7822_v51  ;;  %5742 = vrcp.f32 %v3575_v34  ;;  %vm4124_vm10 = vweird.f32 %v5737_v27 }
 0x765   :  { %v5739_v6 = vpop.eup %5738  ;;  %v3794_v0 = vsel %vm3793_vm8, %v5733_v55, %v3790_v15  ;;  %vm4125_vm12 = vmor %vm4123_vm11, %vm4124_vm10  ;;  %v4130_v38 = vor.u32 1.1754944e-38, %v4129_v22  ;;  %vm4128_vm13 = vcmp.eq.f32.partialorder %v4127_v25, 8.507059e+37  ;;  %v3810_v45 = vand.u32 2147483647, %v3575_v34 }
 0x766   :  { %v4961_v1 = vmul.f32 -1.442695, %v3885_v63  ;;  %v3799_v50 = vsel %vm3796_vm9, %v3798_v7, %v3794_v0  ;;  %v4120_v53 = vsub.f32 1.0, %v4119_v8  ;;  %v7837_v26 = vadd.f32 1.0, %v5739_v6 }
 0x767   :  { %v5741_v28 = vpop.eup %5740  ;;  %3830 = vst [vmem:[#allocation2 + $0x70] sm:$0xff] %v3799_v50  ;;  %v3812_v54 = vand.u32 2147483648, %v3575_v34  ;;  %vm3806_vm15 = vweird.f32 %v3575_v34  ;;  %vm3811_vm1 = vcmp.eq.f32.partialorder %v3810_v45, 8.507059e+37 }
 0x768   :  { %5744 = vpow2.f32 %v4961_v1  ;;  %v4121_v41 = vmul.f32 %v5737_v27, %v4120_v53  ;;  %v3950_v57 = vadd.f32 1.0, %v5741_v28  ;;  %v4144_v2 = vand.u32 2147483648, %v7837_v26 }
 0x769   :  { %5746 = vrcp.f32 %v7837_v26  ;;  %v3813_v44 = vor.u32 1.1754944e-38, %v3812_v54  ;;  %v4142_v51 = vand.u32 2147483647, %v7837_v26  ;;  %vm4138_vm3 = vweird.f32 %v7837_v26 }
 0x76a   :  { %v5743_v3 = vpop.eup %5742  ;;  %v4122_v17 = vadd.f32 %v5737_v27, %v4121_v41  ;;  %5748 = vrcp.f32 %v3950_v57  ;;  %v4145_v9 = vor.u32 1.1754944e-38, %v4144_v2  ;;  %v4157_v35 = vand.u32 2147483647, %v3950_v57 }
 0x76b   :  { %v3886_v52 = vpop.f32.mrf.mxu2  ;;  %vm3807_vm14 = vweird.f32 %v5743_v3  ;;  %v4159_v46 = vand.u32 2147483648, %v3950_v57  ;;  %vm4143_vm6 = vcmp.eq.f32.partialorder %v4142_v51, 8.507059e+37  ;;  %vm4153_vm7 = vweird.f32 %v3950_v57 }
 0x76c   :  { %v3887_v42 = vadd.f32 %v7800_v43, %v3886_v52  ;;  %v3802_v43 = vmul.f32 %v5743_v3, %v3575_v34  ;;  %v4126_v19 = vsel %vm4125_vm12, %v5737_v27, %v4122_v17  ;;  %vm3808_vm0 = vmor %vm3806_vm15, %vm3807_vm14  ;;  %vm4158_vm9 = vcmp.eq.f32.partialorder %v4157_v35, 8.507059e+37 }
 0x76d   :  { %v4131_v18 = vsel %vm4128_vm13, %v4130_v38, %v4126_v19  ;;  %v4160_v61 = vor.u32 1.1754944e-38, %v4159_v46 }
 0x76e   :  { %v4962_v39 = vmul.f32 -1.442695, %v3887_v42  ;;  %v5745_v59 = vpop.eup %5744  ;;  %v3803_v4 = vsub.f32 1.0, %v3802_v43  ;;  %4204 = vst [vmem:[#allocation2 + $0xd8] sm:$0xff] %v4131_v18 }
 0x76f   :  { %v7844_v40 = vadd.f32 1.0, %v5745_v59  ;;  %v5747_v47 = vpop.eup %5746 }
 0x770   :  { %5750 = vpow2.f32 %v4962_v39  ;;  %v3804_v13 = vmul.f32 %v5743_v3, %v3803_v4  ;;  %v4134_v49 = vmul.f32 %v5747_v47, %v7837_v26  ;;  %v5749_v36 = vpop.eup %5748  ;;  %vm4139_vm2 = vweird.f32 %v5747_v47 }
 0x771   :  { %5752 = vrcp.f32 %v7844_v40  ;;  %v4149_v33 = vmul.f32 %v5749_v36, %v3950_v57  ;;  %vm4140_vm4 = vmor %vm4138_vm3, %vm4139_vm2  ;;  %vm4154_vm5 = vweird.f32 %v5749_v36  ;;  %v4174_v16 = vand.u32 2147483648, %v7844_v40 }
 0x772   :  { %v3805_v62 = vadd.f32 %v5743_v3, %v3804_v13  ;;  %v4135_v56 = vsub.f32 1.0, %v4134_v49  ;;  %vm4155_vm8 = vmor %vm4153_vm7, %vm4154_vm5  ;;  %v4172_v37 = vand.u32 2147483647, %v7844_v40  ;;  %vm4168_vm11 = vweird.f32 %v7844_v40 }
 0x773   :  { %v4150_v55 = vsub.f32 1.0, %v4149_v33  ;;  %v4175_v1 = vor.u32 1.1754944e-38, %v4174_v16 }
 0x774   :  { %v3809_v12 = vsel %vm3808_vm0, %v5743_v3, %v3805_v62  ;;  %v4136_v10 = vmul.f32 %v5747_v47, %v4135_v56  ;;  %vm4173_vm13 = vcmp.eq.f32.partialorder %v4172_v37, 8.507059e+37 }
 0x775   :  { %v3814_v60 = vsel %vm3811_vm1, %v3813_v44, %v3809_v12  ;;  %v4151_v24 = vmul.f32 %v5749_v36, %v4150_v55 }
 0x776   :  { %v5751_v30 = vpop.eup %5750  ;;  %3831 = vst [vmem:[#allocation2 + $0x78] sm:$0xff] %v3814_v60  ;;  %v4137_v31 = vadd.f32 %v5747_v47, %v4136_v10 }
 0x777   :  { %v3952_v5 = vadd.f32 1.0, %v5751_v30  ;;  %v5753_v20 = vpop.eup %5752  ;;  %v4152_v23 = vadd.f32 %v5749_v36, %v4151_v24 }
 0x778   :  { %v4164_v48 = vmul.f32 %v5753_v20, %v7844_v40  ;;  %v4141_v11 = vsel %vm4140_vm4, %v5747_v47, %v4137_v31  ;;  %vm4169_vm10 = vweird.f32 %v5753_v20 }
 0x779   :  { %5754 = vrcp.f32 %v3952_v5  ;;  %v4146_v21 = vsel %vm4143_vm6, %v4145_v9, %v4141_v11  ;;  %v4156_v14 = vsel %vm4155_vm8, %v5749_v36, %v4152_v23  ;;  %vm4170_vm12 = vmor %vm4168_vm11, %vm4169_vm10  ;;  %v4189_v6 = vand.u32 2147483648, %v3952_v5 }
 0x77a   :  { %v4165_v58 = vsub.f32 1.0, %v4164_v48  ;;  %4205 = vst [vmem:[#allocation2 + $0xe0] sm:$0xff] %v4146_v21  ;;  %v4161_v29 = vsel %vm4158_vm9, %v4160_v61, %v4156_v14  ;;  %v4187_v52 = vand.u32 2147483647, %v3952_v5  ;;  %vm4183_vm15 = vweird.f32 %v3952_v5 }
 0x77b   :  { %4206 = vst [vmem:[#allocation2 + $0xe8] sm:$0xff] %v4161_v29  ;;  %v4190_v53 = vor.u32 1.1754944e-38, %v4189_v6 }
 0x77c   :  { %v4166_v63 = vmul.f32 %v5753_v20, %v4165_v58  ;;  %vm4188_vm1 = vcmp.eq.f32.partialorder %v4187_v52, 8.507059e+37 }
 0x77e   :  { %v4167_v34 = vadd.f32 %v5753_v20, %v4166_v63 }
 0x77f   :  { %v5755_v32 = vpop.eup %5754 }
 0x780   :  { %v4179_v27 = vmul.f32 %v5755_v32, %v3952_v5  ;;  %v4171_v15 = vsel %vm4170_vm12, %v5753_v20, %v4167_v34  ;;  %vm4184_vm14 = vweird.f32 %v5755_v32 }
 0x781   :  { %v4176_v7 = vsel %vm4173_vm13, %v4175_v1, %v4171_v15  ;;  %vm4185_vm0 = vmor %vm4183_vm15, %vm4184_vm14 }
 0x782   :  { %v4180_v8 = vsub.f32 1.0, %v4179_v27  ;;  %4207 = vst [vmem:[#allocation2 + $0xf0] sm:$0xff] %v4176_v7 }
 0x784   :  { %v4181_v0 = vmul.f32 %v5755_v32, %v4180_v8 }
 0x786   :  { %v4182_v50 = vadd.f32 %v5755_v32, %v4181_v0 }
 0x788   :  { %v4186_v26 = vsel %vm4185_vm0, %v5755_v32, %v4182_v50 }
 0x789   :  { %v4191_v42 = vsel %vm4188_vm1, %v4190_v53, %v4186_v26 }
 0x78a   :  { %4208 = vst [vmem:[#allocation2 + $0xf8] sm:$0xff] %v4191_v42 }
 0x78b   :  { %4221 = dma.vmem_to_hbm [thread:$0]  %s4214_s25, 4096, %s4216_s28, [#allocation3], %s5804_s1, %s5804_s1, %s5805_s2  }
 0x78c   :  { %5800 = dma.done.wait [#allocation3], 4096  }
 0x78d   :  { %5801 = vsyncadd [#allocation3], 4294963200 }
 0x78e   :  { %4226 = vsyncpa [#allocation3], 1 }

</bundles_post_ra>
